<compile_context>
chip_gen: v7x
topology: tpu7x:2x2x1
jax: 0.10.0
libtpu: 0.0.40
codegen_flags: <defaults>
</compile_context>

<pallas_src>
import functools

import jax
import jax.numpy as jnp
from jax.experimental import pallas as pl
from jax.experimental.pallas import tpu as pltpu


_KL_ROWS = 8  # sublane-aligned rows reserved for per-layer KL partial sums (L <= 8)


# ---------------------------------------------------------------------------
# Fused kernel: student MLP + teacher MLP + masked KL, one token tile per step
# ---------------------------------------------------------------------------
def _fused_kd_kernel(x_ref, mask_ref, ws_s_ref, ws_t_ref, o_ref, kl_ref):
    # x_ref    : [TM, H]    bf16 input tokens (shared LHS for student & teacher)
    # mask_ref : [TM, 1]    f32 non-pad mask (1.0 = keep token)
    # ws_*_ref : [L, H, H]  bf16 stacked per-layer weights
    # o_ref    : [TM, H]    f32 final student activations (org_output tile)
    # kl_ref   : [1, 8, 128] f32, row l holds layer l's masked-KL partial sum
    L = ws_s_ref.shape[0]
    h_s = x_ref[...]
    h_t = x_ref[...]
    mask = mask_ref[...]  # [TM, 1] f32

    partials = []
    s = None
    for l in range(L):  # static unroll over wrapped layers
        # MXU matmuls: bf16 inputs, f32 accumulation. tanh stays f32 (VPU/EUP).
        s = jnp.tanh(jnp.dot(h_s, ws_s_ref[l], preferred_element_type=jnp.float32))
        t = jnp.tanh(jnp.dot(h_t, ws_t_ref[l], preferred_element_type=jnp.float32))

        # log-sum-exp (max-subtracted) for student / teacher logits
        s_max = jnp.max(s, axis=-1, keepdims=True)
        s_lse = jnp.log(jnp.sum(jnp.exp(s - s_max), axis=-1, keepdims=True)) + s_max
        t_max = jnp.max(t, axis=-1, keepdims=True)
        t_exp = jnp.exp(t - t_max)
        t_sum = jnp.sum(t_exp, axis=-1, keepdims=True)
        t_lse = jnp.log(t_sum) + t_max
        p_t = t_exp * pl.reciprocal(t_sum, approx=True)  # teacher softmax, EUP divide

        # KL(teacher || student) per token, simplified:
        #   sum_h p_t*(logp_t - logp_s) = sum_h p_t*(t - s) - (t_lse - s_lse)
        kl_tok = jnp.sum(p_t * (t - s), axis=-1, keepdims=True) - (t_lse - s_lse)
        partials.append(jnp.sum(mask * kl_tok))  # masked partial numerator (scalar)

        # carry activations to next layer (bf16 for the MXU)
        h_s = s.astype(x_ref.dtype)
        h_t = t.astype(x_ref.dtype)

    o_ref[...] = s.astype(o_ref.dtype)

    # Lane-dense partial-sum output: row l (broadcast across 128 lanes) = layer l.
    row = jax.lax.broadcasted_iota(jnp.int32, (1, _KL_ROWS, 128), 1)
    out = jnp.zeros((1, _KL_ROWS, 128), jnp.float32)
    for l, p in enumerate(partials):
        out = jnp.where(row == l, p, out)
    kl_ref[...] = out


# ---------------------------------------------------------------------------
# Student-only kernel (kd_enabled=False path)
# ---------------------------------------------------------------------------
def _student_mlp_kernel(x_ref, ws_ref, o_ref):
    h = x_ref[...]
    s = None
    for l in range(ws_ref.shape[0]):
        s = jnp.tanh(jnp.dot(h, ws_ref[l], preferred_element_type=jnp.float32))
        h = s.astype(x_ref.dtype)
    o_ref[...] = s.astype(o_ref.dtype)


def _pick_tile(m, cap=256):
    for tm in (cap, 128, 64, 32, 16, 8):
        if tm <= cap and m % tm == 0:
            return tm
    raise ValueError(f"token count {m} must be a multiple of 8")
    # TODO(synk): pad ragged token counts to a multiple of 8 instead of asserting.


# ---------------------------------------------------------------------------
# KDModelWrapper.forward equivalent
# ---------------------------------------------------------------------------
@functools.partial(jax.jit, static_argnames=("kd_enabled", "tile_m"))
def kd_model_wrapper_forward(x, attention_mask, student_ws, teacher_ws,
                             kd_enabled=True, tile_m=256):
    B, S, H = x.shape
    L = student_ws.shape[0]
    M = B * S
    assert H % 128 == 0, "pad hidden dim to a multiple of 128 (lane width)"
    assert L <= _KL_ROWS
    tm = _pick_tile(M, cap=min(tile_m, M))
    grid = (M // tm,)

    x2d = x.reshape(M, H).astype(jnp.bfloat16)
    ws_s = student_ws.astype(jnp.bfloat16)

    cparams = pltpu.CompilerParams(
        dimension_semantics=("parallel",),          # shard token tiles across TCs (v7x)
        vmem_limit_bytes=32 * 1024 * 1024,          # explicit, safe on v5e/v6e/v7x
    )

    if not kd_enabled:
        # if not self.kd_enabled: return self.student_model(*args, **kwargs)
        org_flat = pl.pallas_call(
            _student_mlp_kernel,
            out_shape=jax.ShapeDtypeStruct((M, H), jnp.float32),
            grid=grid,
            in_specs=[
                pl.BlockSpec((tm, H), lambda i: (i, 0)),
                pl.BlockSpec((L, H, H), lambda i: (0, 0, 0)),
            ],
            out_specs=pl.BlockSpec((tm, H), lambda i: (i, 0)),
            compiler_params=cparams,
        )(x2d, ws_s)
        return org_flat.reshape(B, S, H), jnp.zeros((1,), jnp.float32)

    # with torch.no_grad(): teacher_model(...)
    ws_t = jax.lax.stop_gradient(teacher_ws).astype(jnp.bfloat16)
    # nonpad_tokens = kwargs['attention_mask'] == 1
    mask2d = (attention_mask == 1).astype(jnp.float32).reshape(M, 1)

    org_flat, kl_parts = pl.pallas_call(
        _fused_kd_kernel,
        out_shape=(
            jax.ShapeDtypeStruct((M, H), jnp.float32),
            jax.ShapeDtypeStruct((grid[0], _KL_ROWS, 128), jnp.float32),
        ),
        grid=grid,
        in_specs=[
            pl.BlockSpec((tm, H), lambda i: (i, 0)),
            pl.BlockSpec((tm, 1), lambda i: (i, 0)),
            pl.BlockSpec((L, H, H), lambda i: (0, 0, 0)),
            pl.BlockSpec((L, H, H), lambda i: (0, 0, 0)),
        ],
        out_specs=(
            pl.BlockSpec((tm, H), lambda i: (i, 0)),
            pl.BlockSpec((1, _KL_ROWS, 128), lambda i: (i, 0, 0)),
        ),
        compiler_params=cparams,
    )(x2d, mask2d, ws_s, ws_t)

    # den is identical across layers -> computed once; guarded against all-padding.
    den = jnp.maximum(jnp.sum(mask2d), 1.0)
    kl_num = jnp.sum(kl_parts[:, :L, 0], axis=0)        # [L] layerwise numerators
    layerwise_comps = kl_num / den
    # self.kd_last_comparison = torch.stack(layerwise_comps).mean()  (buffer, shape (1,))
    kd_last_comparison = jnp.mean(layerwise_comps).reshape(1)
    return org_flat.reshape(B, S, H), kd_last_comparison


# TODO(synk): state_dict / load_state_dict / named_modules / save hooks / train are
# Python-side module plumbing with no kernel equivalent; not translated.


# ---------------------------------------------------------------------------
# Pure-JAX reference (mirrors the kernel's bf16 matmul casts) for validation
# ---------------------------------------------------------------------------
def _reference(x, attention_mask, ws_s, ws_t):
    B, S, H = x.shape
    h_s = x.reshape(B * S, H).astype(jnp.bfloat16)
    h_t = h_s
    mask = (attention_mask.reshape(-1) == 1).astype(jnp.float32)
    den = jnp.maximum(jnp.sum(mask), 1.0)
    comps = []
    s = None
    for l in range(ws_s.shape[0]):
        s = jnp.tanh(jnp.dot(h_s, ws_s[l].astype(jnp.bfloat16),
                             preferred_element_type=jnp.float32))
        t = jnp.tanh(jnp.dot(h_t, ws_t[l].astype(jnp.bfloat16),
                             preferred_element_type=jnp.float32))
        s_logp = jax.nn.log_softmax(s, axis=-1)
        t_logp = jax.nn.log_softmax(t, axis=-1)
        p_t = jnp.exp(t_logp)
        kl_tok = jnp.sum(p_t * (t_logp - s_logp), axis=-1)
        comps.append(jnp.sum(mask * kl_tok) / den)
        h_s = s.astype(jnp.bfloat16)
        h_t = t.astype(jnp.bfloat16)
    return s.reshape(B, S, H), jnp.mean(jnp.stack(comps)).reshape(1)


if __name__ == "__main__":
    B, S, H, L = 4, 128, 128, 2  # batch, seq, hidden (lane-dense), wrapped layers

    key = jax.random.PRNGKey(0)
    kx, ks, kt = jax.random.split(key, 3)

    x = jax.random.normal(kx, (B, S, H), dtype=jnp.float32)
    student_ws = jax.random.normal(ks, (L, H, H), dtype=jnp.float32) * 0.1
    teacher_ws = jax.random.normal(kt, (L, H, H), dtype=jnp.float32) * 0.1

    # attention_mask: some trailing tokens of batch elements 1 and 3 are padding.
    attention_mask = jnp.ones((B, S), dtype=jnp.int32)
    attention_mask = attention_mask.at[1, -16:].set(0)
    attention_mask = attention_mask.at[3, -5:].set(0)

    org_output, kd_last_comparison = kd_model_wrapper_forward(
        x, attention_mask, student_ws, teacher_ws, kd_enabled=True)
    jax.block_until_ready((org_output, kd_last_comparison))

    ref_out, ref_cmp = _reference(x, attention_mask, student_ws, teacher_ws)

    assert org_output.shape == (B, S, H)
    assert kd_last_comparison.shape == (1,)
    assert bool(jnp.isfinite(kd_last_comparison).all())
    assert bool(jnp.allclose(org_output, ref_out, atol=2e-3, rtol=2e-3))
    assert bool(jnp.allclose(kd_last_comparison, ref_cmp, rtol=2e-2, atol=1e-4))

    # kd_enabled=False path: student-only kernel, comparison buffer stays zero.
    org2, cmp2 = kd_model_wrapper_forward(
        x, attention_mask, student_ws, teacher_ws, kd_enabled=False)
    jax.block_until_ready((org2, cmp2))
    assert bool(jnp.allclose(org2, org_output, atol=1e-5))
    assert bool(jnp.allclose(cmp2, 0.0))

    print("KERNEL_OK")
</pallas_src>

<mosaic_0001>
module attributes {stable_mosaic.version = 11 : i64} {
  func.func @_fused_kd_kernel(%arg0: i32, %arg1: memref<256x128xbf16, #tpu.memory_space<vmem>>, %arg2: memref<256x1xf32, #tpu.memory_space<vmem>>, %arg3: memref<2x128x128xbf16, #tpu.memory_space<vmem>>, %arg4: memref<2x128x128xbf16, #tpu.memory_space<vmem>>, %arg5: memref<256x128xf32, #tpu.memory_space<vmem>>, %arg6: memref<1x8x128xf32, #tpu.memory_space<vmem>>) attributes {dimension_semantics = [#tpu.dimension_semantics<parallel>], iteration_bounds = array<i64: 2>, scalar_prefetch = 0 : i64, scratch_operands = 0 : i64, tpu.core_type = #tpu.core_type<tc>, window_params = [{transform_indices = @transform_0, window_bounds = array<i64: 256, 128>}, {transform_indices = @transform_1, window_bounds = array<i64: 256, 1>}, {pipeline_mode = #tpu.pipeline_mode<synchronous>, transform_indices = @transform_2, window_bounds = array<i64: 2, 128, 128>}, {pipeline_mode = #tpu.pipeline_mode<synchronous>, transform_indices = @transform_3, window_bounds = array<i64: 2, 128, 128>}, {transform_indices = @transform_4, window_bounds = array<i64: 256, 128>}, {transform_indices = @transform_5, window_bounds = array<i64: 1, 8, 128>}]} {
    %c0 = arith.constant 0 : index
    %c0_0 = arith.constant 0 : index
    %0 = vector.load %arg1[%c0, %c0_0] : memref<256x128xbf16, #tpu.memory_space<vmem>>, vector<256x128xbf16>
    %c0_1 = arith.constant 0 : index
    %c0_2 = arith.constant 0 : index
    %1 = vector.load %arg1[%c0_1, %c0_2] : memref<256x128xbf16, #tpu.memory_space<vmem>>, vector<256x128xbf16>
    %c0_3 = arith.constant 0 : index
    %c0_4 = arith.constant 0 : index
    %2 = vector.load %arg2[%c0_3, %c0_4] : memref<256x1xf32, #tpu.memory_space<vmem>>, vector<256x1xf32>
    %c0_5 = arith.constant 0 : index
    %c0_6 = arith.constant 0 : index
    %c0_7 = arith.constant 0 : index
    %3 = vector.load %arg3[%c0_5, %c0_6, %c0_7] : memref<2x128x128xbf16, #tpu.memory_space<vmem>>, vector<1x128x128xbf16>
    %4 = vector.shape_cast %3 : vector<1x128x128xbf16> to vector<128x128xbf16>
    %cst = arith.constant dense<0.000000e+00> : vector<256x128xf32>
    %5 = tpu.matmul %0, %4, %cst {dimension_numbers = #tpu.dot_dimension_numbers<[1], [0], [0], [1], [0, 0, 1, 1], [], []>} : vector<256x128xbf16>, vector<128x128xbf16>, vector<256x128xf32> -> vector<256x128xf32>
    %6 = math.tanh %5 : vector<256x128xf32>
    %c0_8 = arith.constant 0 : index
    %c0_9 = arith.constant 0 : index
    %c0_10 = arith.constant 0 : index
    %7 = vector.load %arg4[%c0_8, %c0_9, %c0_10] : memref<2x128x128xbf16, #tpu.memory_space<vmem>>, vector<1x128x128xbf16>
    %8 = vector.shape_cast %7 : vector<1x128x128xbf16> to vector<128x128xbf16>
    %cst_11 = arith.constant dense<0.000000e+00> : vector<256x128xf32>
    %9 = tpu.matmul %1, %8, %cst_11 {dimension_numbers = #tpu.dot_dimension_numbers<[1], [0], [0], [1], [0, 0, 1, 1], [], []>} : vector<256x128xbf16>, vector<128x128xbf16>, vector<256x128xf32> -> vector<256x128xf32>
    %10 = math.tanh %9 : vector<256x128xf32>
    %cst_12 = arith.constant dense<0xFF800000> : vector<256xf32>
    %11 = vector.multi_reduction <maximumf>, %6, %cst_12 [1] : vector<256x128xf32> to vector<256xf32>
    %12 = vector.shape_cast %11 : vector<256xf32> to vector<256x1xf32>
    %13 = vector.broadcast %12 : vector<256x1xf32> to vector<256x128xf32>
    %14 = arith.subf %6, %13 : vector<256x128xf32>
    %15 = math.exp %14 : vector<256x128xf32>
    %cst_13 = arith.constant dense<0.000000e+00> : vector<256xf32>
    %16 = vector.multi_reduction <add>, %15, %cst_13 [1] : vector<256x128xf32> to vector<256xf32>
    %17 = vector.shape_cast %16 : vector<256xf32> to vector<256x1xf32>
    %18 = math.log %17 : vector<256x1xf32>
    %19 = arith.addf %18, %12 : vector<256x1xf32>
    %cst_14 = arith.constant dense<0xFF800000> : vector<256xf32>
    %20 = vector.multi_reduction <maximumf>, %10, %cst_14 [1] : vector<256x128xf32> to vector<256xf32>
    %21 = vector.shape_cast %20 : vector<256xf32> to vector<256x1xf32>
    %22 = vector.broadcast %21 : vector<256x1xf32> to vector<256x128xf32>
    %23 = arith.subf %10, %22 : vector<256x128xf32>
    %24 = math.exp %23 : vector<256x128xf32>
    %cst_15 = arith.constant dense<0.000000e+00> : vector<256xf32>
    %25 = vector.multi_reduction <add>, %24, %cst_15 [1] : vector<256x128xf32> to vector<256xf32>
    %26 = vector.shape_cast %25 : vector<256xf32> to vector<256x1xf32>
    %27 = math.log %26 : vector<256x1xf32>
    %28 = arith.addf %27, %21 : vector<256x1xf32>
    %29 = tpu.reciprocal %26 {approx = true} : vector<256x1xf32> -> vector<256x1xf32>
    %30 = vector.broadcast %29 : vector<256x1xf32> to vector<256x128xf32>
    %31 = arith.mulf %24, %30 : vector<256x128xf32>
    %32 = arith.subf %10, %6 : vector<256x128xf32>
    %33 = arith.mulf %31, %32 : vector<256x128xf32>
    %cst_16 = arith.constant dense<0.000000e+00> : vector<256xf32>
    %34 = vector.multi_reduction <add>, %33, %cst_16 [1] : vector<256x128xf32> to vector<256xf32>
    %35 = vector.shape_cast %34 : vector<256xf32> to vector<256x1xf32>
    %36 = arith.subf %28, %19 : vector<256x1xf32>
    %37 = arith.subf %35, %36 : vector<256x1xf32>
    %38 = arith.mulf %2, %37 : vector<256x1xf32>
    %39 = vector.shape_cast %38 : vector<256x1xf32> to vector<1x256x1xf32>
    %cst_17 = arith.constant dense<0.000000e+00> : vector<1xf32>
    %40 = vector.multi_reduction <add>, %39, %cst_17 [1, 2] : vector<1x256x1xf32> to vector<1xf32>
    %41 = vector.shape_cast %40 : vector<1xf32> to vector<1x1x1xf32>
    %42 = vector.extract %41[0, 0, 0] : f32 from vector<1x1x1xf32>
    %43 = arith.truncf %6 : vector<256x128xf32> to vector<256x128xbf16>
    %44 = arith.truncf %10 : vector<256x128xf32> to vector<256x128xbf16>
    %c1 = arith.constant 1 : index
    %c0_18 = arith.constant 0 : index
    %c0_19 = arith.constant 0 : index
    %45 = vector.load %arg3[%c1, %c0_18, %c0_19] : memref<2x128x128xbf16, #tpu.memory_space<vmem>>, vector<1x128x128xbf16>
    %46 = vector.shape_cast %45 : vector<1x128x128xbf16> to vector<128x128xbf16>
    %cst_20 = arith.constant dense<0.000000e+00> : vector<256x128xf32>
    %47 = tpu.matmul %43, %46, %cst_20 {dimension_numbers = #tpu.dot_dimension_numbers<[1], [0], [0], [1], [0, 0, 1, 1], [], []>} : vector<256x128xbf16>, vector<128x128xbf16>, vector<256x128xf32> -> vector<256x128xf32>
    %48 = math.tanh %47 : vector<256x128xf32>
    %c1_21 = arith.constant 1 : index
    %c0_22 = arith.constant 0 : index
    %c0_23 = arith.constant 0 : index
    %49 = vector.load %arg4[%c1_21, %c0_22, %c0_23] : memref<2x128x128xbf16, #tpu.memory_space<vmem>>, vector<1x128x128xbf16>
    %50 = vector.shape_cast %49 : vector<1x128x128xbf16> to vector<128x128xbf16>
    %cst_24 = arith.constant dense<0.000000e+00> : vector<256x128xf32>
    %51 = tpu.matmul %44, %50, %cst_24 {dimension_numbers = #tpu.dot_dimension_numbers<[1], [0], [0], [1], [0, 0, 1, 1], [], []>} : vector<256x128xbf16>, vector<128x128xbf16>, vector<256x128xf32> -> vector<256x128xf32>
    %52 = math.tanh %51 : vector<256x128xf32>
    %cst_25 = arith.constant dense<0xFF800000> : vector<256xf32>
    %53 = vector.multi_reduction <maximumf>, %48, %cst_25 [1] : vector<256x128xf32> to vector<256xf32>
    %54 = vector.shape_cast %53 : vector<256xf32> to vector<256x1xf32>
    %55 = vector.broadcast %54 : vector<256x1xf32> to vector<256x128xf32>
    %56 = arith.subf %48, %55 : vector<256x128xf32>
    %57 = math.exp %56 : vector<256x128xf32>
    %cst_26 = arith.constant dense<0.000000e+00> : vector<256xf32>
    %58 = vector.multi_reduction <add>, %57, %cst_26 [1] : vector<256x128xf32> to vector<256xf32>
    %59 = vector.shape_cast %58 : vector<256xf32> to vector<256x1xf32>
    %60 = math.log %59 : vector<256x1xf32>
    %61 = arith.addf %60, %54 : vector<256x1xf32>
    %cst_27 = arith.constant dense<0xFF800000> : vector<256xf32>
    %62 = vector.multi_reduction <maximumf>, %52, %cst_27 [1] : vector<256x128xf32> to vector<256xf32>
    %63 = vector.shape_cast %62 : vector<256xf32> to vector<256x1xf32>
    %64 = vector.broadcast %63 : vector<256x1xf32> to vector<256x128xf32>
    %65 = arith.subf %52, %64 : vector<256x128xf32>
    %66 = math.exp %65 : vector<256x128xf32>
    %cst_28 = arith.constant dense<0.000000e+00> : vector<256xf32>
    %67 = vector.multi_reduction <add>, %66, %cst_28 [1] : vector<256x128xf32> to vector<256xf32>
    %68 = vector.shape_cast %67 : vector<256xf32> to vector<256x1xf32>
    %69 = math.log %68 : vector<256x1xf32>
    %70 = arith.addf %69, %63 : vector<256x1xf32>
    %71 = tpu.reciprocal %68 {approx = true} : vector<256x1xf32> -> vector<256x1xf32>
    %72 = vector.broadcast %71 : vector<256x1xf32> to vector<256x128xf32>
    %73 = arith.mulf %66, %72 : vector<256x128xf32>
    %74 = arith.subf %52, %48 : vector<256x128xf32>
    %75 = arith.mulf %73, %74 : vector<256x128xf32>
    %cst_29 = arith.constant dense<0.000000e+00> : vector<256xf32>
    %76 = vector.multi_reduction <add>, %75, %cst_29 [1] : vector<256x128xf32> to vector<256xf32>
    %77 = vector.shape_cast %76 : vector<256xf32> to vector<256x1xf32>
    %78 = arith.subf %70, %61 : vector<256x1xf32>
    %79 = arith.subf %77, %78 : vector<256x1xf32>
    %80 = arith.mulf %2, %79 : vector<256x1xf32>
    %81 = vector.shape_cast %80 : vector<256x1xf32> to vector<1x256x1xf32>
    %cst_30 = arith.constant dense<0.000000e+00> : vector<1xf32>
    %82 = vector.multi_reduction <add>, %81, %cst_30 [1, 2] : vector<1x256x1xf32> to vector<1xf32>
    %83 = vector.shape_cast %82 : vector<1xf32> to vector<1x1x1xf32>
    %84 = vector.extract %83[0, 0, 0] : f32 from vector<1x1x1xf32>
    %c0_31 = arith.constant 0 : index
    %c0_32 = arith.constant 0 : index
    %85 = vector.load %arg5[%c0_31, %c0_32] : memref<256x128xf32, #tpu.memory_space<vmem>>, vector<256x128xf32>
    tpu.vector_store %arg5[%c0_31, %c0_32], %48 {strides = array<i32>} : memref<256x128xf32, #tpu.memory_space<vmem>>, vector<256x128xf32>,
    %86 = tpu.iota {dimensions = array<i32: 1>} : vector<1x8x128xi32>
    %cst_33 = arith.constant 0.000000e+00 : f32
    %87 = vector.broadcast %cst_33 : f32 to vector<1x8x128xf32>
    %c0_i32 = arith.constant 0 : i32
    %88 = vector.broadcast %c0_i32 : i32 to vector<1x8x128xi32>
    %89 = arith.cmpi eq, %86, %88 : vector<1x8x128xi32>
    %90 = vector.broadcast %42 : f32 to vector<1x8x128xf32>
    %91 = arith.select %89, %90, %87 : vector<1x8x128xi1>, vector<1x8x128xf32>
    %c1_i32 = arith.constant 1 : i32
    %92 = vector.broadcast %c1_i32 : i32 to vector<1x8x128xi32>
    %93 = arith.cmpi eq, %86, %92 : vector<1x8x128xi32>
    %94 = vector.broadcast %84 : f32 to vector<1x8x128xf32>
    %95 = arith.select %93, %94, %91 : vector<1x8x128xi1>, vector<1x8x128xf32>
    %c0_34 = arith.constant 0 : index
    %c0_35 = arith.constant 0 : index
    %c0_36 = arith.constant 0 : index
    %96 = vector.load %arg6[%c0_34, %c0_35, %c0_36] : memref<1x8x128xf32, #tpu.memory_space<vmem>>, vector<1x8x128xf32>
    tpu.vector_store %arg6[%c0_34, %c0_35, %c0_36], %95 {strides = array<i32>} : memref<1x8x128xf32, #tpu.memory_space<vmem>>, vector<1x8x128xf32>,
    return
  }
  func.func @transform_0(%arg0: i32) -> (i32, i32) {
    %c0_i32 = arith.constant 0 : i32
    %c0_i32_0 = arith.constant 0 : i32
    return %arg0, %c0_i32 : i32, i32
  }
  func.func @transform_1(%arg0: i32) -> (i32, i32) {
    %c0_i32 = arith.constant 0 : i32
    %c0_i32_0 = arith.constant 0 : i32
    return %arg0, %c0_i32 : i32, i32
  }
  func.func @transform_2(%arg0: i32) -> (i32, i32, i32) {
    %c0_i32 = arith.constant 0 : i32
    %c0_i32_0 = arith.constant 0 : i32
    %c0_i32_1 = arith.constant 0 : i32
    %c0_i32_2 = arith.constant 0 : i32
    return %c0_i32, %c0_i32_0, %c0_i32_1 : i32, i32, i32
  }
  func.func @transform_3(%arg0: i32) -> (i32, i32, i32) {
    %c0_i32 = arith.constant 0 : i32
    %c0_i32_0 = arith.constant 0 : i32
    %c0_i32_1 = arith.constant 0 : i32
    %c0_i32_2 = arith.constant 0 : i32
    return %c0_i32, %c0_i32_0, %c0_i32_1 : i32, i32, i32
  }
  func.func @transform_4(%arg0: i32) -> (i32, i32) {
    %c0_i32 = arith.constant 0 : i32
    %c0_i32_0 = arith.constant 0 : i32
    return %arg0, %c0_i32 : i32, i32
  }
  func.func @transform_5(%arg0: i32) -> (i32, i32, i32) {
    %c0_i32 = arith.constant 0 : i32
    %c0_i32_0 = arith.constant 0 : i32
    %c0_i32_1 = arith.constant 0 : i32
    return %arg0, %c0_i32, %c0_i32_0 : i32, i32, i32
  }
}

</mosaic_0001>

<bundles_post_ra>
// kernel: kd_model_wrapper_forward.1
= control target key start
LH: loop header
LB: loop body
LE: loop exit
PB: predicated region body
PF: predicated region fallthrough
CT: control target
= control target key end

     0   :  { %11 = vsyncpa [#allocation3], 0  ;;  %s7947_s0 = inlined_call_operand.vmem [shape: bf16[512,128], index: 0, kind: input, shape index: {}]   ;;  %s7948_s1 = inlined_call_operand.vmem [shape: f32[512,1], index: 1, kind: input, shape index: {}]   ;;  %s7949_s2 = inlined_call_operand.vmem [shape: bf16[2,128,128], index: 2, kind: input, shape index: {}]   ;;  %s7950_s3 = inlined_call_operand.vmem [shape: bf16[2,128,128], index: 3, kind: input, shape index: {}]   ;;  %s7951_s4 = inlined_call_operand.hbm [shape: f32[512,128], index: 4, kind: output, shape index: {0}]   ;;  %s7952_s5 = inlined_call_operand.vmem [shape: f32[2,8,128], index: 5, kind: output, shape index: {1}]  }
   0x1   :  { %13 = vsyncpa [#allocation3 + $0x1], 0  ;;  %s5198_s18 = smov 0   ;;  %s5200_s19 = smov 0  }
   0x2   :  { %s5202_s20 = smov 0   ;;  %s5204_s21 = smov 0  }
   0x3 LB: > { %s5219_s22 = sadd.s32 4294967295, %s5163_s21   ;;  %s3643_s23 = sadd.s32 4294967294, %s5163_s21   ;;  %s5163_s21 = sphi %s5204_s21, %s9101_s21   ;;  %s5159_s20 = sphi %s5202_s20, %s9100_s20   ;;  %s5155_s19 = sphi %s5200_s19, %s9099_s19   ;;  %s5151_s18 = sphi %s5198_s18, %s9098_s18  }
   0x4   : > { %s5223_s24 = sadd.s32 1, %s5163_s21   ;;  %s120_s25 = sadd.s32 1, %s5159_s20 }
   0x5   : > { %s117_s26 = ssub.s32 %s5163_s21, %s5223_s24  ;;  %p130_p0 = scmp.ne.s32.totalorder %s5159_s20, %s5155_s19 }
   0x6   : > { %p118_p1 = scmp.eq.s32.totalorder %s117_s26, 0  ;;  %p131_p2 = scmp.eq.s32.totalorder %s5219_s22, 1 }
   0x7   : > { %p136_p3 = scmp.ne.s32.totalorder %s5155_s19, %s5151_s18  ;;  %p137_p4 = scmp.eq.s32.totalorder %s3643_s23, 1 }
   0x8   : > { %s5234_s27 = scalar_select %p118_p1, %s5159_s20, %s120_s25  }
   0x9   : > { %p5236_p5 = por %p131_p2, %p130_p0  ;;  %p5240_p6 = por %p137_p4, %p136_p3 }
   0xa   : > { %p3646_p7 = scmp.ge.s32.totalorder %s5163_s21, 1  ;;  %p205_p8 = scmp.lt.s32.totalorder %s5163_s21, 3 }
   0xc   : > { %p206_p9 = pnand %p3646_p7, %p205_p8 }
   0xe   : > { %209 = sbr.rel (%p206_p9) target bundleno = 1406 (0x57e), region = 36 }
  0x15   : > { %v4072_v0 = vld [vmem:[%s7949_s2] sm:$0xff]   ;;  %s3648_s7 = sshll.u32 %s5219_s22, 5  ;;  %v4074_v2 = vld [vmem:[%s7949_s2 + $0x8] sm:$0xff]   ;;  %v4076_v4 = vld [vmem:[%s7949_s2 + $0x10] sm:$0xff]   ;;  %s233_s16 = sand.u32 1, %s5155_s19   ;;  %vm1862_vm0 = vcmask 7168  }
  0x16   : > { %v4073_v1 = vld [vmem:[%s7950_s3] sm:$0xff]   ;;  %3835 = vmatprep.subr.bf16.mxu0 %v4072_v0  ;;  %p243_p10 = scmp.lt.s32.totalorder %s3648_s7, 63  ;;  %v4075_v3 = vld [vmem:[%s7950_s3 + $0x8] sm:$0xff]   ;;  %v4077_v5 = vld [vmem:[%s7950_s3 + $0x10] sm:$0xff]   ;;  %s3647_s17 = sshll.u32 %s233_s16, 8 }
  0x17   : > { %3883 = vmatprep.subr.bf16.mxu1 %v4073_v1  ;;  %3836 = vmatpush3.bf16.msra.mxu0 %v4072_v0  ;;  %v4078_v6 = vld [vmem:[%s7949_s2 + $0x18] sm:$0xff]   ;;  %v4080_v8 = vld [vmem:[%s7949_s2 + $0x20] sm:$0xff]   ;;  %v4082_v10 = vld [vmem:[%s7949_s2 + $0x28] sm:$0xff]   ;;  %s5880_s23 = scalar_lea.vmem [#allocation2], %s3647_s17  ;;  %s7901_s11 = scalar_lea.sflag [#allocation3], %s233_s16 }
  0x18   : > { %3884 = vmatpush3.bf16.msra.mxu1 %v4073_v1  ;;  %3837 = vmatprep.subr.bf16.mxu0 %v4074_v2  ;;  %s9103_s7 = smov (!%p243_p10, %s3648_s7), 63  ;;  %v4079_v7 = vld [vmem:[%s7950_s3 + $0x18] sm:$0xff]   ;;  %v4081_v9 = vld [vmem:[%s7950_s3 + $0x20] sm:$0xff]   ;;  %v4083_v12 = vld [vmem:[%s7950_s3 + $0x28] sm:$0xff]   ;;  %s3542_s10 = sshll.u32 %s5880_s23, 4  ;;  %s7897_s10 = int_to_ptr.vmem [resolvable:$true] %s3542_s10 }
  0x19   : > { %3885 = vmatprep.subr.bf16.mxu1 %v4075_v3  ;;  %s3649_s6 = sshll.u32 %s9103_s7, 2  ;;  %v4084_v13 = vld [vmem:[%s7949_s2 + $0x30] sm:$0xff]   ;;  %v4086_v15 = vld [vmem:[%s7949_s2 + $0x38] sm:$0xff]   ;;  %v4104_v19 = vld [vmem:[%s7949_s2 + $0x40] sm:$0xff]   ;;  %s3651_s25 = sshll.u32 %s9103_s7, 3 }
  0x1a   : > { %s5283_s14 = scalar_lea.vmem %s7947_s0, %s3649_s6  ;;  %v4085_v14 = vld [vmem:[%s7950_s3 + $0x30] sm:$0xff]   ;;  %v4087_v16 = vld [vmem:[%s7950_s3 + $0x38] sm:$0xff]   ;;  %v4105_v20 = vld [vmem:[%s7950_s3 + $0x40] sm:$0xff]   ;;  %s7038_s30 = scalar_lea.vmem %s7948_s1, %s3651_s25 }
  0x1b   : > { %3838 = vmatpush3.bf16.msra.mxu0 %v4074_v2  ;;  %v4088_v11 = vld [vmem:[%s5283_s14] sm:$0xff]   ;;  %v4089_v17 = vld [vmem:[%s5283_s14 + $0x8] sm:$0xff]   ;;  %v4090_v18 = vld [vmem:[%s5283_s14 + $0x10] sm:$0xff]   ;;  %s5101_s12 = scalar_lea.vmem %s7897_s10, 4096  ;;  %s5165_s13 = smov [#allocation2]  }
  0x1c   : > { %3886 = vmatpush3.bf16.msra.mxu1 %v4075_v3  ;;  %3839 = vmatprep.subr.bf16.mxu0 %v4076_v4  ;;  %v4106_v21 = vld [vmem:[%s7949_s2 + $0x48] sm:$0xff]   ;;  %v4091_v23 = vld [vmem:[%s5283_s14 + $0x18] sm:$0xff]   ;;  %v4092_v24 = vld [vmem:[%s5283_s14 + $0x20] sm:$0xff]   ;;  %p5102_p11 = scmp.ne.s32.totalorder %s7897_s10, %s5101_s12  ;;  %s5105_s15 = sshll.u32 %s5165_s13, 4  ;;  %s5106_s15 = int_to_ptr.vmem [resolvable:$false] %s5105_s15 }
  0x1d   : > { %3887 = vmatprep.subr.bf16.mxu1 %v4077_v5  ;;  %3851 = vmatprep.mubr.bf16.mxu0 %v4088_v11  ;;  %v4107_v22 = vld [vmem:[%s7950_s3 + $0x48] sm:$0xff]   ;;  %v4108_v25 = vld [vmem:[%s7949_s2 + $0x50] sm:$0xff]   ;;  %v4110_v27 = vld [vmem:[%s7949_s2 + $0x58] sm:$0xff]   ;;  %s5107_s17 = scalar_lea.vmem %s5106_s15, 8192  ;;  %p5108_p0 = scmp.lt.s32.totalorder %s7897_s10, %s5106_s15 }
  0x1e   : > { %3899 = vmatprep.mubr.bf16.mxu1 %v4088_v11  ;;  %v4109_v26 = vld [vmem:[%s7950_s3 + $0x50] sm:$0xff]   ;;  %v4111_v28 = vld [vmem:[%s7950_s3 + $0x58] sm:$0xff]   ;;  %v4093_v29 = vld [vmem:[%s5283_s14 + $0x28] sm:$0xff]   ;;  %p5103_p12 = pnand %p5102_p11, %p5236_p5  ;;  %p5109_p1 = scmp.lt.s32.totalorder %s5107_s17, %s5101_s12 }
  0x1f   : > { %3840 = vmatpush3.bf16.msra.mxu0 %v4076_v4  ;;  %v4094_v30 = vld [vmem:[%s5283_s14 + $0x30] sm:$0xff]   ;;  %v4095_v31 = vld [vmem:[%s5283_s14 + $0x38] sm:$0xff]   ;;  %v4096_v32 = vld [vmem:[%s5283_s14 + $0x40] sm:$0xff]  }
  0x20   : > { %3888 = vmatpush3.bf16.msra.mxu1 %v4077_v5  ;;  %3841 = vmatprep.subr.bf16.mxu0 %v4078_v6  ;;  %v4097_v33 = vld [vmem:[%s5283_s14 + $0x48] sm:$0xff]   ;;  %v4098_v34 = vld [vmem:[%s5283_s14 + $0x50] sm:$0xff]   ;;  %v4099_v35 = vld [vmem:[%s5283_s14 + $0x58] sm:$0xff]   ;;  %p5104_p13 = pneg %p5103_p12  ;;  %p5110_p2 = por %p5109_p1, %p5108_p0 }
  0x21   : > { %3889 = vmatprep.subr.bf16.mxu1 %v4079_v7  ;;  %v4100_v36 = vld [vmem:[%s5283_s14 + $0x60] sm:$0xff]   ;;  %v4101_v37 = vld [vmem:[%s5283_s14 + $0x68] sm:$0xff]   ;;  %v4102_v38 = vld [vmem:[%s5283_s14 + $0x70] sm:$0xff]  }
  0x22   : > { %v4103_v39 = vld [vmem:[%s5283_s14 + $0x78] sm:$0xff]   ;;  %v4112_v40 = vld [vmem:[%s7949_s2 + $0x60] sm:$0xff]   ;;  %v4114_v42 = vld [vmem:[%s7949_s2 + $0x68] sm:$0xff]   ;;  %s3738_s14 = sshll.u32 %s5219_s22, 12  ;;  %p5111_p3 = pnand %p5110_p2, %p5104_p13 }
  0x23   : > { %3842 = vmatpush3.bf16.msra.mxu0 %v4078_v6  ;;  %v4113_v41 = vld [vmem:[%s7950_s3 + $0x60] sm:$0xff]   ;;  %v4115_v43 = vld [vmem:[%s7950_s3 + $0x68] sm:$0xff]   ;;  %v4116_v44 = vld [vmem:[%s7949_s2 + $0x70] sm:$0xff]   ;;  %s7894_s9 = scalar_lea.hbm %s7951_s4, %s3738_s14 }
  0x24   : > { %3890 = vmatpush3.bf16.msra.mxu1 %v4079_v7  ;;  %3843 = vmatprep.subr.bf16.mxu0 %v4080_v8  ;;  %v4117_v45 = vld [vmem:[%s7950_s3 + $0x70] sm:$0xff]   ;;  %v4118_v46 = vld [vmem:[%s7949_s2 + $0x78] sm:$0xff]  }
  0x25   : > { %3891 = vmatprep.subr.bf16.mxu1 %v4081_v9  ;;  %v4119_v47 = vld [vmem:[%s7950_s3 + $0x78] sm:$0xff]  }
  0x27   : > { %3844 = vmatpush3.bf16.msra.mxu0 %v4080_v8 }
  0x28   : > { %3892 = vmatpush3.bf16.msra.mxu1 %v4081_v9  ;;  %3845 = vmatprep.subr.bf16.mxu0 %v4082_v10 }
  0x29   : > { %3893 = vmatprep.subr.bf16.mxu1 %v4083_v12 }
  0x2b   : > { %3846 = vmatpush3.bf16.msra.mxu0 %v4082_v10 }
  0x2c   : > { %3894 = vmatpush3.bf16.msra.mxu1 %v4083_v12  ;;  %3847 = vmatprep.subr.bf16.mxu0 %v4084_v13 }
  0x2d   : > { %3895 = vmatprep.subr.bf16.mxu1 %v4085_v14 }
  0x2f   : > { %3848 = vmatpush3.bf16.msra.mxu0 %v4084_v13 }
  0x30   : > { %3896 = vmatpush3.bf16.msra.mxu1 %v4085_v14  ;;  %3849 = vmatprep.subr.bf16.mxu0 %v4086_v15 }
  0x31   : > { %3897 = vmatprep.subr.bf16.mxu1 %v4087_v16 }
  0x33   : > { %3850 = vmatpush3.bf16.msra.mxu0 %v4086_v15 }
  0x34   : > { %3898 = vmatpush3.bf16.msra.mxu1 %v4087_v16  ;;  %3931 = vmatprep.subr.bf16.mxu0 %v4104_v19 }
  0x35   : > { %3979 = vmatprep.subr.bf16.mxu1 %v4105_v20 }
  0x36   : > { %3852 = vmatmul.mubr.bf16.vlgmr.msra.gmra.mrb[0].mxu0 %v4089_v17 }
  0x37   : > { %3900 = vmatmul.mubr.bf16.vlgmr.msra.gmra.mrb[0].mxu1 %v4089_v17  ;;  %3855 = vmatprep.mubr.bf16.mxu0 %v4090_v18 }
  0x38   : > { %3903 = vmatprep.mubr.bf16.mxu1 %v4090_v18  ;;  %3932 = vmatpush3.bf16.msra.mxu0 %v4104_v19 }
  0x39   : > { %3980 = vmatpush3.bf16.msra.mxu1 %v4105_v20  ;;  %3933 = vmatprep.subr.bf16.mxu0 %v4106_v21 }
  0x3a   : > { %3981 = vmatprep.subr.bf16.mxu1 %v4107_v22 }
  0x3c   : > { %3934 = vmatpush3.bf16.msra.mxu0 %v4106_v21 }
  0x3d   : > { %3982 = vmatpush3.bf16.msra.mxu1 %v4107_v22  ;;  %3935 = vmatprep.subr.bf16.mxu0 %v4108_v25 }
  0x3e   : > { %3856 = vmatmul.mubr.bf16.gmra.mrb[4].mxu0 %v4091_v23  ;;  %3983 = vmatprep.subr.bf16.mxu1 %v4109_v26 }
  0x3f   : > { %3904 = vmatmul.mubr.bf16.gmra.mrb[4].mxu1 %v4091_v23  ;;  %3859 = vmatprep.mubr.bf16.mxu0 %v4092_v24 }
  0x40   : > { %3907 = vmatprep.mubr.bf16.mxu1 %v4092_v24  ;;  %3936 = vmatpush3.bf16.msra.mxu0 %v4108_v25 }
  0x41   : > { %3984 = vmatpush3.bf16.msra.mxu1 %v4109_v26  ;;  %3937 = vmatprep.subr.bf16.mxu0 %v4110_v27 }
  0x42   : > { %3985 = vmatprep.subr.bf16.mxu1 %v4111_v28 }
  0x44   : > { %3938 = vmatpush3.bf16.msra.mxu0 %v4110_v27 }
  0x45   : > { %3986 = vmatpush3.bf16.msra.mxu1 %v4111_v28  ;;  %3939 = vmatprep.subr.bf16.mxu0 %v4112_v40 }
  0x46   : > { %3860 = vmatmul.mubr.bf16.gmra.mrb[8].mxu0 %v4093_v29  ;;  %3987 = vmatprep.subr.bf16.mxu1 %v4113_v41 }
  0x47   : > { %3908 = vmatmul.mubr.bf16.gmra.mrb[8].mxu1 %v4093_v29  ;;  %3863 = vmatprep.mubr.bf16.mxu0 %v4094_v30 }
  0x48   : > { %3911 = vmatprep.mubr.bf16.mxu1 %v4094_v30  ;;  %3940 = vmatpush3.bf16.msra.mxu0 %v4112_v40 }
  0x49   : > { %3988 = vmatpush3.bf16.msra.mxu1 %v4113_v41  ;;  %3941 = vmatprep.subr.bf16.mxu0 %v4114_v42 }
  0x4a   : > { %3989 = vmatprep.subr.bf16.mxu1 %v4115_v43 }
  0x4c   : > { %3942 = vmatpush3.bf16.msra.mxu0 %v4114_v42 }
  0x4d   : > { %3990 = vmatpush3.bf16.msra.mxu1 %v4115_v43  ;;  %3943 = vmatprep.subr.bf16.mxu0 %v4116_v44 }
  0x4e   : > { %3864 = vmatmul.mubr.bf16.gmra.mrb[12].mxu0 %v4095_v31  ;;  %3991 = vmatprep.subr.bf16.mxu1 %v4117_v45 }
  0x4f   : > { %3912 = vmatmul.mubr.bf16.gmra.mrb[12].mxu1 %v4095_v31  ;;  %3867 = vmatprep.mubr.bf16.mxu0 %v4096_v32 }
  0x50   : > { %3915 = vmatprep.mubr.bf16.mxu1 %v4096_v32  ;;  %3944 = vmatpush3.bf16.msra.mxu0 %v4116_v44 }
  0x51   : > { %3992 = vmatpush3.bf16.msra.mxu1 %v4117_v45  ;;  %3945 = vmatprep.subr.bf16.mxu0 %v4118_v46 }
  0x52   : > { %3993 = vmatprep.subr.bf16.mxu1 %v4119_v47 }
  0x54   : > { %3946 = vmatpush3.bf16.msra.mxu0 %v4118_v46 }
  0x55   : > { %3994 = vmatpush3.bf16.msra.mxu1 %v4119_v47 }
  0x56   : > { %3868 = vmatmul.mubr.bf16.gmra.mrb[16].mxu0 %v4097_v33 }
  0x57   : > { %3916 = vmatmul.mubr.bf16.gmra.mrb[16].mxu1 %v4097_v33  ;;  %3871 = vmatprep.mubr.bf16.mxu0 %v4098_v34 }
  0x58   : > { %3919 = vmatprep.mubr.bf16.mxu1 %v4098_v34 }
  0x5e   : > { %3872 = vmatmul.mubr.bf16.gmra.mrb[20].mxu0 %v4099_v35 }
  0x5f   : > { %3920 = vmatmul.mubr.bf16.gmra.mrb[20].mxu1 %v4099_v35  ;;  %3875 = vmatprep.mubr.bf16.mxu0 %v4100_v36 }
  0x60   : > { %3923 = vmatprep.mubr.bf16.mxu1 %v4100_v36 }
  0x66   : > { %3876 = vmatmul.mubr.bf16.gmra.mrb[24].mxu0 %v4101_v37 }
  0x67   : > { %3924 = vmatmul.mubr.bf16.gmra.mrb[24].mxu1 %v4101_v37  ;;  %3879 = vmatprep.mubr.bf16.mxu0 %v4102_v38 }
  0x68   : > { %3927 = vmatprep.mubr.bf16.mxu1 %v4102_v38 }
  0x6e   : > { %3880 = vmatmul.mubr.bf16.gmra.mrb[28].mxu0 %v4103_v39 }
  0x6f   : > { %3928 = vmatmul.mubr.bf16.gmra.mrb[28].mxu1 %v4103_v39 }
 0x109   : > { %v3853_v48 = vpop.f32.mrb[0].mxu0 }
 0x10a   : > { %4120 = vtanh.f32 %v3853_v48  ;;  %v3901_v49 = vpop.f32.mrb[0].mxu1  ;;  %v518_v50 = vpop.f32.mrb[1].mxu0 }
 0x10b   : > { %4122 = vtanh.f32 %v3901_v49  ;;  %v775_v51 = vpop.f32.mrb[1].mxu1  ;;  %v3854_v52 = vpop.f32.mrb[2].mxu0 }
 0x10c   : > { %4124 = vtanh.f32 %v518_v50  ;;  %v3902_v53 = vpop.f32.mrb[2].mxu1  ;;  %v521_v54 = vpop.f32.mrb[3].mxu0 }
 0x10d   : > { %4126 = vtanh.f32 %v775_v51  ;;  %v778_v55 = vpop.f32.mrb[3].mxu1 }
 0x10e   : > { %4128 = vtanh.f32 %v3854_v52 }
 0x10f   : > { %4130 = vtanh.f32 %v3902_v53 }
 0x110   : > { %4132 = vtanh.f32 %v521_v54 }
 0x111   : > { %4134 = vtanh.f32 %v778_v55  ;;  %v3857_v56 = vpop.f32.mrb[4].mxu0 }
 0x112   : > { %4136 = vtanh.f32 %v3857_v56  ;;  %v3905_v57 = vpop.f32.mrb[4].mxu1  ;;  %v534_v58 = vpop.f32.mrb[5].mxu0 }
 0x113   : > { %4138 = vtanh.f32 %v3905_v57  ;;  %v791_v59 = vpop.f32.mrb[5].mxu1  ;;  %v3858_v60 = vpop.f32.mrb[6].mxu0 }
 0x114   : > { %v5367_v61 = vpop.eup %4120  ;;  %4140 = vtanh.f32 %v534_v58  ;;  %v3906_v62 = vpop.f32.mrb[6].mxu1 }
 0x115   : > { %8311 = vst [vmem:[#allocation5_spill] sm:$0xff] %v5367_v61  ;;  %v537_v63 = vpop.f32.mrb[7].mxu0  ;;  %v5369_v0 = vpop.eup %4122  ;;  %4142 = vtanh.f32 %v791_v59  ;;  %938 = vmax.xlane.f32.xlu1 %v5367_v61 }
 0x116   : > { %8312 = vst [vmem:[#allocation6_spill] sm:$0xff] %v5369_v0  ;;  %v794_v1 = vpop.f32.mrb[7].mxu1  ;;  %v5372_v2 = vpop.eup %4124  ;;  %4144 = vtanh.f32 %v3858_v60  ;;  %1258 = vmax.xlane.f32.xlu0 %v5369_v0 }
 0x117   : > { %8313 = vst [vmem:[#allocation7_spill] sm:$0xff] %v5372_v2  ;;  %v5375_v3 = vpop.eup %4126  ;;  %4146 = vtanh.f32 %v3906_v62 }
 0x118   : > { %8314 = vst [vmem:[#allocation8_spill] sm:$0xff] %v5375_v3  ;;  %v5377_v4 = vpop.eup %4128  ;;  %4148 = vtanh.f32 %v794_v1 }
 0x119   : > { %8315 = vst [vmem:[#allocation9_spill] sm:$0xff] %v5377_v4  ;;  %v5379_v5 = vpop.eup %4130  ;;  %4150 = vtanh.f32 %v537_v63  ;;  %940 = vmax.xlane.f32.xlu1 %v5377_v4  ;;  %v3861_v6 = vpop.f32.mrb[8].mxu0  ;;  %v1936_v16 = vpack.c.bf16 %v5377_v4, %v5367_v61 }
 0x11a   : > { %8316 = vst [vmem:[#allocation10_spill] sm:$0xff] %v5379_v5  ;;  %v5382_v7 = vpop.eup %4132  ;;  %934 = vmax.xlane.f32.xlu0 %v5372_v2  ;;  %4152 = vtanh.f32 %v3861_v6  ;;  %v3909_v8 = vpop.f32.mrb[8].mxu1  ;;  %v1952_v20 = vpack.c.bf16 %v5379_v5, %v5369_v0 }
 0x11b   : > { %8317 = vst [vmem:[#allocation11_spill] sm:$0xff] %v5382_v7  ;;  %v550_v9 = vpop.f32.mrb[9].mxu0  ;;  %v5385_v10 = vpop.eup %4134  ;;  %v1935_v11 = vpack.c.bf16 %v5382_v7, %v5372_v2  ;;  %4154 = vtanh.f32 %v3909_v8 }
 0x11c   : > { %8318 = vst [vmem:[#allocation12_spill] sm:$0xff] %v5385_v10  ;;  %v807_v12 = vpop.f32.mrb[9].mxu1  ;;  %v3862_v13 = vpop.f32.mrb[10].mxu0  ;;  %v1951_v15 = vpack.c.bf16 %v5385_v10, %v5375_v3  ;;  %4156 = vtanh.f32 %v550_v9 }
 0x11d   : > { %v5389_v14 = vpop.eup %4136  ;;  %v3910_v17 = vpop.f32.mrb[10].mxu1  ;;  %3947 = vmatprep.mubr.bf16.mxu0 %v1935_v11  ;;  %1260 = vmax.xlane.f32.xlu1 %v5379_v5  ;;  %4158 = vtanh.f32 %v807_v12 }
 0x11e   : > { %8319 = vst [vmem:[#allocation13_spill] sm:$0xff] %v5389_v14  ;;  %v553_v18 = vpop.f32.mrb[11].mxu0  ;;  %v5395_v19 = vpop.eup %4138  ;;  %3995 = vmatprep.mubr.bf16.mxu1 %v1951_v15  ;;  %3948 = vmatmul.mubr.bf16.vlgmr.msra.gmra.mrb[32].mxu0 %v1936_v16  ;;  %4160 = vtanh.f32 %v3862_v13 }
 0x11f   : > { %8320 = vst [vmem:[#allocation14_spill] sm:$0xff] %v5395_v19  ;;  %v810_v21 = vpop.f32.mrb[11].mxu1  ;;  %v5400_v22 = vpop.eup %4140  ;;  %3996 = vmatmul.mubr.bf16.vlgmr.msra.gmra.mrb[32].mxu1 %v1952_v20  ;;  %1254 = vmax.xlane.f32.xlu0 %v5375_v3  ;;  %4162 = vtanh.f32 %v3910_v17 }
 0x120   : > { %8321 = vst [vmem:[#allocation15_spill] sm:$0xff] %v5400_v22  ;;  %v5402_v23 = vpop.eup %4142  ;;  %4164 = vtanh.f32 %v810_v21 }
 0x121   : > { %8322 = vst [vmem:[#allocation16_spill] sm:$0xff] %v5402_v23  ;;  %v5405_v24 = vpop.eup %4144  ;;  %1256 = vmax.xlane.f32.xlu1 %v5385_v10  ;;  %4166 = vtanh.f32 %v553_v18  ;;  %v3865_v26 = vpop.f32.mrb[12].mxu0 }
 0x122   : > { %8323 = vst [vmem:[#allocation17_spill] sm:$0xff] %v5405_v24  ;;  %v5407_v25 = vpop.eup %4146  ;;  %4168 = vtanh.f32 %v3865_v26  ;;  %v3913_v28 = vpop.f32.mrb[12].mxu1  ;;  %v1938_v32 = vpack.c.bf16 %v5405_v24, %v5389_v14 }
 0x123   : > { %8324 = vst [vmem:[#allocation18_spill] sm:$0xff] %v5407_v25  ;;  %v5410_v27 = vpop.eup %4148  ;;  %v566_v29 = vpop.f32.mrb[13].mxu0  ;;  %936 = vmax.xlane.f32.xlu0 %v5382_v7  ;;  %v1954_v33 = vpack.c.bf16 %v5407_v25, %v5395_v19  ;;  %4170 = vtanh.f32 %v3913_v28 }
 0x124   : > { %8325 = vst [vmem:[#allocation19_spill] sm:$0xff] %v5410_v27  ;;  %v5412_v30 = vpop.eup %4150  ;;  %v1953_v31 = vpack.c.bf16 %v5410_v27, %v5402_v23  ;;  %v823_v34 = vpop.f32.mrb[13].mxu1  ;;  %4172 = vtanh.f32 %v566_v29 }
 0x125   : > { %8326 = vst [vmem:[#allocation20_spill] sm:$0xff] %v5412_v30  ;;  %v3866_v35 = vpop.f32.mrb[14].mxu0  ;;  %v5421_v36 = vpop.eup %4152  ;;  %v1937_v37 = vpack.c.bf16 %v5412_v30, %v5400_v22  ;;  %948 = vmax.xlane.f32.xlu1 %v5405_v24  ;;  %4174 = vtanh.f32 %v823_v34 }
 0x126   : > { %8327 = vst [vmem:[#allocation21_spill] sm:$0xff] %v5421_v36  ;;  %v3914_v38 = vpop.f32.mrb[14].mxu1  ;;  %v569_v39 = vpop.f32.mrb[15].mxu0  ;;  %3999 = vmatprep.mubr.bf16.mxu1 %v1953_v31  ;;  %4176 = vtanh.f32 %v3866_v35 }
 0x127   : > { %v5425_v40 = vpop.eup %4154  ;;  %v826_v41 = vpop.f32.mrb[15].mxu1  ;;  %3951 = vmatprep.mubr.bf16.mxu0 %v1937_v37  ;;  %4000 = vmatmul.mubr.bf16.gmra.mrb[36].mxu1 %v1954_v33  ;;  %4178 = vtanh.f32 %v3914_v38 }
 0x128   : > { %8328 = vst [vmem:[#allocation22_spill] sm:$0xff] %v5425_v40  ;;  %v5428_v42 = vpop.eup %4156  ;;  %3952 = vmatmul.mubr.bf16.gmra.mrb[36].mxu0 %v1938_v32  ;;  %946 = vmax.xlane.f32.xlu0 %v5389_v14  ;;  %4180 = vtanh.f32 %v826_v41 }
 0x129   : > { %8329 = vst [vmem:[#allocation23_spill] sm:$0xff] %v5428_v42  ;;  %v5430_v43 = vpop.eup %4158  ;;  %1268 = vmax.xlane.f32.xlu1 %v5407_v25  ;;  %4182 = vtanh.f32 %v569_v39  ;;  %v3869_v46 = vpop.f32.mrb[16].mxu0 }
 0x12a   : > { %8330 = vst [vmem:[#allocation24_spill] sm:$0xff] %v5430_v43  ;;  %v5432_v44 = vpop.eup %4160  ;;  %4184 = vtanh.f32 %v3869_v46  ;;  %v3917_v48 = vpop.f32.mrb[16].mxu1 }
 0x12b   : > { %8331 = vst [vmem:[#allocation25_spill] sm:$0xff] %v5432_v44  ;;  %v5435_v45 = vpop.eup %4162  ;;  %v582_v49 = vpop.f32.mrb[17].mxu0  ;;  %v1940_v52 = vpack.c.bf16 %v5432_v44, %v5421_v36  ;;  %4186 = vtanh.f32 %v3917_v48 }
 0x12c   : > { %8332 = vst [vmem:[#allocation26_spill] sm:$0xff] %v5435_v45  ;;  %v5438_v47 = vpop.eup %4164  ;;  %v1956_v53 = vpack.c.bf16 %v5435_v45, %v5425_v40  ;;  %v839_v54 = vpop.f32.mrb[17].mxu1  ;;  %1266 = vmax.xlane.f32.xlu0 %v5395_v19  ;;  %4188 = vtanh.f32 %v582_v49 }
 0x12d   : > { %8333 = vst [vmem:[#allocation27_spill] sm:$0xff] %v5438_v47  ;;  %v5440_v50 = vpop.eup %4166  ;;  %v1955_v51 = vpack.c.bf16 %v5438_v47, %v5430_v43  ;;  %v3870_v55 = vpop.f32.mrb[18].mxu0  ;;  %944 = vmax.xlane.f32.xlu1 %v5412_v30  ;;  %4190 = vtanh.f32 %v839_v54 }
 0x12e   : > { %8334 = vst [vmem:[#allocation28_spill] sm:$0xff] %v5440_v50  ;;  %v5448_v56 = vpop.eup %4168  ;;  %v1939_v57 = vpack.c.bf16 %v5440_v50, %v5428_v42  ;;  %v3918_v58 = vpop.f32.mrb[18].mxu1  ;;  %4192 = vtanh.f32 %v3870_v55 }
 0x12f   : > { %8335 = vst [vmem:[#allocation29_spill] sm:$0xff] %v5448_v56  ;;  %v585_v59 = vpop.f32.mrb[19].mxu0  ;;  %v5453_v60 = vpop.eup %4170  ;;  %4003 = vmatprep.mubr.bf16.mxu1 %v1955_v51  ;;  %4194 = vtanh.f32 %v3918_v58 }
 0x130   : > { %8336 = vst [vmem:[#allocation30_spill] sm:$0xff] %v5453_v60  ;;  %v842_v62 = vpop.f32.mrb[19].mxu1  ;;  %v5456_v63 = vpop.eup %4172  ;;  %3955 = vmatprep.mubr.bf16.mxu0 %v1939_v57  ;;  %4004 = vmatmul.mubr.bf16.gmra.mrb[40].mxu1 %v1956_v53 }
 0x131   : > { %8337 = vst [vmem:[#allocation31_spill] sm:$0xff] %v5456_v63  ;;  %v5458_v1 = vpop.eup %4174  ;;  %3956 = vmatmul.mubr.bf16.gmra.mrb[40].mxu0 %v1940_v52  ;;  %942 = vmax.xlane.f32.xlu0 %v5400_v22  ;;  %4196 = vtanh.f32 %v842_v62  ;;  %v3873_v9 = vpop.f32.mrb[20].mxu0 }
 0x132   : > { %8338 = vst [vmem:[#allocation32_spill] sm:$0xff] %v5458_v1  ;;  %v5460_v6 = vpop.eup %4176  ;;  %1264 = vmax.xlane.f32.xlu1 %v5410_v27  ;;  %4198 = vtanh.f32 %v585_v59  ;;  %v3921_v12 = vpop.f32.mrb[20].mxu1 }
 0x133   : > { %8339 = vst [vmem:[#allocation33_spill] sm:$0xff] %v5460_v6  ;;  %v5463_v8 = vpop.eup %4178  ;;  %4200 = vtanh.f32 %v3873_v9  ;;  %v598_v13 = vpop.f32.mrb[21].mxu0  ;;  %v1942_v17 = vpack.c.bf16 %v5460_v6, %v5448_v56 }
 0x134   : > { %8340 = vst [vmem:[#allocation34_spill] sm:$0xff] %v5463_v8  ;;  %v5466_v11 = vpop.eup %4180  ;;  %v1958_v18 = vpack.c.bf16 %v5463_v8, %v5453_v60  ;;  %4202 = vtanh.f32 %v3921_v12  ;;  %v855_v20 = vpop.f32.mrb[21].mxu1 }
 0x135   : > { %8341 = vst [vmem:[#allocation35_spill] sm:$0xff] %v5466_v11  ;;  %v5468_v15 = vpop.eup %4182  ;;  %v1957_v16 = vpack.c.bf16 %v5466_v11, %v5458_v1  ;;  %v3874_v21 = vpop.f32.mrb[22].mxu0  ;;  %1262 = vmax.xlane.f32.xlu0 %v5402_v23  ;;  %4204 = vtanh.f32 %v598_v13 }
 0x136   : > { %8342 = vst [vmem:[#allocation36_spill] sm:$0xff] %v5468_v15  ;;  %v5476_v26 = vpop.eup %4184  ;;  %v1941_v28 = vpack.c.bf16 %v5468_v15, %v5456_v63  ;;  %v3922_v29 = vpop.f32.mrb[22].mxu1  ;;  %956 = vmax.xlane.f32.xlu1 %v5432_v44  ;;  %4206 = vtanh.f32 %v855_v20 }
 0x137   : > { %8343 = vst [vmem:[#allocation37_spill] sm:$0xff] %v5476_v26  ;;  %v601_v31 = vpop.f32.mrb[23].mxu0  ;;  %v5481_v32 = vpop.eup %4186  ;;  %4007 = vmatprep.mubr.bf16.mxu1 %v1957_v16  ;;  %4208 = vtanh.f32 %v3874_v21 }
 0x138   : > { %8344 = vst [vmem:[#allocation38_spill] sm:$0xff] %v5481_v32  ;;  %v858_v33 = vpop.f32.mrb[23].mxu1  ;;  %v5484_v34 = vpop.eup %4188  ;;  %3959 = vmatprep.mubr.bf16.mxu0 %v1941_v28  ;;  %4008 = vmatmul.mubr.bf16.gmra.mrb[44].mxu1 %v1958_v18  ;;  %4210 = vtanh.f32 %v3922_v29 }
 0x139   : > { %8345 = vst [vmem:[#allocation39_spill] sm:$0xff] %v5484_v34  ;;  %v5486_v35 = vpop.eup %4190  ;;  %3960 = vmatmul.mubr.bf16.gmra.mrb[44].mxu0 %v1942_v17  ;;  %954 = vmax.xlane.f32.xlu0 %v5421_v36  ;;  %4212 = vtanh.f32 %v858_v33  ;;  %v3877_v39 = vpop.f32.mrb[24].mxu0 }
 0x13a   : > { %8346 = vst [vmem:[#allocation40_spill] sm:$0xff] %v5486_v35  ;;  %v5488_v37 = vpop.eup %4192  ;;  %1276 = vmax.xlane.f32.xlu1 %v5435_v45  ;;  %4214 = vtanh.f32 %v601_v31  ;;  %v3925_v46 = vpop.f32.mrb[24].mxu1 }
 0x13b   : > { %8347 = vst [vmem:[#allocation41_spill] sm:$0xff] %v5488_v37  ;;  %v5491_v38 = vpop.eup %4194  ;;  %4216 = vtanh.f32 %v3877_v39  ;;  %v614_v48 = vpop.f32.mrb[25].mxu0  ;;  %v1944_v52 = vpack.c.bf16 %v5488_v37, %v5476_v26 }
 0x13c   : > { %8348 = vst [vmem:[#allocation42_spill] sm:$0xff] %v5491_v38  ;;  %v5494_v41 = vpop.eup %4196  ;;  %v1960_v53 = vpack.c.bf16 %v5491_v38, %v5481_v32  ;;  %4218 = vtanh.f32 %v3925_v46  ;;  %v871_v54 = vpop.f32.mrb[25].mxu1 }
 0x13d   : > { %8349 = vst [vmem:[#allocation43_spill] sm:$0xff] %v5494_v41  ;;  %v5496_v49 = vpop.eup %4198  ;;  %v1959_v51 = vpack.c.bf16 %v5494_v41, %v5486_v35  ;;  %v3878_v55 = vpop.f32.mrb[26].mxu0  ;;  %1274 = vmax.xlane.f32.xlu0 %v5425_v40  ;;  %4220 = vtanh.f32 %v614_v48 }
 0x13e   : > { %8350 = vst [vmem:[#allocation44_spill] sm:$0xff] %v5496_v49  ;;  %v5504_v57 = vpop.eup %4200  ;;  %v1943_v58 = vpack.c.bf16 %v5496_v49, %v5484_v34  ;;  %v3926_v59 = vpop.f32.mrb[26].mxu1  ;;  %952 = vmax.xlane.f32.xlu1 %v5440_v50  ;;  %4222 = vtanh.f32 %v871_v54 }
 0x13f   : > { %8351 = vst [vmem:[#allocation45_spill] sm:$0xff] %v5504_v57  ;;  %v617_v62 = vpop.f32.mrb[27].mxu0  ;;  %v5509_v9 = vpop.eup %4202  ;;  %4011 = vmatprep.mubr.bf16.mxu1 %v1959_v51  ;;  %4224 = vtanh.f32 %v3878_v55 }
 0x140   : > { %8352 = vst [vmem:[#allocation46_spill] sm:$0xff] %v5509_v9  ;;  %v874_v12 = vpop.f32.mrb[27].mxu1  ;;  %v5512_v13 = vpop.eup %4204  ;;  %3963 = vmatprep.mubr.bf16.mxu0 %v1943_v58  ;;  %4012 = vmatmul.mubr.bf16.gmra.mrb[48].mxu1 %v1960_v53  ;;  %4226 = vtanh.f32 %v3926_v59 }
 0x141   : > { %8353 = vst [vmem:[#allocation47_spill] sm:$0xff] %v5512_v13  ;;  %v5514_v16 = vpop.eup %4206  ;;  %3964 = vmatmul.mubr.bf16.gmra.mrb[48].mxu0 %v1944_v52  ;;  %950 = vmax.xlane.f32.xlu0 %v5428_v42  ;;  %4228 = vtanh.f32 %v874_v12  ;;  %v3881_v20 = vpop.f32.mrb[28].mxu0 }
 0x142   : > { %8354 = vst [vmem:[#allocation48_spill] sm:$0xff] %v5514_v16  ;;  %v5516_v17 = vpop.eup %4208  ;;  %1272 = vmax.xlane.f32.xlu1 %v5438_v47  ;;  %4230 = vtanh.f32 %v617_v62  ;;  %v630_v28 = vpop.f32.mrb[29].mxu0 }
 0x143   : > { %8355 = vst [vmem:[#allocation49_spill] sm:$0xff] %v5516_v17  ;;  %v5519_v18 = vpop.eup %4210  ;;  %4232 = vtanh.f32 %v3881_v20  ;;  %v3929_v29 = vpop.f32.mrb[28].mxu1  ;;  %v1946_v39 = vpack.c.bf16 %v5516_v17, %v5504_v57 }
 0x144   : > { %8356 = vst [vmem:[#allocation50_spill] sm:$0xff] %v5519_v18  ;;  %v5522_v21 = vpop.eup %4212  ;;  %v1962_v46 = vpack.c.bf16 %v5519_v18, %v5509_v9  ;;  %4234 = vtanh.f32 %v630_v28  ;;  %v3882_v48 = vpop.f32.mrb[30].mxu0 }
 0x145   : > { %8357 = vst [vmem:[#allocation51_spill] sm:$0xff] %v5522_v21  ;;  %v5524_v31 = vpop.eup %4214  ;;  %v1961_v33 = vpack.c.bf16 %v5522_v21, %v5514_v16  ;;  %v887_v51 = vpop.f32.mrb[29].mxu1  ;;  %1270 = vmax.xlane.f32.xlu0 %v5430_v43  ;;  %4236 = vtanh.f32 %v3882_v48 }
 0x146   : > { %8358 = vst [vmem:[#allocation52_spill] sm:$0xff] %v5524_v31  ;;  %v5532_v52 = vpop.eup %4216  ;;  %v1945_v53 = vpack.c.bf16 %v5524_v31, %v5512_v13  ;;  %v3930_v54 = vpop.f32.mrb[30].mxu1  ;;  %964 = vmax.xlane.f32.xlu1 %v5460_v6  ;;  %4238 = vtanh.f32 %v3929_v29 }
 0x147   : > { %8359 = vst [vmem:[#allocation53_spill] sm:$0xff] %v5532_v52  ;;  %v633_v55 = vpop.f32.mrb[31].mxu0  ;;  %v5537_v58 = vpop.eup %4218  ;;  %4015 = vmatprep.mubr.bf16.mxu1 %v1961_v33  ;;  %4240 = vtanh.f32 %v887_v51 }
 0x148   : > { %8360 = vst [vmem:[#allocation54_spill] sm:$0xff] %v5537_v58  ;;  %v890_v59 = vpop.f32.mrb[31].mxu1  ;;  %v5540_v62 = vpop.eup %4220  ;;  %3967 = vmatprep.mubr.bf16.mxu0 %v1945_v53  ;;  %4016 = vmatmul.mubr.bf16.gmra.mrb[52].mxu1 %v1962_v46  ;;  %4242 = vtanh.f32 %v3930_v54 }
 0x149   : > { %8361 = vst [vmem:[#allocation55_spill] sm:$0xff] %v5540_v62  ;;  %v5542_v12 = vpop.eup %4222  ;;  %3968 = vmatmul.mubr.bf16.gmra.mrb[52].mxu0 %v1946_v39  ;;  %962 = vmax.xlane.f32.xlu0 %v5448_v56  ;;  %4244 = vtanh.f32 %v890_v59 }
 0x14a   : > { %8362 = vst [vmem:[#allocation56_spill] sm:$0xff] %v5542_v12  ;;  %v5544_v20 = vpop.eup %4224  ;;  %1284 = vmax.xlane.f32.xlu1 %v5463_v8  ;;  %4246 = vtanh.f32 %v633_v55 }
 0x14b   : > { %8363 = vst [vmem:[#allocation57_spill] sm:$0xff] %v5544_v20  ;;  %v5547_v28 = vpop.eup %4226  ;;  %v1948_v39 = vpack.c.bf16 %v5544_v20, %v5532_v52 }
 0x14c   : > { %8364 = vst [vmem:[#allocation58_spill] sm:$0xff] %v5547_v28  ;;  %v5550_v29 = vpop.eup %4228  ;;  %v1964_v46 = vpack.c.bf16 %v5547_v28, %v5537_v58 }
 0x14d   : > { %8365 = vst [vmem:[#allocation59_spill] sm:$0xff] %v5550_v29  ;;  %v5552_v33 = vpop.eup %4230  ;;  %v1963_v48 = vpack.c.bf16 %v5550_v29, %v5542_v12  ;;  %1282 = vmax.xlane.f32.xlu0 %v5453_v60 }
 0x14e   : > { %8366 = vst [vmem:[#allocation60_spill] sm:$0xff] %v5552_v33  ;;  %v5560_v51 = vpop.eup %4232  ;;  %v1947_v53 = vpack.c.bf16 %v5552_v33, %v5540_v62  ;;  %960 = vmax.xlane.f32.xlu1 %v5468_v15 }
 0x14f   : > { %8367 = vst [vmem:[#allocation61_spill] sm:$0xff] %v5560_v51  ;;  %v5565_v54 = vpop.eup %4234  ;;  %4019 = vmatprep.mubr.bf16.mxu1 %v1963_v48 }
 0x150   : > { %8368 = vst [vmem:[#allocation62_spill] sm:$0xff] %v5565_v54  ;;  %v5568_v55 = vpop.eup %4236  ;;  %3971 = vmatprep.mubr.bf16.mxu0 %v1947_v53  ;;  %4020 = vmatmul.mubr.bf16.gmra.mrb[56].mxu1 %v1964_v46 }
 0x151   : > { %8369 = vst [vmem:[#allocation63_spill] sm:$0xff] %v5568_v55  ;;  %v5570_v59 = vpop.eup %4238  ;;  %3972 = vmatmul.mubr.bf16.gmra.mrb[56].mxu0 %v1948_v39  ;;  %958 = vmax.xlane.f32.xlu0 %v5456_v63  ;;  %v1950_v53 = vpack.c.bf16 %v5568_v55, %v5560_v51 }
 0x152   : > { %8370 = vst [vmem:[#allocation64_spill] sm:$0xff] %v5570_v59  ;;  %v5572_v8 = vpop.eup %4240  ;;  %1280 = vmax.xlane.f32.xlu1 %v5466_v11 }
 0x153   : > { %8371 = vst [vmem:[#allocation65_spill] sm:$0xff] %v5572_v8  ;;  %v5575_v60 = vpop.eup %4242 }
 0x154   : > { %8372 = vst [vmem:[#allocation66_spill] sm:$0xff] %v5575_v60  ;;  %v5578_v56 = vpop.eup %4244  ;;  %v1966_v39 = vpack.c.bf16 %v5575_v60, %v5570_v59 }
 0x155   : > { %8373 = vst [vmem:[#allocation67_spill] sm:$0xff] %v5578_v56  ;;  %v5580_v6 = vpop.eup %4246  ;;  %v1965_v48 = vpack.c.bf16 %v5578_v56, %v5572_v8  ;;  %1278 = vmax.xlane.f32.xlu0 %v5458_v1 }
 0x156   : > { %8374 = vst [vmem:[#allocation68_spill] sm:$0xff] %v5580_v6  ;;  %v1949_v46 = vpack.c.bf16 %v5580_v6, %v5565_v54  ;;  %972 = vmax.xlane.f32.xlu1 %v5488_v37 }
 0x157   : > { %4023 = vmatprep.mubr.bf16.mxu1 %v1965_v48 }
 0x158   : > { %3975 = vmatprep.mubr.bf16.mxu0 %v1949_v46  ;;  %4024 = vmatmul.mubr.bf16.gmra.mrb[60].mxu1 %v1966_v39 }
 0x159   : > { %3976 = vmatmul.mubr.bf16.gmra.mrb[60].mxu0 %v1950_v53  ;;  %970 = vmax.xlane.f32.xlu0 %v5476_v26 }
 0x15a   : > { %1292 = vmax.xlane.f32.xlu1 %v5491_v38 }
 0x15d   : > { %1290 = vmax.xlane.f32.xlu0 %v5481_v32 }
 0x15e   : > { %968 = vmax.xlane.f32.xlu1 %v5496_v49 }
 0x161   : > { %966 = vmax.xlane.f32.xlu0 %v5484_v34 }
 0x162   : > { %1288 = vmax.xlane.f32.xlu1 %v5494_v41 }
 0x165   : > { %1286 = vmax.xlane.f32.xlu0 %v5486_v35 }
 0x166   : > { %980 = vmax.xlane.f32.xlu1 %v5516_v17 }
 0x169   : > { %978 = vmax.xlane.f32.xlu0 %v5504_v57 }
 0x16a   : > { %1300 = vmax.xlane.f32.xlu1 %v5519_v18 }
 0x16d   : > { %1298 = vmax.xlane.f32.xlu0 %v5509_v9 }
 0x16e   : > { %976 = vmax.xlane.f32.xlu1 %v5524_v31 }
 0x171   : > { %974 = vmax.xlane.f32.xlu0 %v5512_v13 }
 0x172   : > { %1296 = vmax.xlane.f32.xlu1 %v5522_v21 }
 0x175   : > { %1294 = vmax.xlane.f32.xlu0 %v5514_v16 }
 0x176   : > { %988 = vmax.xlane.f32.xlu1 %v5544_v20 }
 0x179   : > { %986 = vmax.xlane.f32.xlu0 %v5532_v52 }
 0x17a   : > { %1308 = vmax.xlane.f32.xlu1 %v5547_v28 }
 0x17d   : > { %1306 = vmax.xlane.f32.xlu0 %v5537_v58 }
 0x17e   : > { %984 = vmax.xlane.f32.xlu1 %v5552_v33 }
 0x181   : > { %982 = vmax.xlane.f32.xlu0 %v5540_v62 }
 0x182   : > { %1304 = vmax.xlane.f32.xlu1 %v5550_v29 }
 0x185   : > { %1302 = vmax.xlane.f32.xlu0 %v5542_v12 }
 0x186   : > { %996 = vmax.xlane.f32.xlu1 %v5568_v55 }
 0x189   : > { %994 = vmax.xlane.f32.xlu0 %v5560_v51 }
 0x18a   : > { %1316 = vmax.xlane.f32.xlu1 %v5575_v60 }
 0x18d   : > { %1314 = vmax.xlane.f32.xlu0 %v5570_v59 }
 0x18e   : > { %992 = vmax.xlane.f32.xlu1 %v5580_v6 }
 0x191   : > { %990 = vmax.xlane.f32.xlu0 %v5565_v54 }
 0x192   : > { %1312 = vmax.xlane.f32.xlu1 %v5578_v56 }
 0x195   : > { %1310 = vmax.xlane.f32.xlu0 %v5572_v8 }
 0x1a2   : > { %v5623_v48 = vpop.xlane.xlu1 %938 }
 0x1a3   : > { %v5625_v53 = vpop.xlane.xlu0 %1258  ;;  %v1000_v39 = vsub.f32 %v5367_v61, %v5623_v48 }
 0x1a4   : > { %v1320_v46 = vsub.f32 %v5369_v0, %v5625_v53 }
 0x1a5   : > { %v1034_v60 = vmul.f32 1.442695, %v1000_v39 }
 0x1a6   : > { %v1354_v59 = vmul.f32 1.442695, %v1320_v46  ;;  %v5631_v51 = vpop.xlane.xlu1 %940 }
 0x1a7   : > { %8375 = vst [vmem:[#allocation69_spill] sm:$0xff] %v5631_v51  ;;  %4248 = vpow2.f32 %v1034_v60  ;;  %v5633_v54 = vpop.xlane.xlu0 %934  ;;  %v1001_v56 = vsub.f32 %v5377_v4, %v5631_v51 }
 0x1a8   : > { %v998_v8 = vsub.f32 %v5372_v2, %v5633_v54  ;;  %4250 = vpow2.f32 %v1354_v59 }
 0x1a9   : > { %v1036_v6 = vmul.f32 1.442695, %v1001_v56 }
 0x1aa   : > { %v1030_v29 = vmul.f32 1.442695, %v998_v8  ;;  %v5639_v61 = vpop.xlane.xlu1 %1260 }
 0x1ab   : > { %8376 = vst [vmem:[#allocation70_spill] sm:$0xff] %v5639_v61  ;;  %4252 = vpow2.f32 %v1036_v6  ;;  %v1321_v39 = vsub.f32 %v5379_v5, %v5639_v61 }
 0x1ac   : > { %v5643_v46 = vpop.xlane.xlu0 %1254  ;;  %4254 = vpow2.f32 %v1030_v29 }
 0x1ad   : > { %v1318_v60 = vsub.f32 %v5375_v3, %v5643_v46  ;;  %v1356_v0 = vmul.f32 1.442695, %v1321_v39 }
 0x1ae   : > { %v5647_v51 = vpop.xlane.xlu1 %1256 }
 0x1af   : > { %8377 = vst [vmem:[#allocation71_spill] sm:$0xff] %v5647_v51  ;;  %v1350_v4 = vmul.f32 1.442695, %v1318_v60  ;;  %4256 = vpow2.f32 %v1356_v0  ;;  %v1319_v6 = vsub.f32 %v5385_v10, %v5647_v51 }
 0x1b0   : > { %v5649_v56 = vpop.xlane.xlu0 %936 }
 0x1b1   : > { %8378 = vst [vmem:[#allocation72_spill] sm:$0xff] %v5649_v56  ;;  %v4249_v8 = vpop.eup %4248  ;;  %v999_v59 = vsub.f32 %v5382_v7, %v5649_v56  ;;  %4258 = vpow2.f32 %v1350_v4  ;;  %v1352_v3 = vmul.f32 1.442695, %v1319_v6 }
 0x1b2   : > { %v5655_v61 = vpop.xlane.xlu1 %948  ;;  %1098 = vadd.xlane.f32.xlu0 %v4249_v8  ;;  %v5657_v39 = vpop.eup %4250 }
 0x1b3   : > { %8379 = vst [vmem:[#allocation73_spill] sm:$0xff] %v5655_v61  ;;  %v1032_v5 = vmul.f32 1.442695, %v999_v59  ;;  %8380 = vst [vmem:[#allocation74_spill] sm:$0xff] %v5657_v39  ;;  %v1005_v60 = vsub.f32 %v5405_v24, %v5655_v61 }
 0x1b5   : > { %v4253_v29 = vpop.eup %4252  ;;  %4260 = vpow2.f32 %v1032_v5  ;;  %v5659_v0 = vpop.xlane.xlu0 %946  ;;  %v1044_v6 = vmul.f32 1.442695, %v1005_v60 }
 0x1b6   : > { %v1004_v51 = vsub.f32 %v5389_v14, %v5659_v0  ;;  %v5665_v10 = vpop.xlane.xlu1 %1268  ;;  %1418 = vadd.xlane.f32.xlu0 %v5657_v39  ;;  %1100 = vadd.xlane.f32.xlu1 %v4253_v29  ;;  %v4255_v4 = vpop.eup %4254  ;;  %4262 = vpow2.f32 %v1352_v3 }
 0x1b7   : > { %8381 = vst [vmem:[#allocation75_spill] sm:$0xff] %v5665_v10  ;;  %v1325_v56 = vsub.f32 %v5407_v25, %v5665_v10 }
 0x1b8   : > { %v1042_v8 = vmul.f32 1.442695, %v1004_v51 }
 0x1b9   : > { %v5668_v59 = vpop.eup %4256  ;;  %v5670_v5 = vpop.xlane.xlu0 %1266  ;;  %v1364_v3 = vmul.f32 1.442695, %v1325_v56 }
 0x1ba   : > { %8382 = vst [vmem:[#allocation76_spill] sm:$0xff] %v5668_v59  ;;  %4264 = vpow2.f32 %v1042_v8  ;;  %v1324_v61 = vsub.f32 %v5395_v19, %v5670_v5  ;;  %v5676_v14 = vpop.xlane.xlu1 %944  ;;  %1094 = vadd.xlane.f32.xlu0 %v4255_v4  ;;  %1420 = vadd.xlane.f32.xlu1 %v5668_v59 }
 0x1bb   : > { %8383 = vst [vmem:[#allocation77_spill] sm:$0xff] %v5676_v14  ;;  %v5679_v51 = vpop.eup %4258  ;;  %4266 = vpow2.f32 %v1044_v6  ;;  %v1003_v7 = vsub.f32 %v5412_v30, %v5676_v14 }
 0x1bc   : > { %v1362_v29 = vmul.f32 1.442695, %v1324_v61  ;;  %8384 = vst [vmem:[#allocation78_spill] sm:$0xff] %v5679_v51 }
 0x1bd   : > { %v1040_v61 = vmul.f32 1.442695, %v1003_v7 }
 0x1be   : > { %v5681_v60 = vpop.xlane.xlu0 %942  ;;  %4268 = vpow2.f32 %v1362_v29  ;;  %1414 = vadd.xlane.f32.xlu0 %v5679_v51 }
 0x1bf   : > { %v1002_v8 = vsub.f32 %v5400_v22, %v5681_v60  ;;  %v5687_v10 = vpop.xlane.xlu1 %1264  ;;  %v4261_v4 = vpop.eup %4260  ;;  %4270 = vpow2.f32 %v1364_v3 }
 0x1c0   : > { %8385 = vst [vmem:[#allocation79_spill] sm:$0xff] %v5687_v10  ;;  %1096 = vadd.xlane.f32.xlu1 %v4261_v4  ;;  %v1323_v56 = vsub.f32 %v5410_v27, %v5687_v10  ;;  %v5698_v22 = vpop.eup %4262 }
 0x1c1   : > { %v1038_v19 = vmul.f32 1.442695, %v1002_v8  ;;  %8387 = vst [vmem:[#allocation81_spill] sm:$0xff] %v5698_v22 }
 0x1c2   : > { %v5690_v6 = vpop.xlane.xlu0 %1262  ;;  %v1360_v3 = vmul.f32 1.442695, %v1323_v56 }
 0x1c3   : > { %4272 = vpow2.f32 %v1038_v19  ;;  %v1322_v29 = vsub.f32 %v5402_v23, %v5690_v6  ;;  %v5696_v14 = vpop.xlane.xlu1 %956 }
 0x1c4   : > { %8386 = vst [vmem:[#allocation80_spill] sm:$0xff] %v5696_v14  ;;  %v4265_v30 = vpop.eup %4264  ;;  %1416 = vadd.xlane.f32.xlu1 %v5698_v22  ;;  %4274 = vpow2.f32 %v1040_v61  ;;  %v1009_v8 = vsub.f32 %v5432_v44, %v5696_v14  ;;  %v8406_v44 = vld [vmem:[#allocation34_spill] sm:$0xff] }
 0x1c5   : > { %v1358_v39 = vmul.f32 1.442695, %v1322_v29  ;;  %1106 = vadd.xlane.f32.xlu0 %v4265_v30  ;;  %v4267_v10 = vpop.eup %4266 }
 0x1c6   : > { %v5701_v7 = vpop.xlane.xlu0 %954  ;;  %v1052_v61 = vmul.f32 1.442695, %v1009_v8 }
 0x1c7   : > { %8388 = vst [vmem:[#allocation82_spill] sm:$0xff] %v5701_v7  ;;  %4276 = vpow2.f32 %v1358_v39  ;;  %v1008_v19 = vsub.f32 %v5421_v36, %v5701_v7  ;;  %v5707_v4 = vpop.xlane.xlu1 %1276 }
 0x1c8   : > { %8389 = vst [vmem:[#allocation83_spill] sm:$0xff] %v5707_v4  ;;  %v5709_v23 = vpop.eup %4268  ;;  %1108 = vadd.xlane.f32.xlu1 %v4267_v10  ;;  %4278 = vpow2.f32 %v1360_v3  ;;  %v1329_v22 = vsub.f32 %v5435_v45, %v5707_v4 }
 0x1c9   : > { %8390 = vst [vmem:[#allocation84_spill] sm:$0xff] %v5709_v23  ;;  %v1050_v29 = vmul.f32 1.442695, %v1008_v19  ;;  %1426 = vadd.xlane.f32.xlu0 %v5709_v23  ;;  %v5720_v14 = vpop.eup %4270 }
 0x1ca   : > { %v5711_v56 = vpop.xlane.xlu0 %1274  ;;  %8393 = vst [vmem:[#allocation87_spill] sm:$0xff] %v5720_v14  ;;  %v1372_v10 = vmul.f32 1.442695, %v1329_v22 }
 0x1cb   : > { %8391 = vst [vmem:[#allocation85_spill] sm:$0xff] %v5711_v56  ;;  %4280 = vpow2.f32 %v1050_v29  ;;  %v1328_v30 = vsub.f32 %v5425_v40, %v5711_v56  ;;  %v5718_v39 = vpop.xlane.xlu1 %952 }
 0x1cc   : > { %8392 = vst [vmem:[#allocation86_spill] sm:$0xff] %v5718_v39  ;;  %1428 = vadd.xlane.f32.xlu1 %v5720_v14  ;;  %4282 = vpow2.f32 %v1052_v61  ;;  %v1007_v8 = vsub.f32 %v5440_v50, %v5718_v39 }
 0x1cd   : > { %v4273_v36 = vpop.eup %4272  ;;  %v1370_v19 = vmul.f32 1.442695, %v1328_v30 }
 0x1ce   : > { %v5723_v3 = vpop.xlane.xlu0 %950  ;;  %1102 = vadd.xlane.f32.xlu0 %v4273_v36  ;;  %v4275_v40 = vpop.eup %4274  ;;  %v1048_v61 = vmul.f32 1.442695, %v1007_v8  ;;  %v8401_v8 = vld [vmem:[#allocation33_spill] sm:$0xff] }
 0x1cf   : > { %8394 = vst [vmem:[#allocation88_spill] sm:$0xff] %v5723_v3  ;;  %4284 = vpow2.f32 %v1370_v19  ;;  %v1006_v29 = vsub.f32 %v5428_v42, %v5723_v3  ;;  %v5729_v4 = vpop.xlane.xlu1 %1272 }
 0x1d0   : > { %8395 = vst [vmem:[#allocation89_spill] sm:$0xff] %v5729_v4  ;;  %1104 = vadd.xlane.f32.xlu1 %v4275_v40  ;;  %4286 = vpow2.f32 %v1372_v10  ;;  %v1327_v45 = vsub.f32 %v5438_v47, %v5729_v4 }
 0x1d1   : > { %v5731_v23 = vpop.eup %4276  ;;  %v1046_v30 = vmul.f32 1.442695, %v1006_v29 }
 0x1d2   : > { %8396 = vst [vmem:[#allocation90_spill] sm:$0xff] %v5731_v23  ;;  %v5733_v22 = vpop.xlane.xlu0 %1270  ;;  %1422 = vadd.xlane.f32.xlu0 %v5731_v23  ;;  %v5742_v39 = vpop.eup %4278  ;;  %v1368_v40 = vmul.f32 1.442695, %v1327_v45 }
 0x1d3   : > { %8397 = vst [vmem:[#allocation91_spill] sm:$0xff] %v5733_v22  ;;  %4288 = vpow2.f32 %v1046_v30  ;;  %v1326_v36 = vsub.f32 %v5430_v43, %v5733_v22  ;;  %v5740_v19 = vpop.xlane.xlu1 %964  ;;  %8399 = vst [vmem:[#allocation93_spill] sm:$0xff] %v5742_v39  ;;  %v8402_v30 = vld [vmem:[#allocation29_spill] sm:$0xff] }
 0x1d4   : > { %8398 = vst [vmem:[#allocation92_spill] sm:$0xff] %v5740_v19  ;;  %1424 = vadd.xlane.f32.xlu1 %v5742_v39  ;;  %4290 = vpow2.f32 %v1048_v61  ;;  %v1013_v4 = vsub.f32 %v8401_v8, %v5740_v19 }
 0x1d5   : > { %v4281_v42 = vpop.eup %4280  ;;  %v1366_v29 = vmul.f32 1.442695, %v1326_v36 }
 0x1d6   : > { %v5745_v10 = vpop.xlane.xlu0 %962  ;;  %1114 = vadd.xlane.f32.xlu0 %v4281_v42  ;;  %v4283_v47 = vpop.eup %4282  ;;  %v1060_v61 = vmul.f32 1.442695, %v1013_v4  ;;  %v8407_v42 = vld [vmem:[#allocation30_spill] sm:$0xff] }
 0x1d7   : > { %8400 = vst [vmem:[#allocation94_spill] sm:$0xff] %v5745_v10  ;;  %4292 = vpow2.f32 %v1366_v29  ;;  %v1012_v43 = vsub.f32 %v8402_v30, %v5745_v10  ;;  %v5751_v23 = vpop.xlane.xlu1 %1284 }
 0x1d8   : > { %8403 = vst [vmem:[#allocation95_spill] sm:$0xff] %v5751_v23  ;;  %1116 = vadd.xlane.f32.xlu1 %v4283_v47  ;;  %4294 = vpow2.f32 %v1368_v40  ;;  %v1333_v27 = vsub.f32 %v8406_v44, %v5751_v23 }
 0x1d9   : > { %v5753_v50 = vpop.eup %4284  ;;  %v1058_v36 = vmul.f32 1.442695, %v1012_v43 }
 0x1da   : > { %8404 = vst [vmem:[#allocation96_spill] sm:$0xff] %v5753_v50  ;;  %v5755_v45 = vpop.xlane.xlu0 %1282  ;;  %1434 = vadd.xlane.f32.xlu0 %v5753_v50  ;;  %v5764_v30 = vpop.eup %4286  ;;  %v1380_v47 = vmul.f32 1.442695, %v1333_v27 }
 0x1db   : > { %8405 = vst [vmem:[#allocation97_spill] sm:$0xff] %v5755_v45  ;;  %4296 = vpow2.f32 %v1058_v36  ;;  %v1332_v29 = vsub.f32 %v8407_v42, %v5755_v45  ;;  %v5762_v19 = vpop.xlane.xlu1 %960  ;;  %8409 = vst [vmem:[#allocation99_spill] sm:$0xff] %v5764_v30 }
 0x1dc   : > { %8408 = vst [vmem:[#allocation98_spill] sm:$0xff] %v5762_v19  ;;  %1436 = vadd.xlane.f32.xlu1 %v5764_v30  ;;  %4298 = vpow2.f32 %v1060_v61  ;;  %v1011_v40 = vsub.f32 %v5468_v15, %v5762_v19 }
 0x1dd   : > { %v4289_v8 = vpop.eup %4288  ;;  %v1378_v43 = vmul.f32 1.442695, %v1332_v29 }
 0x1de   : > { %v5767_v4 = vpop.xlane.xlu0 %958  ;;  %1110 = vadd.xlane.f32.xlu0 %v4289_v8  ;;  %v4291_v42 = vpop.eup %4290  ;;  %v1056_v61 = vmul.f32 1.442695, %v1011_v40 }
 0x1df   : > { %8410 = vst [vmem:[#allocation100_spill] sm:$0xff] %v5767_v4  ;;  %4300 = vpow2.f32 %v1378_v43  ;;  %v1010_v36 = vsub.f32 %v5456_v63, %v5767_v4  ;;  %v5773_v23 = vpop.xlane.xlu1 %1280 }
 0x1e0   : > { %8411 = vst [vmem:[#allocation101_spill] sm:$0xff] %v5773_v23  ;;  %1112 = vadd.xlane.f32.xlu1 %v4291_v42  ;;  %4302 = vpow2.f32 %v1380_v47  ;;  %v1331_v44 = vsub.f32 %v5466_v11, %v5773_v23 }
 0x1e1   : > { %v5775_v50 = vpop.eup %4292  ;;  %v1054_v29 = vmul.f32 1.442695, %v1010_v36 }
 0x1e2   : > { %8412 = vst [vmem:[#allocation102_spill] sm:$0xff] %v5775_v50  ;;  %v5777_v27 = vpop.xlane.xlu0 %1278  ;;  %1430 = vadd.xlane.f32.xlu0 %v5775_v50  ;;  %v5786_v19 = vpop.eup %4294  ;;  %v1376_v42 = vmul.f32 1.442695, %v1331_v44 }
 0x1e3   : > { %8413 = vst [vmem:[#allocation103_spill] sm:$0xff] %v5777_v27  ;;  %4304 = vpow2.f32 %v1054_v29  ;;  %v1330_v8 = vsub.f32 %v5458_v1, %v5777_v27  ;;  %v5784_v43 = vpop.xlane.xlu1 %972  ;;  %8415 = vst [vmem:[#allocation105_spill] sm:$0xff] %v5786_v19 }
 0x1e4   : > { %8414 = vst [vmem:[#allocation104_spill] sm:$0xff] %v5784_v43  ;;  %1432 = vadd.xlane.f32.xlu1 %v5786_v19  ;;  %4306 = vpow2.f32 %v1056_v61  ;;  %v1017_v40 = vsub.f32 %v5488_v37, %v5784_v43 }
 0x1e5   : > { %v4297_v63 = vpop.eup %4296  ;;  %v1374_v36 = vmul.f32 1.442695, %v1330_v8 }
 0x1e6   : > { %v5789_v47 = vpop.xlane.xlu0 %970  ;;  %1122 = vadd.xlane.f32.xlu0 %v4297_v63  ;;  %v4299_v1 = vpop.eup %4298  ;;  %v1068_v61 = vmul.f32 1.442695, %v1017_v40 }
 0x1e7   : > { %8416 = vst [vmem:[#allocation106_spill] sm:$0xff] %v5789_v47  ;;  %4308 = vpow2.f32 %v1374_v36  ;;  %v1016_v29 = vsub.f32 %v5476_v26, %v5789_v47  ;;  %v5795_v23 = vpop.xlane.xlu1 %1292 }
 0x1e8   : > { %8417 = vst [vmem:[#allocation107_spill] sm:$0xff] %v5795_v23  ;;  %1124 = vadd.xlane.f32.xlu1 %v4299_v1  ;;  %4310 = vpow2.f32 %v1376_v42  ;;  %v1337_v11 = vsub.f32 %v5491_v38, %v5795_v23 }
 0x1e9   : > { %v5797_v50 = vpop.eup %4300  ;;  %v1066_v8 = vmul.f32 1.442695, %v1016_v29 }
 0x1ea   : > { %8418 = vst [vmem:[#allocation108_spill] sm:$0xff] %v5797_v50  ;;  %v5799_v44 = vpop.xlane.xlu0 %1290  ;;  %1442 = vadd.xlane.f32.xlu0 %v5797_v50  ;;  %v5808_v43 = vpop.eup %4302  ;;  %v1388_v42 = vmul.f32 1.442695, %v1337_v11 }
 0x1eb   : > { %8419 = vst [vmem:[#allocation109_spill] sm:$0xff] %v5799_v44  ;;  %4312 = vpow2.f32 %v1066_v8  ;;  %v1336_v63 = vsub.f32 %v5481_v32, %v5799_v44  ;;  %v5806_v36 = vpop.xlane.xlu1 %968  ;;  %8421 = vst [vmem:[#allocation111_spill] sm:$0xff] %v5808_v43 }
 0x1ec   : > { %8420 = vst [vmem:[#allocation110_spill] sm:$0xff] %v5806_v36  ;;  %v1015_v1 = vsub.f32 %v5496_v49, %v5806_v36  ;;  %1444 = vadd.xlane.f32.xlu1 %v5808_v43  ;;  %4314 = vpow2.f32 %v1068_v61 }
 0x1ed   : > { %v4305_v26 = vpop.eup %4304  ;;  %v1386_v29 = vmul.f32 1.442695, %v1336_v63 }
 0x1ee   : > { %v5813_v40 = vpop.xlane.xlu0 %966  ;;  %1118 = vadd.xlane.f32.xlu0 %v4305_v26  ;;  %v4307_v32 = vpop.eup %4306  ;;  %v1064_v38 = vmul.f32 1.442695, %v1015_v1 }
 0x1ef   : > { %8422 = vst [vmem:[#allocation112_spill] sm:$0xff] %v5813_v40  ;;  %4316 = vpow2.f32 %v1386_v29  ;;  %v1014_v8 = vsub.f32 %v5484_v34, %v5813_v40  ;;  %v5817_v23 = vpop.xlane.xlu1 %1288 }
 0x1f0   : > { %8423 = vst [vmem:[#allocation113_spill] sm:$0xff] %v5817_v23  ;;  %v1335_v36 = vsub.f32 %v5494_v41, %v5817_v23  ;;  %1120 = vadd.xlane.f32.xlu1 %v4307_v32  ;;  %4318 = vpow2.f32 %v1388_v42 }
 0x1f1   : > { %v5819_v50 = vpop.eup %4308  ;;  %v1062_v63 = vmul.f32 1.442695, %v1014_v8  ;;  %v3949_v26 = vpop.f32.mrb[32].mxu0 }
 0x1f2   : > { %8424 = vst [vmem:[#allocation114_spill] sm:$0xff] %v5819_v50  ;;  %v5823_v11 = vpop.xlane.xlu0 %1286  ;;  %1438 = vadd.xlane.f32.xlu0 %v5819_v50  ;;  %v5826_v61 = vpop.f32.mrb[32].mxu1  ;;  %v1384_v23 = vmul.f32 1.442695, %v1335_v36 }
 0x1f3   : > { %8425 = vst [vmem:[#allocation115_spill] sm:$0xff] %v5823_v11  ;;  %4320 = vpow2.f32 %v1062_v63  ;;  %v1334_v29 = vsub.f32 %v5486_v35, %v5823_v11  ;;  %v2066_v34 = vpop.f32.mrb[33].mxu0  ;;  %v5830_v49 = vpop.eup %4310 }
 0x1f4   : > { %8426 = vst [vmem:[#allocation116_spill] sm:$0xff] %v5830_v49  ;;  %v5832_v1 = vpop.f32.mrb[33].mxu1  ;;  %v3950_v8 = vpop.f32.mrb[34].mxu0  ;;  %4322 = vpow2.f32 %v1064_v38  ;;  %1440 = vadd.xlane.f32.xlu1 %v5830_v49 }
 0x1f5   : > { %v4313_v32 = vpop.eup %4312  ;;  %v1382_v42 = vmul.f32 1.442695, %v1334_v29  ;;  %v5834_v41 = vpop.f32.mrb[34].mxu1  ;;  %4324 = vtanh.f32 %v3949_v26 }
 0x1f6   : > { %v2069_v50 = vpop.f32.mrb[35].mxu0  ;;  %v5837_v63 = vpop.f32.mrb[35].mxu1  ;;  %1130 = vadd.xlane.f32.xlu0 %v4313_v32 }
 0x1f7   : > { %v5839_v35 = vpop.xlane.xlu0 %978  ;;  %4326 = vpow2.f32 %v1382_v42  ;;  %v5843_v15 = vpop.xlane.xlu1 %980 }
 0x1f8   : > { %8427 = vst [vmem:[#allocation117_spill] sm:$0xff] %v5839_v35  ;;  %v1020_v37 = vsub.f32 %v5504_v57, %v5839_v35  ;;  %8428 = vst [vmem:[#allocation118_spill] sm:$0xff] %v5843_v15  ;;  %v4315_v38 = vpop.eup %4314  ;;  %4328 = vtanh.f32 %v2066_v34  ;;  %v1021_v36 = vsub.f32 %v5516_v17, %v5843_v15 }
 0x1f9   : > { %v5848_v29 = vpop.eup %4316  ;;  %4330 = vpow2.f32 %v1384_v23  ;;  %1132 = vadd.xlane.f32.xlu1 %v4315_v38 }
 0x1fa   : > { %8429 = vst [vmem:[#allocation119_spill] sm:$0xff] %v5848_v29  ;;  %4332 = vtanh.f32 %v3950_v8  ;;  %v1074_v26 = vmul.f32 1.442695, %v1020_v37  ;;  %1450 = vadd.xlane.f32.xlu0 %v5848_v29  ;;  %v1076_v32 = vmul.f32 1.442695, %v1021_v36  ;;  %v5859_v15 = vpop.eup %4318  ;;  %v5863_v37 = vpop.f32.mrb[36].mxu1 }
 0x1fb   : > { %v5850_v49 = vpop.xlane.xlu0 %1298  ;;  %v5857_v34 = vpop.xlane.xlu1 %1300  ;;  %8432 = vst [vmem:[#allocation122_spill] sm:$0xff] %v5859_v15  ;;  %4334 = vtanh.f32 %v2069_v50 }
 0x1fc   : > { %8430 = vst [vmem:[#allocation120_spill] sm:$0xff] %v5850_v49  ;;  %v1340_v42 = vsub.f32 %v5509_v9, %v5850_v49  ;;  %8431 = vst [vmem:[#allocation121_spill] sm:$0xff] %v5857_v34  ;;  %v3953_v57 = vpop.f32.mrb[36].mxu0  ;;  %v1341_v23 = vsub.f32 %v5519_v18, %v5857_v34  ;;  %v5865_v29 = vpop.f32.mrb[37].mxu1  ;;  %4336 = vpow2.f32 %v1074_v26 }
 0x1fd   : > { %v2082_v8 = vpop.f32.mrb[37].mxu0  ;;  %v4321_v38 = vpop.eup %4320  ;;  %1452 = vadd.xlane.f32.xlu1 %v5859_v15  ;;  %4338 = vpow2.f32 %v1076_v32 }
 0x1fe   : > { %v1394_v17 = vmul.f32 1.442695, %v1340_v42  ;;  %v3954_v36 = vpop.f32.mrb[38].mxu0  ;;  %v5868_v9 = vpop.f32.mrb[38].mxu1  ;;  %1126 = vadd.xlane.f32.xlu0 %v4321_v38  ;;  %v1396_v19 = vmul.f32 1.442695, %v1341_v23 }
 0x1ff   : > { %v5870_v43 = vpop.xlane.xlu0 %974  ;;  %v4323_v50 = vpop.eup %4322 }
 0x200   : > { %8433 = vst [vmem:[#allocation123_spill] sm:$0xff] %v5870_v43  ;;  %v5872_v34 = vpop.f32.mrb[39].mxu1  ;;  %v5874_v18 = vpop.xlane.xlu1 %976  ;;  %4340 = vpow2.f32 %v1394_v17  ;;  %v1018_v26 = vsub.f32 %v5512_v13, %v5870_v43 }
 0x201   : > { %8434 = vst [vmem:[#allocation124_spill] sm:$0xff] %v5874_v18  ;;  %v5876_v30 = vpop.eup %4324  ;;  %v2085_v42 = vpop.f32.mrb[39].mxu0  ;;  %1128 = vadd.xlane.f32.xlu1 %v4323_v50  ;;  %4342 = vtanh.f32 %v3953_v57  ;;  %v1019_v17 = vsub.f32 %v5524_v31, %v5874_v18 }
 0x202   : > { %v5878_v39 = vpop.eup %4326  ;;  %3485 = vst [vmem:[%s5880_s23 + $0x10] sm:$0xff] %v5876_v30  ;;  %4344 = vpow2.f32 %v1396_v19 }
 0x203   : > { %8435 = vst [vmem:[#allocation125_spill] sm:$0xff] %v5878_v39  ;;  %v5886_v32 = vpop.eup %4328  ;;  %v5890_v23 = vpop.xlane.xlu0 %1294  ;;  %1446 = vadd.xlane.f32.xlu0 %v5878_v39  ;;  %4346 = vtanh.f32 %v2082_v8  ;;  %v1070_v39 = vmul.f32 1.442695, %v1018_v26  ;;  %v1072_v8 = vmul.f32 1.442695, %v1019_v17 }
 0x204   : > { %8436 = vst [vmem:[#allocation126_spill] sm:$0xff] %v5890_v23  ;;  %v5893_v38 = vpop.eup %4330  ;;  %3483 = vst [vmem:[%s5880_s23] sm:$0xff] %v5886_v32  ;;  %v5897_v15 = vpop.xlane.xlu1 %1296  ;;  %v1338_v57 = vsub.f32 %v5514_v16, %v5890_v23  ;;  %4348 = vtanh.f32 %v3954_v36 }
 0x205   : > { %8437 = vst [vmem:[#allocation127_spill] sm:$0xff] %v5893_v38  ;;  %8438 = vst [vmem:[#allocation128_spill] sm:$0xff] %v5897_v15  ;;  %v5899_v13 = vpop.f32.mrb[40].mxu0  ;;  %v5901_v50 = vpop.eup %4332  ;;  %1448 = vadd.xlane.f32.xlu1 %v5893_v38  ;;  %v1339_v16 = vsub.f32 %v5522_v21, %v5897_v15  ;;  %4350 = vpow2.f32 %v1070_v39 }
 0x206   : > { %v5905_v18 = vpop.f32.mrb[40].mxu1  ;;  %v5907_v31 = vpop.f32.mrb[41].mxu0  ;;  %3486 = vst [vmem:[%s5880_s23 + $0x18] sm:$0xff] %v5901_v50  ;;  %v1390_v23 = vmul.f32 1.442695, %v1338_v57  ;;  %4352 = vpow2.f32 %v1072_v8 }
 0x207   : > { %v5912_v19 = vpop.f32.mrb[41].mxu1  ;;  %v5914_v25 = vpop.f32.mrb[42].mxu0  ;;  %v1392_v43 = vmul.f32 1.442695, %v1339_v16  ;;  %4354 = vtanh.f32 %v2085_v42 }
 0x208   : > { %v5916_v24 = vpop.eup %4334  ;;  %v5920_v14 = vpop.xlane.xlu0 %986  ;;  %4356 = vpow2.f32 %v1390_v23 }
 0x209   : > { %8439 = vst [vmem:[#allocation129_spill] sm:$0xff] %v5920_v14  ;;  %v5922_v59 = vpop.f32.mrb[42].mxu1  ;;  %3484 = vst [vmem:[%s5880_s23 + $0x8] sm:$0xff] %v5916_v24  ;;  %v1024_v26 = vsub.f32 %v5532_v52, %v5920_v14  ;;  %v5928_v38 = vpop.xlane.xlu1 %988  ;;  %4358 = vpow2.f32 %v1392_v43 }
 0x20a   : > { %8440 = vst [vmem:[#allocation130_spill] sm:$0xff] %v5928_v38  ;;  %v5930_v2 = vpop.f32.mrb[43].mxu1  ;;  %v4337_v51 = vpop.eup %4336  ;;  %v1025_v15 = vsub.f32 %v5544_v20, %v5928_v38 }
 0x20b   : > { %v5932_v36 = vpop.f32.mrb[43].mxu0  ;;  %v4339_v17 = vpop.eup %4338  ;;  %1138 = vadd.xlane.f32.xlu0 %v4337_v51  ;;  %v1082_v14 = vmul.f32 1.442695, %v1024_v26 }
 0x20c   : > { %v5936_v21 = vpop.eup %4340  ;;  %v5938_v52 = vpop.xlane.xlu0 %1306  ;;  %1140 = vadd.xlane.f32.xlu1 %v4339_v17  ;;  %v1084_v42 = vmul.f32 1.442695, %v1025_v15 }
 0x20d   : > { %8441 = vst [vmem:[#allocation131_spill] sm:$0xff] %v5936_v21  ;;  %8442 = vst [vmem:[#allocation132_spill] sm:$0xff] %v5938_v52  ;;  %v1344_v57 = vsub.f32 %v5537_v58, %v5938_v52  ;;  %v5942_v49 = vpop.xlane.xlu1 %1308  ;;  %v5944_v39 = vpop.f32.mrb[44].mxu0  ;;  %4360 = vpow2.f32 %v1082_v14 }
 0x20e   : > { %8443 = vst [vmem:[#allocation133_spill] sm:$0xff] %v5942_v49  ;;  %v5946_v38 = vpop.eup %4342  ;;  %v5948_v51 = vpop.f32.mrb[44].mxu1  ;;  %4362 = vpow2.f32 %v1084_v42 }
 0x20f   : > { %v5950_v8 = vpop.f32.mrb[45].mxu0  ;;  %v5952_v16 = vpop.eup %4344  ;;  %3489 = vst [vmem:[%s5880_s23 + $0x30] sm:$0xff] %v5946_v38  ;;  %1458 = vadd.xlane.f32.xlu0 %v5936_v21  ;;  %v1402_v15 = vmul.f32 1.442695, %v1344_v57  ;;  %4364 = vtanh.f32 %v5899_v13 }
 0x210   : > { %8444 = vst [vmem:[#allocation134_spill] sm:$0xff] %v5952_v16  ;;  %v5957_v26 = vpop.f32.mrb[45].mxu1  ;;  %v5959_v17 = vpop.f32.mrb[46].mxu0  ;;  %1460 = vadd.xlane.f32.xlu1 %v5952_v16 }
 0x211   : > { %v5961_v20 = vpop.eup %4346  ;;  %v5963_v23 = vpop.xlane.xlu0 %982  ;;  %4366 = vpow2.f32 %v1402_v15 }
 0x212   : > { %8445 = vst [vmem:[#allocation135_spill] sm:$0xff] %v5963_v23  ;;  %v5966_v58 = vpop.f32.mrb[46].mxu1  ;;  %3487 = vst [vmem:[%s5880_s23 + $0x20] sm:$0xff] %v5961_v20  ;;  %v5970_v52 = vpop.xlane.xlu1 %984  ;;  %v1022_v43 = vsub.f32 %v5540_v62, %v5963_v23  ;;  %4368 = vtanh.f32 %v5907_v31 }
 0x213   : > { %8446 = vst [vmem:[#allocation136_spill] sm:$0xff] %v5970_v52  ;;  %v5972_v21 = vpop.f32.mrb[47].mxu1  ;;  %v5974_v35 = vpop.eup %4348  ;;  %v1023_v14 = vsub.f32 %v5552_v33, %v5970_v52  ;;  %4370 = vtanh.f32 %v5914_v25 }
 0x214   : > { %v5976_v11 = vpop.f32.mrb[47].mxu0  ;;  %3490 = vst [vmem:[%s5880_s23 + $0x38] sm:$0xff] %v5974_v35  ;;  %v4351_v16 = vpop.eup %4350  ;;  %v1078_v33 = vmul.f32 1.442695, %v1022_v43 }
 0x215   : > { %v5985_v57 = vpop.xlane.xlu0 %1302  ;;  %v5989_v44 = vpop.f32.mrb[48].mxu0  ;;  %1134 = vadd.xlane.f32.xlu0 %v4351_v16  ;;  %v1080_v31 = vmul.f32 1.442695, %v1023_v14  ;;  %v1345_v14 = vsub.f32 %v5547_v28, %v5942_v49 }
 0x216   : > { %8447 = vst [vmem:[#allocation137_spill] sm:$0xff] %v5985_v57  ;;  %v5987_v40 = vpop.xlane.xlu1 %1304  ;;  %v4353_v47 = vpop.eup %4352  ;;  %v1342_v42 = vsub.f32 %v5542_v12, %v5985_v57  ;;  %4372 = vpow2.f32 %v1078_v33 }
 0x217   : > { %8448 = vst [vmem:[#allocation138_spill] sm:$0xff] %v5987_v40  ;;  %v5994_v13 = vpop.f32.mrb[48].mxu1  ;;  %v5996_v62 = vpop.f32.mrb[49].mxu0  ;;  %1136 = vadd.xlane.f32.xlu1 %v4353_v47  ;;  %4374 = vpow2.f32 %v1080_v31  ;;  %v1404_v28 = vmul.f32 1.442695, %v1345_v14 }
 0x218   : > { %8449 = vst [vmem:[#allocation139_spill] sm:$0xff] %v5994_v13  ;;  %v5998_v52 = vpop.eup %4354  ;;  %v6000_v15 = vpop.f32.mrb[49].mxu1  ;;  %v1398_v43 = vmul.f32 1.442695, %v1342_v42  ;;  %4376 = vtanh.f32 %v5932_v36 }
 0x219   : > { %8450 = vst [vmem:[#allocation140_spill] sm:$0xff] %v6000_v15  ;;  %v6002_v23 = vpop.f32.mrb[50].mxu0  ;;  %v6004_v27 = vpop.eup %4356  ;;  %3488 = vst [vmem:[%s5880_s23 + $0x28] sm:$0xff] %v5998_v52 }
 0x21a   : > { %8451 = vst [vmem:[#allocation141_spill] sm:$0xff] %v6004_v27  ;;  %v6009_v16 = vpop.xlane.xlu0 %994  ;;  %v6011_v12 = vpop.f32.mrb[50].mxu1  ;;  %1454 = vadd.xlane.f32.xlu0 %v6004_v27  ;;  %4378 = vpow2.f32 %v1398_v43 }
 0x21b   : > { %8452 = vst [vmem:[#allocation142_spill] sm:$0xff] %v6009_v16  ;;  %8453 = vst [vmem:[#allocation143_spill] sm:$0xff] %v6011_v12  ;;  %v6013_v57 = vpop.xlane.xlu1 %996  ;;  %v6015_v4 = vpop.f32.mrb[51].mxu1 }
 0x21c   : > { %8454 = vst [vmem:[#allocation144_spill] sm:$0xff] %v6013_v57  ;;  %8455 = vst [vmem:[#allocation145_spill] sm:$0xff] %v6015_v4  ;;  %v6017_v47 = vpop.eup %4358  ;;  %v1029_v45 = vsub.f32 %v5568_v55, %v6013_v57  ;;  %v6022_v10 = vpop.f32.mrb[51].mxu0 }
 0x21d   : > { %8456 = vst [vmem:[#allocation146_spill] sm:$0xff] %v6017_v47  ;;  %v4361_v25 = vpop.eup %4360  ;;  %1456 = vadd.xlane.f32.xlu1 %v6017_v47  ;;  %v6032_v57 = vpop.f32.mrb[52].mxu0 }
 0x21e   : > { %v6027_v15 = vpop.xlane.xlu0 %1314  ;;  %v4363_v4 = vpop.eup %4362  ;;  %v1092_v42 = vmul.f32 1.442695, %v1029_v45  ;;  %1146 = vadd.xlane.f32.xlu0 %v4361_v25  ;;  %v8461_v45 = vld [vmem:[#allocation59_spill] sm:$0xff] }
 0x21f   : > { %8457 = vst [vmem:[#allocation147_spill] sm:$0xff] %v6027_v15  ;;  %v6030_v27 = vpop.xlane.xlu1 %1316  ;;  %v6034_v55 = vpop.eup %4364  ;;  %v1343_v36 = vsub.f32 %v8461_v45, %v5987_v40  ;;  %v8466_v45 = vld [vmem:[#allocation61_spill] sm:$0xff] }
 0x220   : > { %8458 = vst [vmem:[#allocation148_spill] sm:$0xff] %v6030_v27  ;;  %v6036_v33 = vpop.f32.mrb[52].mxu1  ;;  %v6038_v49 = vpop.f32.mrb[53].mxu0  ;;  %3493 = vst [vmem:[%s5880_s23 + $0x50] sm:$0xff] %v6034_v55  ;;  %4380 = vpow2.f32 %v1092_v42 }
 0x221   : > { %8459 = vst [vmem:[#allocation149_spill] sm:$0xff] %v6036_v33  ;;  %v6040_v31 = vpop.eup %4366  ;;  %1148 = vadd.xlane.f32.xlu1 %v4363_v4  ;;  %v6046_v47 = vpop.f32.mrb[53].mxu1  ;;  %4382 = vpow2.f32 %v1404_v28  ;;  %v1400_v40 = vmul.f32 1.442695, %v1343_v36 }
 0x222   : > { %8460 = vst [vmem:[#allocation150_spill] sm:$0xff] %v6040_v31  ;;  %8462 = vst [vmem:[#allocation151_spill] sm:$0xff] %v6046_v47  ;;  %v6048_v22 = vpop.f32.mrb[54].mxu0  ;;  %v6050_v43 = vpop.eup %4368  ;;  %1466 = vadd.xlane.f32.xlu0 %v6040_v31  ;;  %v1028_v47 = vsub.f32 %v8466_v45, %v6009_v16  ;;  %4384 = vtanh.f32 %v5944_v39  ;;  %v8472_v16 = vld [vmem:[#allocation64_spill] sm:$0xff] }
 0x223   : > { %v6052_v25 = vpop.f32.mrb[54].mxu1  ;;  %3491 = vst [vmem:[%s5880_s23 + $0x40] sm:$0xff] %v6050_v43  ;;  %v6058_v14 = vpop.eup %4370  ;;  %4386 = vtanh.f32 %v5950_v8  ;;  %v1348_v56 = vsub.f32 %v8472_v16, %v6027_v15  ;;  %v8476_v15 = vld [vmem:[#allocation62_spill] sm:$0xff] }
 0x224   : > { %8463 = vst [vmem:[#allocation152_spill] sm:$0xff] %v6052_v25  ;;  %v6056_v33 = vpop.f32.mrb[55].mxu1  ;;  %v6061_v3 = vpop.xlane.xlu1 %992  ;;  %3494 = vst [vmem:[%s5880_s23 + $0x58] sm:$0xff] %v6058_v14  ;;  %4388 = vpow2.f32 %v1400_v40  ;;  %v1090_v39 = vmul.f32 1.442695, %v1028_v47 }
 0x225   : > { %8464 = vst [vmem:[#allocation153_spill] sm:$0xff] %v6056_v33  ;;  %8465 = vst [vmem:[#allocation154_spill] sm:$0xff] %v6061_v3  ;;  %v6063_v4 = vpop.f32.mrb[55].mxu0  ;;  %v4373_v42 = vpop.eup %4372  ;;  %v8468_v33 = vld [vmem:[#allocation68_spill] sm:$0xff]  ;;  %4390 = vtanh.f32 %v5959_v17  ;;  %v1410_v16 = vmul.f32 1.442695, %v1348_v56 }
 0x226   : > { %v6070_v25 = vpop.xlane.xlu0 %990  ;;  %v1027_v31 = vsub.f32 %v8468_v33, %v6061_v3  ;;  %v6074_v13 = vpop.f32.mrb[56].mxu1  ;;  %1142 = vadd.xlane.f32.xlu0 %v4373_v42  ;;  %4392 = vpow2.f32 %v1090_v39  ;;  %v8480_v56 = vld [vmem:[#allocation65_spill] sm:$0xff] }
 0x227   : > { %8467 = vst [vmem:[#allocation155_spill] sm:$0xff] %v6070_v25  ;;  %8469 = vst [vmem:[#allocation156_spill] sm:$0xff] %v6074_v13  ;;  %v4375_v12 = vpop.eup %4374  ;;  %v6077_v28 = vpop.f32.mrb[56].mxu0  ;;  %4394 = vtanh.f32 %v5976_v11 }
 0x228   : > { %v6079_v36 = vpop.f32.mrb[57].mxu1  ;;  %v6081_v45 = vpop.eup %4376  ;;  %1144 = vadd.xlane.f32.xlu1 %v4375_v12  ;;  %v1088_v40 = vmul.f32 1.442695, %v1027_v31 }
 0x229   : > { %8470 = vst [vmem:[#allocation157_spill] sm:$0xff] %v6079_v36  ;;  %8471 = vst [vmem:[#allocation158_spill] sm:$0xff] %v6081_v45  ;;  %v6085_v7 = vpop.f32.mrb[57].mxu0  ;;  %v6087_v3 = vpop.f32.mrb[58].mxu1  ;;  %v1026_v36 = vsub.f32 %v8476_v15, %v6070_v25 }
 0x22a   : > { %8473 = vst [vmem:[#allocation159_spill] sm:$0xff] %v6087_v3  ;;  %v6089_v33 = vpop.eup %4378  ;;  %3492 = vst [vmem:[%s5880_s23 + $0x48] sm:$0xff] %v6081_v45  ;;  %v6094_v8 = vpop.f32.mrb[58].mxu0  ;;  %4396 = vpow2.f32 %v1088_v40 }
 0x22b   : > { %8474 = vst [vmem:[#allocation160_spill] sm:$0xff] %v6089_v33  ;;  %v6096_v42 = vpop.f32.mrb[59].mxu1  ;;  %v6098_v47 = vpop.f32.mrb[59].mxu0  ;;  %1462 = vadd.xlane.f32.xlu0 %v6089_v33  ;;  %4398 = vpow2.f32 %v1410_v16  ;;  %v1086_v11 = vmul.f32 1.442695, %v1026_v36 }
 0x22c   : > { %8475 = vst [vmem:[#allocation161_spill] sm:$0xff] %v6096_v42  ;;  %v4381_v12 = vpop.eup %4380  ;;  %v6103_v13 = vpop.xlane.xlu0 %1310  ;;  %4400 = vtanh.f32 %v5989_v44 }
 0x22d   : > { %8477 = vst [vmem:[#allocation162_spill] sm:$0xff] %v6103_v13  ;;  %1156 = vadd.xlane.f32.xlu1 %v4381_v12  ;;  %v6106_v17 = vpop.eup %4382  ;;  %v6108_v31 = vpop.f32.mrb[60].mxu1  ;;  %v1346_v39 = vsub.f32 %v8480_v56, %v6103_v13  ;;  %4402 = vtanh.f32 %v5996_v62 }
 0x22e   : > { %8478 = vst [vmem:[#allocation163_spill] sm:$0xff] %v6106_v17  ;;  %8479 = vst [vmem:[#allocation164_spill] sm:$0xff] %v6108_v31  ;;  %v6110_v42 = vpop.f32.mrb[60].mxu0  ;;  %v6112_v33 = vpop.eup %4384  ;;  %4404 = vpow2.f32 %v1086_v11 }
 0x22f   : > { %1468 = vadd.xlane.f32.xlu0 %v6106_v17  ;;  %v6117_v15 = vpop.f32.mrb[61].mxu0  ;;  %v6119_v25 = vpop.f32.mrb[61].mxu1  ;;  %3497 = vst [vmem:[%s5880_s23 + $0x70] sm:$0xff] %v6112_v33  ;;  %v1406_v36 = vmul.f32 1.442695, %v1346_v39  ;;  %4406 = vtanh.f32 %v6002_v23  ;;  %v8487_v39 = vld [vmem:[#allocation67_spill] sm:$0xff] }
 0x230   : > { %8481 = vst [vmem:[#allocation165_spill] sm:$0xff] %v6119_v25  ;;  %v6123_v40 = vpop.f32.mrb[62].mxu0  ;;  %v6125_v12 = vpop.f32.mrb[62].mxu1  ;;  %v8485_v25 = vld [vmem:[#allocation66_spill] sm:$0xff] }
 0x231   : > { %8482 = vst [vmem:[#allocation166_spill] sm:$0xff] %v6125_v12  ;;  %v6127_v31 = vpop.eup %4386  ;;  %v6130_v56 = vpop.f32.mrb[63].mxu1  ;;  %v1349_v12 = vsub.f32 %v8485_v25, %v6030_v27  ;;  %4408 = vpow2.f32 %v1406_v36 }
 0x232   : > { %8483 = vst [vmem:[#allocation167_spill] sm:$0xff] %v6130_v56  ;;  %v6132_v17 = vpop.f32.mrb[63].mxu0  ;;  %v6134_v13 = vpop.eup %4388  ;;  %3495 = vst [vmem:[%s5880_s23 + $0x60] sm:$0xff] %v6127_v31  ;;  %4410 = vtanh.f32 %v6022_v10 }
 0x233   : > { %8484 = vst [vmem:[#allocation168_spill] sm:$0xff] %v6134_v13  ;;  %v6138_v16 = vpop.eup %4390  ;;  %1464 = vadd.xlane.f32.xlu0 %v6134_v13  ;;  %v6146_v44 = vpop.xlane.xlu1 %1312  ;;  %v1412_v45 = vmul.f32 1.442695, %v1349_v12  ;;  %4412 = vtanh.f32 %v6032_v57 }
 0x234   : > { %3498 = vst [vmem:[%s5880_s23 + $0x78] sm:$0xff] %v6138_v16  ;;  %8486 = vst [vmem:[#allocation169_spill] sm:$0xff] %v6146_v44  ;;  %v4393_v56 = vpop.eup %4392  ;;  %v1347_v13 = vsub.f32 %v8487_v39, %v6146_v44  ;;  %4414 = vtanh.f32 %v5834_v41 }
 0x235   : > { %v6149_v3 = vpop.eup %4394  ;;  %4416 = vtanh.f32 %v6038_v49 }
 0x236   : > { %v4397_v62 = vpop.eup %4396  ;;  %3496 = vst [vmem:[%s5880_s23 + $0x68] sm:$0xff] %v6149_v3  ;;  %v1408_v36 = vmul.f32 1.442695, %v1347_v13  ;;  %4418 = vpow2.f32 %v1412_v45 }
 0x237   : > { %1154 = vadd.xlane.f32.xlu0 %v4393_v56  ;;  %1152 = vadd.xlane.f32.xlu1 %v4397_v62  ;;  %v6157_v23 = vpop.eup %4398  ;;  %4420 = vtanh.f32 %v6048_v22 }
 0x238   : > { %8488 = vst [vmem:[#allocation170_spill] sm:$0xff] %v6157_v23  ;;  %v6160_v11 = vpop.eup %4400  ;;  %4422 = vtanh.f32 %v5837_v63 }
 0x239   : > { %3501 = vst [vmem:[%s5880_s23 + $0x90] sm:$0xff] %v6160_v11  ;;  %v6166_v10 = vpop.eup %4402  ;;  %4424 = vpow2.f32 %v1408_v36 }
 0x23a   : > { %v4405_v57 = vpop.eup %4404  ;;  %3499 = vst [vmem:[%s5880_s23 + $0x80] sm:$0xff] %v6166_v10  ;;  %4426 = vtanh.f32 %v6063_v4 }
 0x23b   : > { %1474 = vadd.xlane.f32.xlu0 %v6157_v23  ;;  %2487 = vmax.xlane.f32.xlu1 %v5876_v30  ;;  %v6173_v41 = vpop.eup %4406  ;;  %4428 = vtanh.f32 %v5826_v61 }
 0x23c   : > { %3502 = vst [vmem:[%s5880_s23 + $0x98] sm:$0xff] %v6173_v41  ;;  %v6178_v49 = vpop.eup %4408  ;;  %4430 = vtanh.f32 %v6077_v28 }
 0x23d   : > { %8489 = vst [vmem:[#allocation171_spill] sm:$0xff] %v6178_v49  ;;  %v6182_v22 = vpop.eup %4410  ;;  %4432 = vtanh.f32 %v6085_v7 }
 0x23e   : > { %v6185_v30 = vpop.eup %4412  ;;  %3500 = vst [vmem:[%s5880_s23 + $0x88] sm:$0xff] %v6182_v22 }
 0x23f   : > { %1150 = vadd.xlane.f32.xlu0 %v4405_v57  ;;  %2483 = vmax.xlane.f32.xlu1 %v5886_v32  ;;  %v1099_v63 = vpop.xlane.xlu0 %1098  ;;  %v6191_v13 = vpop.eup %4414  ;;  %3505 = vst [vmem:[%s5880_s23 + $0xb0] sm:$0xff] %v6185_v30 }
 0x240   : > { %4434 = vlog2.f32 %v1099_v63  ;;  %v6195_v61 = vpop.eup %4416 }
 0x241   : > { %v6198_v32 = vpop.eup %4418  ;;  %3503 = vst [vmem:[%s5880_s23 + $0xa0] sm:$0xff] %v6195_v61  ;;  %4436 = vtanh.f32 %v6094_v8 }
 0x242   : > { %8490 = vst [vmem:[#allocation172_spill] sm:$0xff] %v6198_v32  ;;  %v6203_v45 = vpop.eup %4420  ;;  %4438 = vtanh.f32 %v5832_v1 }
 0x243   : > { %1470 = vadd.xlane.f32.xlu0 %v6178_v49  ;;  %2809 = vmax.xlane.f32.xlu1 %v6191_v13  ;;  %v6207_v7 = vpop.xlane.xlu0 %1418  ;;  %v6209_v4 = vpop.xlane.xlu1 %1100  ;;  %3506 = vst [vmem:[%s5880_s23 + $0xb8] sm:$0xff] %v6203_v45 }
 0x244   : > { %8491 = vst [vmem:[#allocation173_spill] sm:$0xff] %v6209_v4  ;;  %v6211_v28 = vpop.eup %4422  ;;  %4440 = vlog2.f32 %v6207_v7  ;;  %v8546_v4 = vld [vmem:[#allocation153_spill] sm:$0xff] }
 0x245   : > { %v6216_v56 = vpop.eup %4424  ;;  %4442 = vtanh.f32 %v5868_v9 }
 0x246   : > { %8492 = vst [vmem:[#allocation174_spill] sm:$0xff] %v6216_v56  ;;  %v6219_v8 = vpop.eup %4426  ;;  %4444 = vtanh.f32 %v6098_v47 }
 0x247   : > { %1476 = vadd.xlane.f32.xlu0 %v6198_v32  ;;  %2805 = vmax.xlane.f32.xlu1 %v6211_v28  ;;  %v6222_v1 = vpop.eup %4428  ;;  %3504 = vst [vmem:[%s5880_s23 + $0xa8] sm:$0xff] %v6219_v8  ;;  %v1095_v12 = vpop.xlane.xlu0 %1094 }
 0x248   : > { %v6227_v62 = vpop.xlane.xlu1 %1420  ;;  %v6230_v36 = vpop.eup %4430  ;;  %4446 = vlog2.f32 %v1095_v12 }
 0x249   : > { %v6232_v57 = vpop.eup %4432  ;;  %3509 = vst [vmem:[%s5880_s23 + $0xd0] sm:$0xff] %v6230_v36  ;;  %4448 = vtanh.f32 %v5872_v34 }
 0x24a   : > { %v4435_v9 = vpop.eup %4434  ;;  %3507 = vst [vmem:[%s5880_s23 + $0xc0] sm:$0xff] %v6232_v57 }
 0x24b   : > { %1472 = vadd.xlane.f32.xlu0 %v6216_v56  ;;  %2495 = vmax.xlane.f32.xlu1 %v5946_v38  ;;  %v6241_v63 = vpop.xlane.xlu0 %1414  ;;  %v6243_v47 = vpop.eup %4436  ;;  %v1163_v27 = vmul.f32 0.6931472, %v4435_v9 }
 0x24c   : > { %4450 = vlog2.f32 %v6241_v63  ;;  %v6246_v12 = vpop.eup %4438  ;;  %3510 = vst [vmem:[%s5880_s23 + $0xd8] sm:$0xff] %v6243_v47 }
 0x24d   : > { %v6251_v38 = vpop.xlane.xlu1 %1096  ;;  %4452 = vtanh.f32 %v5863_v37  ;;  %v6265_v9 = vadd.f32 %v1163_v27, %v5623_v48 }
 0x24e   : > { %8493 = vst [vmem:[#allocation175_spill] sm:$0xff] %v6251_v38  ;;  %v4441_v34 = vpop.eup %4440  ;;  %4454 = vtanh.f32 %v6110_v42 }
 0x24f   : > { %2807 = vmax.xlane.f32.xlu0 %v6222_v1  ;;  %2491 = vmax.xlane.f32.xlu1 %v5961_v20  ;;  %v1483_v44 = vmul.f32 0.6931472, %v4441_v34  ;;  %v6255_v25 = vpop.eup %4442  ;;  %4456 = vtanh.f32 %v6117_v15  ;;  %8494 = vst [vmem:[#allocation176_spill] sm:$0xff] %v6265_v9 }
 0x250   : > { %v6258_v32 = vpop.eup %4444 }
 0x251   : > { %v6261_v20 = vpop.xlane.xlu1 %1416  ;;  %v6268_v37 = vadd.f32 %v1483_v44, %v5625_v53  ;;  %3508 = vst [vmem:[%s5880_s23 + $0xc8] sm:$0xff] %v6258_v32 }
 0x252   : > { %v4447_v34 = vpop.eup %4446  ;;  %v1107_v23 = vpop.xlane.xlu0 %1106 }
 0x253   : > { %2803 = vmax.xlane.f32.xlu0 %v6246_v12  ;;  %2817 = vmax.xlane.f32.xlu1 %v6255_v25  ;;  %8495 = vst [vmem:[#allocation177_spill] sm:$0xff] %v6268_v37  ;;  %4458 = vlog2.f32 %v1107_v23  ;;  %v6275_v39 = vpop.eup %4448  ;;  %v1159_v15 = vmul.f32 0.6931472, %v4447_v34  ;;  %v8521_v37 = vld [vmem:[#allocation143_spill] sm:$0xff] }
 0x254   : > { %4460 = vtanh.f32 %v5865_v29 }
 0x255   : > { %v6279_v48 = vpop.xlane.xlu1 %1108  ;;  %4462 = vtanh.f32 %v5922_v59  ;;  %v6293_v23 = vadd.f32 %v1159_v15, %v5633_v54 }
 0x256   : > { %8496 = vst [vmem:[#allocation178_spill] sm:$0xff] %v6279_v48  ;;  %v4451_v53 = vpop.eup %4450  ;;  %v6282_v27 = vpop.xlane.xlu0 %1426 }
 0x257   : > { %2489 = vmax.xlane.f32.xlu0 %v5901_v50  ;;  %2813 = vmax.xlane.f32.xlu1 %v6275_v39  ;;  %v1479_v50 = vmul.f32 0.6931472, %v4451_v53  ;;  %4464 = vlog2.f32 %v6282_v27  ;;  %v6286_v44 = vpop.eup %4452  ;;  %8497 = vst [vmem:[#allocation179_spill] sm:$0xff] %v6293_v23 }
 0x258   : > { %4466 = vtanh.f32 %v6123_v40  ;;  %v6298_v34 = vpop.eup %4454 }
 0x259   : > { %v6289_v29 = vpop.xlane.xlu1 %1428  ;;  %v6296_v59 = vadd.f32 %v1479_v50, %v5643_v46  ;;  %3513 = vst [vmem:[%s5880_s23 + $0xf0] sm:$0xff] %v6298_v34 }
 0x25b   : > { %2485 = vmax.xlane.f32.xlu0 %v5916_v24  ;;  %2503 = vmax.xlane.f32.xlu1 %v6034_v55  ;;  %8498 = vst [vmem:[#allocation180_spill] sm:$0xff] %v6296_v59  ;;  %v1103_v53 = vpop.xlane.xlu0 %1102  ;;  %v6300_v24 = vpop.eup %4456 }
 0x25c   : > { %4468 = vlog2.f32 %v1103_v53  ;;  %3511 = vst [vmem:[%s5880_s23 + $0xe0] sm:$0xff] %v6300_v24 }
 0x25d   : > { %v4459_v54 = vpop.eup %4458  ;;  %v6310_v46 = vpop.xlane.xlu1 %1104  ;;  %4470 = vtanh.f32 %v5930_v2 }
 0x25e   : > { %8499 = vst [vmem:[#allocation181_spill] sm:$0xff] %v6310_v46  ;;  %v6312_v40 = vpop.eup %4460  ;;  %v1171_v53 = vmul.f32 0.6931472, %v4459_v54  ;;  %v8528_v46 = vld [vmem:[#allocation145_spill] sm:$0xff] }
 0x25f   : > { %2815 = vmax.xlane.f32.xlu0 %v6286_v44  ;;  %2499 = vmax.xlane.f32.xlu1 %v6050_v43  ;;  %v6315_v15 = vpop.xlane.xlu0 %1422  ;;  %v6319_v50 = vpop.eup %4462 }
 0x260   : > { %4472 = vlog2.f32 %v6315_v15  ;;  %8500 = vst [vmem:[#allocation182_spill] sm:$0xff] %v6319_v50  ;;  %v6332_v49 = vadd.f32 %v1171_v53, %v5659_v0 }
 0x261   : > { %4474 = vtanh.f32 %v5905_v18  ;;  %v4465_v42 = vpop.eup %4464  ;;  %v6323_v43 = vpop.xlane.xlu1 %1424 }
 0x262   : > { %v1491_v55 = vmul.f32 0.6931472, %v4465_v42  ;;  %v6325_v2 = vpop.eup %4466  ;;  %8501 = vst [vmem:[#allocation183_spill] sm:$0xff] %v6332_v49  ;;  %v8514_v49 = vld [vmem:[#allocation85_spill] sm:$0xff] }
 0x263   : > { %2811 = vmax.xlane.f32.xlu0 %v6312_v40  ;;  %2825 = vmax.xlane.f32.xlu1 %v6319_v50  ;;  %v1115_v56 = vpop.xlane.xlu0 %1114  ;;  %3514 = vst [vmem:[%s5880_s23 + $0xf8] sm:$0xff] %v6325_v2 }
 0x264   : > { %4476 = vlog2.f32 %v1115_v56  ;;  %v6335_v18 = vadd.f32 %v1491_v55, %v5670_v5 }
 0x265   : > { %4478 = vtanh.f32 %v5912_v19  ;;  %v6339_v42 = vpop.xlane.xlu1 %1116 }
 0x266   : > { %8502 = vst [vmem:[#allocation184_spill] sm:$0xff] %v6335_v18  ;;  %v4469_v54 = vpop.eup %4468  ;;  %4480 = vtanh.f32 %v6132_v17  ;;  %8503 = vst [vmem:[#allocation185_spill] sm:$0xff] %v6339_v42 }
 0x267   : > { %2497 = vmax.xlane.f32.xlu0 %v5974_v35  ;;  %2505 = vmax.xlane.f32.xlu1 %v6058_v14  ;;  %v6341_v9 = vpop.xlane.xlu0 %1434  ;;  %v6347_v0 = vpop.eup %4470  ;;  %v1167_v5 = vmul.f32 0.6931472, %v4469_v54 }
 0x268   : > { %4482 = vlog2.f32 %v6341_v9  ;;  %8504 = vst [vmem:[#allocation186_spill] sm:$0xff] %v6347_v0 }
 0x269   : > { %v6350_v14 = vpop.xlane.xlu1 %1436  ;;  %4484 = vtanh.f32 %v5966_v58 }
 0x26a   : > { %v4473_v19 = vpop.eup %4472 }
 0x26b   : > { %2493 = vmax.xlane.f32.xlu0 %v5998_v52  ;;  %2821 = vmax.xlane.f32.xlu1 %v6347_v0  ;;  %v6352_v17 = vpop.eup %4474  ;;  %v1487_v56 = vmul.f32 0.6931472, %v4473_v19  ;;  %v1111_v55 = vpop.xlane.xlu0 %1110  ;;  %v6358_v52 = vadd.f32 %v1167_v5, %v5681_v60 }
 0x26c   : > { %8505 = vst [vmem:[#allocation187_spill] sm:$0xff] %v6352_v17  ;;  %4486 = vlog2.f32 %v1111_v55 }
 0x26d   : > { %4488 = vtanh.f32 %v5948_v51  ;;  %8506 = vst [vmem:[#allocation188_spill] sm:$0xff] %v6358_v52  ;;  %v6361_v53 = vadd.f32 %v1487_v56, %v5690_v6  ;;  %v6364_v35 = vpop.xlane.xlu1 %1112  ;;  %v8510_v56 = vld [vmem:[#allocation158_spill] sm:$0xff] }
 0x26e   : > { %v4477_v54 = vpop.eup %4476  ;;  %8508 = vst [vmem:[#allocation190_spill] sm:$0xff] %v6364_v35  ;;  %4490 = vtanh.f32 %v5972_v21  ;;  %v8512_v52 = vld [vmem:[#allocation82_spill] sm:$0xff] }
 0x26f   : > { %2823 = vmax.xlane.f32.xlu0 %v6352_v17  ;;  %8507 = vst [vmem:[#allocation189_spill] sm:$0xff] %v6361_v53  ;;  %2511 = vmax.xlane.f32.xlu1 %v6112_v33  ;;  %v6366_v58 = vpop.eup %4478  ;;  %v6369_v19 = vpop.xlane.xlu0 %1430  ;;  %v1179_v60 = vmul.f32 0.6931472, %v4477_v54 }
 0x270   : > { %8509 = vst [vmem:[#allocation191_spill] sm:$0xff] %v6366_v58  ;;  %v6373_v55 = vpop.eup %4480  ;;  %4492 = vlog2.f32 %v6369_v19 }
 0x271   : > { %4494 = vtanh.f32 %v5957_v26  ;;  %3512 = vst [vmem:[%s5880_s23 + $0xe8] sm:$0xff] %v6373_v55  ;;  %v6381_v21 = vpop.xlane.xlu1 %1432  ;;  %v6387_v53 = vadd.f32 %v1179_v60, %v8512_v52 }
 0x272   : > { %v4483_v6 = vpop.eup %4482 }
 0x273   : > { %2819 = vmax.xlane.f32.xlu0 %v6366_v58  ;;  %2507 = vmax.xlane.f32.xlu1 %v6127_v31  ;;  %v1499_v33 = vmul.f32 0.6931472, %v4483_v6  ;;  %v1123_v5 = vpop.xlane.xlu0 %1122  ;;  %v6384_v51 = vpop.eup %4484  ;;  %8513 = vst [vmem:[#allocation82_spill] sm:$0xff] %v6387_v53  ;;  %v8523_v53 = vld [vmem:[#allocation88_spill] sm:$0xff] }
 0x274   : > { %4496 = vlog2.f32 %v1123_v5  ;;  %8511 = vst [vmem:[#allocation158_spill] sm:$0xff] %v6384_v51  ;;  %v8522_v5 = vld [vmem:[#allocation139_spill] sm:$0xff] }
 0x275   : > { %v6390_v26 = vadd.f32 %v1499_v33, %v8514_v49  ;;  %v6393_v18 = vpop.xlane.xlu1 %1124 }
 0x276   : > { %v4487_v54 = vpop.eup %4486  ;;  %8516 = vst [vmem:[#allocation192_spill] sm:$0xff] %v6393_v18 }
 0x277   : > { %2501 = vmax.xlane.f32.xlu0 %v8510_v56  ;;  %8515 = vst [vmem:[#allocation85_spill] sm:$0xff] %v6390_v26  ;;  %2833 = vmax.xlane.f32.xlu1 %v6384_v51  ;;  %v6395_v31 = vpop.eup %4488  ;;  %v6397_v6 = vpop.xlane.xlu0 %1442  ;;  %v1175_v49 = vmul.f32 0.6931472, %v4487_v54  ;;  %v8525_v54 = vld [vmem:[#allocation91_spill] sm:$0xff] }
 0x278   : > { %8517 = vst [vmem:[#allocation193_spill] sm:$0xff] %v6395_v31  ;;  %4498 = vlog2.f32 %v6397_v6  ;;  %v6403_v52 = vpop.eup %4490 }
 0x279   : > { %8518 = vst [vmem:[#allocation194_spill] sm:$0xff] %v6403_v52  ;;  %v6406_v33 = vpop.xlane.xlu1 %1444  ;;  %4500 = vtanh.f32 %v8521_v37  ;;  %v6414_v26 = vadd.f32 %v1175_v49, %v8523_v53  ;;  %v8529_v53 = vld [vmem:[#allocation140_spill] sm:$0xff] }
 0x27a   : > { %v4493_v60 = vpop.eup %4492  ;;  %8519 = vst [vmem:[#allocation195_spill] sm:$0xff] %v6406_v33 }
 0x27b   : > { %2831 = vmax.xlane.f32.xlu0 %v6395_v31  ;;  %2829 = vmax.xlane.f32.xlu1 %v6403_v52  ;;  %v6408_v56 = vpop.eup %4494  ;;  %v1495_v18 = vmul.f32 0.6931472, %v4493_v60  ;;  %v1119_v23 = vpop.xlane.xlu0 %1118  ;;  %8524 = vst [vmem:[#allocation143_spill] sm:$0xff] %v6414_v26 }
 0x27c   : > { %8520 = vst [vmem:[#allocation196_spill] sm:$0xff] %v6408_v56  ;;  %4502 = vlog2.f32 %v1119_v23 }
 0x27d   : > { %4504 = vtanh.f32 %v8522_v5  ;;  %v6417_v59 = vadd.f32 %v1495_v18, %v8525_v54  ;;  %v6420_v42 = vpop.xlane.xlu1 %1120  ;;  %v8531_v54 = vld [vmem:[#allocation94_spill] sm:$0xff] }
 0x27e   : > { %v4497_v35 = vpop.eup %4496  ;;  %8527 = vst [vmem:[#allocation88_spill] sm:$0xff] %v6420_v42  ;;  %4506 = vtanh.f32 %v8528_v46 }
 0x27f   : > { %2827 = vmax.xlane.f32.xlu0 %v6408_v56  ;;  %8526 = vst [vmem:[#allocation139_spill] sm:$0xff] %v6417_v59  ;;  %2519 = vmax.xlane.f32.xlu1 %v6160_v11  ;;  %v6423_v37 = vpop.xlane.xlu0 %1438  ;;  %v1187_v18 = vmul.f32 0.6931472, %v4497_v35 }
 0x280   : > { %4508 = vlog2.f32 %v6423_v37 }
 0x281   : > { %4510 = vtanh.f32 %v8529_v53  ;;  %v6431_v11 = vpop.xlane.xlu1 %1440  ;;  %v6437_v23 = vadd.f32 %v1187_v18, %v8531_v54 }
 0x282   : > { %v4499_v5 = vpop.eup %4498 }
 0x283   : > { %2513 = vmax.xlane.f32.xlu0 %v6138_v16  ;;  %2515 = vmax.xlane.f32.xlu1 %v6166_v10  ;;  %v1507_v49 = vmul.f32 0.6931472, %v4499_v5  ;;  %v1131_v60 = vpop.xlane.xlu0 %1130  ;;  %v6434_v46 = vpop.eup %4500  ;;  %8532 = vst [vmem:[#allocation145_spill] sm:$0xff] %v6437_v23  ;;  %v8533_v16 = vld [vmem:[#allocation97_spill] sm:$0xff]  ;;  %v8542_v23 = vld [vmem:[#allocation100_spill] sm:$0xff] }
 0x284   : > { %4512 = vlog2.f32 %v1131_v60  ;;  %8530 = vst [vmem:[#allocation91_spill] sm:$0xff] %v6434_v46 }
 0x285   : > { %v6440_v26 = vadd.f32 %v1507_v49, %v8533_v16  ;;  %v8539_v16 = vld [vmem:[#allocation152_spill] sm:$0xff] }
 0x286   : > { %v4503_v53 = vpop.eup %4502  ;;  %v6443_v35 = vpop.xlane.xlu1 %1132 }
 0x287   : > { %2509 = vmax.xlane.f32.xlu0 %v6149_v3  ;;  %8534 = vst [vmem:[#allocation140_spill] sm:$0xff] %v6440_v26  ;;  %2841 = vmax.xlane.f32.xlu1 %v6434_v46  ;;  %8535 = vst [vmem:[#allocation94_spill] sm:$0xff] %v6443_v35  ;;  %v6445_v10 = vpop.eup %4504  ;;  %v6447_v5 = vpop.xlane.xlu0 %1450  ;;  %v1183_v49 = vmul.f32 0.6931472, %v4503_v53  ;;  %v8541_v3 = vld [vmem:[#allocation149_spill] sm:$0xff]  ;;  %v8544_v53 = vld [vmem:[#allocation103_spill] sm:$0xff] }
 0x288   : > { %8536 = vst [vmem:[#allocation97_spill] sm:$0xff] %v6445_v10  ;;  %4514 = vlog2.f32 %v6447_v5  ;;  %v6453_v18 = vpop.eup %4506 }
 0x289   : > { %8537 = vst [vmem:[#allocation197_spill] sm:$0xff] %v6453_v18  ;;  %4516 = vtanh.f32 %v8539_v16  ;;  %v6464_v26 = vadd.f32 %v1183_v49, %v8542_v23  ;;  %v8550_v49 = vld [vmem:[#allocation106_spill] sm:$0xff]  ;;  %v8552_v16 = vld [vmem:[#allocation109_spill] sm:$0xff] }
 0x28a   : > { %v4509_v60 = vpop.eup %4508  ;;  %v6459_v42 = vpop.xlane.xlu1 %1452 }
 0x28b   : > { %2839 = vmax.xlane.f32.xlu0 %v6445_v10  ;;  %2837 = vmax.xlane.f32.xlu1 %v6453_v18  ;;  %v6456_v54 = vpop.eup %4510  ;;  %v1503_v59 = vmul.f32 0.6931472, %v4509_v60  ;;  %v1127_v35 = vpop.xlane.xlu0 %1126  ;;  %8540 = vst [vmem:[#allocation152_spill] sm:$0xff] %v6459_v42  ;;  %8543 = vst [vmem:[#allocation149_spill] sm:$0xff] %v6464_v26 }
 0x28c   : > { %8538 = vst [vmem:[#allocation198_spill] sm:$0xff] %v6456_v54  ;;  %4518 = vlog2.f32 %v1127_v35  ;;  %v8547_v35 = vld [vmem:[#allocation151_spill] sm:$0xff] }
 0x28d   : > { %4520 = vtanh.f32 %v8541_v3  ;;  %v6467_v48 = vadd.f32 %v1503_v59, %v8544_v53 }
 0x28e   : > { %v4513_v38 = vpop.eup %4512  ;;  %4522 = vtanh.f32 %v8546_v4  ;;  %v6478_v3 = vpop.xlane.xlu1 %1128 }
 0x28f   : > { %2835 = vmax.xlane.f32.xlu0 %v6456_v54  ;;  %8545 = vst [vmem:[#allocation100_spill] sm:$0xff] %v6467_v48  ;;  %2527 = vmax.xlane.f32.xlu1 %v6185_v30  ;;  %v1195_v23 = vmul.f32 0.6931472, %v4513_v38  ;;  %8548 = vst [vmem:[#allocation103_spill] sm:$0xff] %v6478_v3  ;;  %v8564_v3 = vld [vmem:[#allocation115_spill] sm:$0xff] }
 0x290   : > { %v6471_v60 = vpop.xlane.xlu0 %1446 }
 0x291   : > { %4524 = vlog2.f32 %v6471_v60  ;;  %v6485_v53 = vadd.f32 %v1195_v23, %v8550_v49 }
 0x292   : > { %4526 = vtanh.f32 %v8547_v35  ;;  %v4515_v59 = vpop.eup %4514  ;;  %v6493_v48 = vpop.xlane.xlu1 %1448 }
 0x293   : > { %2521 = vmax.xlane.f32.xlu0 %v6173_v41  ;;  %2523 = vmax.xlane.f32.xlu1 %v6195_v61  ;;  %v1515_v30 = vmul.f32 0.6931472, %v4515_v59  ;;  %v6482_v4 = vpop.eup %4516  ;;  %8551 = vst [vmem:[#allocation151_spill] sm:$0xff] %v6485_v53  ;;  %8555 = vst [vmem:[#allocation199_spill] sm:$0xff] %v6493_v48 }
 0x294   : > { %8549 = vst [vmem:[#allocation153_spill] sm:$0xff] %v6482_v4 }
 0x295   : > { %v6488_v41 = vadd.f32 %v1515_v30, %v8552_v16  ;;  %v8557_v16 = vld [vmem:[#allocation159_spill] sm:$0xff] }
 0x296   : > { %v4519_v26 = vpop.eup %4518 }
 0x297   : > { %2517 = vmax.xlane.f32.xlu0 %v6182_v22  ;;  %8553 = vst [vmem:[#allocation106_spill] sm:$0xff] %v6488_v41  ;;  %2849 = vmax.xlane.f32.xlu1 %v6482_v4  ;;  %v6491_v35 = vpop.eup %4520  ;;  %v1191_v23 = vmul.f32 0.6931472, %v4519_v26  ;;  %v8560_v22 = vld [vmem:[#allocation156_spill] sm:$0xff] }
 0x298   : > { %v1139_v38 = vpop.xlane.xlu0 %1138  ;;  %8554 = vst [vmem:[#allocation109_spill] sm:$0xff] %v6491_v35  ;;  %v6498_v61 = vpop.eup %4522  ;;  %v8562_v41 = vld [vmem:[#allocation112_spill] sm:$0xff] }
 0x299   : > { %4528 = vlog2.f32 %v1139_v38  ;;  %8556 = vst [vmem:[#allocation200_spill] sm:$0xff] %v6498_v61  ;;  %v6509_v53 = vpop.xlane.xlu1 %1140  ;;  %v6512_v26 = vadd.f32 %v1191_v23, %v8562_v41 }
 0x29a   : > { %4530 = vtanh.f32 %v8557_v16  ;;  %8561 = vst [vmem:[#allocation156_spill] sm:$0xff] %v6509_v53 }
 0x29b   : > { %2847 = vmax.xlane.f32.xlu0 %v6491_v35  ;;  %v4525_v59 = vpop.eup %4524  ;;  %2845 = vmax.xlane.f32.xlu1 %v6498_v61  ;;  %8563 = vst [vmem:[#allocation112_spill] sm:$0xff] %v6512_v26  ;;  %v8566_v61 = vld [vmem:[#allocation161_spill] sm:$0xff] }
 0x29c   : > { %v6502_v30 = vpop.xlane.xlu0 %1458  ;;  %v6504_v49 = vpop.eup %4526  ;;  %v1511_v38 = vmul.f32 0.6931472, %v4525_v59 }
 0x29d   : > { %8558 = vst [vmem:[#allocation159_spill] sm:$0xff] %v6502_v30  ;;  %8559 = vst [vmem:[#allocation201_spill] sm:$0xff] %v6504_v49  ;;  %4532 = vlog2.f32 %v6502_v30  ;;  %v6524_v41 = vpop.xlane.xlu1 %1460 }
 0x29e   : > { %4534 = vtanh.f32 %v8560_v22  ;;  %v6515_v16 = vadd.f32 %v1511_v38, %v8564_v3  ;;  %8568 = vst [vmem:[#allocation161_spill] sm:$0xff] %v6524_v41 }
 0x29f   : > { %2843 = vmax.xlane.f32.xlu0 %v6504_v49  ;;  %2535 = vmax.xlane.f32.xlu1 %v6230_v36  ;;  %4536 = vtanh.f32 %v8566_v61  ;;  %v8567_v49 = vld [vmem:[#allocation157_spill] sm:$0xff] }
 0x2a0   : > { %8565 = vst [vmem:[#allocation115_spill] sm:$0xff] %v6515_v16  ;;  %4538 = vtanh.f32 %v8567_v49 }
 0x2a2   : > { %v1135_v22 = vpop.xlane.xlu0 %1134 }
 0x2a3   : > { %2529 = vmax.xlane.f32.xlu0 %v6203_v45  ;;  %v4529_v30 = vpop.eup %4528  ;;  %2531 = vmax.xlane.f32.xlu1 %v6232_v57  ;;  %4540 = vlog2.f32 %v1135_v22  ;;  %v8571_v57 = vld [vmem:[#allocation117_spill] sm:$0xff]  ;;  %v8573_v22 = vld [vmem:[#allocation120_spill] sm:$0xff] }
 0x2a4   : > { %v6526_v3 = vpop.eup %4530  ;;  %v1203_v23 = vmul.f32 0.6931472, %v4529_v30 }
 0x2a5   : > { %8569 = vst [vmem:[#allocation157_spill] sm:$0xff] %v6526_v3 }
 0x2a6   : > { %v6537_v49 = vadd.f32 %v1203_v23, %v8571_v57  ;;  %v8578_v23 = vld [vmem:[#allocation166_spill] sm:$0xff] }
 0x2a7   : > { %2525 = vmax.xlane.f32.xlu0 %v6219_v8  ;;  %v4533_v36 = vpop.eup %4532  ;;  %v6529_v61 = vpop.xlane.xlu0 %1454  ;;  %2857 = vmax.xlane.f32.xlu1 %v6526_v3 }
 0x2a8   : > { %v1523_v38 = vmul.f32 0.6931472, %v4533_v36  ;;  %4542 = vlog2.f32 %v6529_v61  ;;  %v6533_v45 = vpop.eup %4534  ;;  %8572 = vst [vmem:[#allocation117_spill] sm:$0xff] %v6537_v49  ;;  %v6545_v8 = vpop.xlane.xlu1 %1136 }
 0x2a9   : > { %8570 = vst [vmem:[#allocation202_spill] sm:$0xff] %v6533_v45  ;;  %v6542_v30 = vpop.eup %4536  ;;  %4544 = vrcp.f32 %v6241_v63  ;;  %8576 = vst [vmem:[#allocation204_spill] sm:$0xff] %v6545_v8 }
 0x2aa   : > { %v6540_v59 = vadd.f32 %v1523_v38, %v8573_v22  ;;  %8575 = vst [vmem:[#allocation203_spill] sm:$0xff] %v6542_v30  ;;  %v6550_v26 = vpop.eup %4538  ;;  %v8579_v38 = vld [vmem:[#allocation164_spill] sm:$0xff]  ;;  %v8581_v22 = vld [vmem:[#allocation167_spill] sm:$0xff] }
 0x2ab   : > { %2855 = vmax.xlane.f32.xlu0 %v6533_v45  ;;  %v1147_v36 = vpop.xlane.xlu0 %1146  ;;  %2853 = vmax.xlane.f32.xlu1 %v6542_v30  ;;  %8577 = vst [vmem:[#allocation205_spill] sm:$0xff] %v6550_v26 }
 0x2ac   : > { %8574 = vst [vmem:[#allocation120_spill] sm:$0xff] %v6540_v59  ;;  %4546 = vlog2.f32 %v1147_v36  ;;  %v6561_v53 = vpop.xlane.xlu1 %1456 }
 0x2ad   : > { %4548 = vtanh.f32 %v8578_v23  ;;  %v4541_v57 = vpop.eup %4540  ;;  %8582 = vst [vmem:[#allocation164_spill] sm:$0xff] %v6561_v53  ;;  %v8583_v23 = vld [vmem:[#allocation165_spill] sm:$0xff] }
 0x2ae   : > { %4550 = vrcp.f32 %v6227_v62  ;;  %v1199_v36 = vmul.f32 0.6931472, %v4541_v57 }
 0x2af   : > { %2851 = vmax.xlane.f32.xlu0 %v6550_v26  ;;  %4552 = vtanh.f32 %v8579_v38  ;;  %v6556_v63 = vpop.xlane.xlu0 %1466  ;;  %2543 = vmax.xlane.f32.xlu1 %v6298_v34  ;;  %v8584_v34 = vld [vmem:[#allocation123_spill] sm:$0xff] }
 0x2b0   : > { %8580 = vst [vmem:[#allocation166_spill] sm:$0xff] %v6556_v63  ;;  %4554 = vlog2.f32 %v6556_v63  ;;  %v6568_v63 = vadd.f32 %v1199_v36, %v8584_v34 }
 0x2b1   : > { %4556 = vtanh.f32 %v8581_v22  ;;  %v8586_v22 = vld [vmem:[#allocation126_spill] sm:$0xff] }
 0x2b2   : > { %v4543_v8 = vpop.eup %4542  ;;  %4558 = vtanh.f32 %v8583_v23  ;;  %8585 = vst [vmem:[#allocation167_spill] sm:$0xff] %v6568_v63  ;;  %v8595_v63 = vld [vmem:[#allocation7_spill] sm:$0xff] }
 0x2b3   : > { %2537 = vmax.xlane.f32.xlu0 %v6243_v47  ;;  %v1519_v49 = vmul.f32 0.6931472, %v4543_v8  ;;  %v1143_v59 = vpop.xlane.xlu0 %1142  ;;  %2539 = vmax.xlane.f32.xlu1 %v6300_v24  ;;  %v4545_v38 = vpop.eup %4544 }
 0x2b4   : > { %4560 = vlog2.f32 %v1143_v59  ;;  %v6577_v8 = vpop.xlane.xlu1 %1148 }
 0x2b5   : > { %4562 = vrcp.f32 %v6289_v29  ;;  %v6571_v57 = vadd.f32 %v1519_v49, %v8586_v22  ;;  %8589 = vst [vmem:[#allocation126_spill] sm:$0xff] %v6577_v8 }
 0x2b6   : > { %v4547_v16 = vpop.eup %4546  ;;  %4564 = vrcp.f32 %v6207_v7  ;;  %v8592_v7 = vld [vmem:[#allocation78_spill] sm:$0xff] }
 0x2b7   : > { %8587 = vst [vmem:[#allocation165_spill] sm:$0xff] %v6571_v57  ;;  %2533 = vmax.xlane.f32.xlu0 %v6258_v32  ;;  %v6574_v47 = vpop.eup %4548  ;;  %v1211_v32 = vmul.f32 0.6931472, %v4547_v16  ;;  %v1606_v34 = vmul.f32 %v4545_v38, %v8592_v7  ;;  %v8596_v57 = vld [vmem:[#allocation8_spill] sm:$0xff] }
 0x2b8   : > { %8588 = vst [vmem:[#allocation123_spill] sm:$0xff] %v6574_v47  ;;  %v6579_v24 = vpop.xlane.xlu0 %1462  ;;  %v4551_v23 = vpop.eup %4550  ;;  %2865 = vmax.xlane.f32.xlu1 %v6574_v47  ;;  %v1638_v41 = vsub.f32 %v8596_v57, %v8595_v63  ;;  %v8599_v47 = vld [vmem:[#allocation129_spill] sm:$0xff]  ;;  %v8601_v7 = vld [vmem:[#allocation132_spill] sm:$0xff] }
 0x2b9   : > { %8590 = vst [vmem:[#allocation206_spill] sm:$0xff] %v6579_v24  ;;  %4566 = vlog2.f32 %v6579_v24  ;;  %v6585_v49 = vpop.eup %4552  ;;  %v6601_v16 = vpop.xlane.xlu1 %1144  ;;  %v6604_v38 = vadd.f32 %v1211_v32, %v8599_v47  ;;  %v8605_v47 = vld [vmem:[#allocation9_spill] sm:$0xff]  ;;  %v8606_v32 = vld [vmem:[#allocation10_spill] sm:$0xff] }
 0x2ba   : > { %8591 = vst [vmem:[#allocation207_spill] sm:$0xff] %v6585_v49  ;;  %4568 = vrcp.f32 %v6323_v43  ;;  %v4555_v36 = vpop.eup %4554  ;;  %8598 = vst [vmem:[#allocation8_spill] sm:$0xff] %v6601_v16  ;;  %v1641_v16 = vsub.f32 %v8606_v32, %v8605_v47  ;;  %v8609_v47 = vld [vmem:[#allocation17_spill] sm:$0xff]  ;;  %v8610_v32 = vld [vmem:[#allocation18_spill] sm:$0xff] }
 0x2bb   : > { %2863 = vmax.xlane.f32.xlu0 %v6585_v49  ;;  %v6590_v22 = vpop.eup %4556  ;;  %4570 = vrcp.f32 %v6261_v20  ;;  %v1531_v59 = vmul.f32 0.6931472, %v4555_v36  ;;  %8600 = vst [vmem:[#allocation129_spill] sm:$0xff] %v6604_v38  ;;  %v1645_v38 = vsub.f32 %v8610_v32, %v8609_v47  ;;  %v8619_v47 = vld [vmem:[#allocation6_spill] sm:$0xff] }
 0x2bc   : > { %8593 = vst [vmem:[#allocation78_spill] sm:$0xff] %v6590_v22  ;;  %v6593_v8 = vpop.xlane.xlu0 %1468  ;;  %2861 = vmax.xlane.f32.xlu1 %v6590_v22  ;;  %v6598_v53 = vpop.eup %4558  ;;  %4572 = vrcp.f32 %v6350_v14  ;;  %v8603_v22 = vld [vmem:[#allocation76_spill] sm:$0xff] }
 0x2bd   : > { %8594 = vst [vmem:[#allocation208_spill] sm:$0xff] %v6593_v8  ;;  %8597 = vst [vmem:[#allocation7_spill] sm:$0xff] %v6598_v53  ;;  %v6607_v24 = vadd.f32 %v1531_v59, %v8601_v7  ;;  %v1670_v8 = vmul.f32 %v1638_v41, %v1606_v34  ;;  %v1609_v49 = vmul.f32 %v4551_v23, %v8603_v22  ;;  %4574 = vrcp.f32 %v6282_v27  ;;  %v8608_v27 = vld [vmem:[#allocation87_spill] sm:$0xff] }
 0x2be   : > { %v4561_v36 = vpop.eup %4560  ;;  %4576 = vrcp.f32 %v6381_v21 }
 0x2bf   : > { %8602 = vst [vmem:[#allocation132_spill] sm:$0xff] %v6607_v24  ;;  %2859 = vmax.xlane.f32.xlu0 %v6598_v53  ;;  %v4563_v30 = vpop.eup %4562  ;;  %v1207_v7 = vmul.f32 0.6931472, %v4561_v36  ;;  %v6619_v53 = vpop.xlane.xlu1 %1156  ;;  %v1673_v23 = vmul.f32 %v1641_v16, %v1609_v49  ;;  %4578 = vrcp.f32 %v6315_v15  ;;  %v8611_v24 = vld [vmem:[#allocation74_spill] sm:$0xff] }
 0x2c0   : > { %v6612_v63 = vpop.xlane.xlu0 %1464  ;;  %1702 = vadd.xlane.f32.xlu1 %v1670_v8  ;;  %v4565_v59 = vpop.eup %4564  ;;  %8607 = vst [vmem:[#allocation9_spill] sm:$0xff] %v6619_v53  ;;  %v1613_v34 = vmul.f32 %v4563_v30, %v8608_v27  ;;  %v8615_v30 = vld [vmem:[#allocation137_spill] sm:$0xff]  ;;  %v8626_v53 = vld [vmem:[#allocation11_spill] sm:$0xff] }
 0x2c1   : > { %8604 = vst [vmem:[#allocation76_spill] sm:$0xff] %v6612_v63  ;;  %v1608_v36 = vmul.f32 %v4565_v59, %v8611_v24 }
 0x2c2   : > { %v1677_v15 = vmul.f32 %v1645_v38, %v1613_v34  ;;  %v8622_v38 = vld [vmem:[#allocation19_spill] sm:$0xff] }
 0x2c3   : > { %v4567_v41 = vpop.eup %4566  ;;  %2545 = vmax.xlane.f32.xlu0 %v6325_v2  ;;  %v8613_v2 = vld [vmem:[#allocation135_spill] sm:$0xff] }
 0x2c4   : > { %v4569_v22 = vpop.eup %4568  ;;  %v1527_v57 = vmul.f32 0.6931472, %v4567_v41  ;;  %v1155_v8 = vpop.xlane.xlu0 %1154  ;;  %1708 = vadd.xlane.f32.xlu1 %v1673_v23  ;;  %v6631_v16 = vadd.f32 %v1207_v7, %v8613_v2  ;;  %v8617_v41 = vld [vmem:[#allocation93_spill] sm:$0xff]  ;;  %v8627_v7 = vld [vmem:[#allocation12_spill] sm:$0xff] }
 0x2c5   : > { %4580 = vlog2.f32 %v1155_v8  ;;  %v4571_v63 = vpop.eup %4570  ;;  %v6628_v49 = vpop.xlane.xlu1 %1152  ;;  %v1611_v23 = vmul.f32 %v4569_v22, %v8617_v41  ;;  %v8618_v8 = vld [vmem:[#allocation5_spill] sm:$0xff] }
 0x2c6   : > { %4582 = vrcp.f32 %v6406_v33  ;;  %8612 = vst [vmem:[#allocation10_spill] sm:$0xff] %v6628_v49  ;;  %8614 = vst [vmem:[#allocation87_spill] sm:$0xff] %v6631_v16  ;;  %v6634_v27 = vadd.f32 %v1527_v57, %v8615_v30  ;;  %v1640_v32 = vsub.f32 %v8619_v47, %v8618_v8  ;;  %v4573_v24 = vpop.eup %4572  ;;  %v8621_v57 = vld [vmem:[#allocation20_spill] sm:$0xff]  ;;  %v8623_v2 = vld [vmem:[#allocation81_spill] sm:$0xff] }
 0x2c7   : > { %2541 = vmax.xlane.f32.xlu0 %v6373_v55  ;;  %4584 = vrcp.f32 %v6341_v9  ;;  %v1643_v34 = vsub.f32 %v8622_v38, %v8621_v57  ;;  %v1607_v22 = vmul.f32 %v4571_v63, %v8623_v2  ;;  %v4575_v30 = vpop.eup %4574  ;;  %v8625_v8 = vld [vmem:[#allocation99_spill] sm:$0xff]  ;;  %v8629_v63 = vld [vmem:[#allocation26_spill] sm:$0xff]  ;;  %v8630_v38 = vld [vmem:[#allocation84_spill] sm:$0xff] }
 0x2c8   : > { %8616 = vst [vmem:[#allocation17_spill] sm:$0xff] %v6634_v27  ;;  %v6641_v59 = vpop.xlane.xlu0 %1474  ;;  %1716 = vadd.xlane.f32.xlu1 %v1677_v15  ;;  %v1672_v55 = vmul.f32 %v1640_v32, %v1608_v36  ;;  %v1617_v47 = vmul.f32 %v4573_v24, %v8625_v8  ;;  %v1639_v15 = vsub.f32 %v8627_v7, %v8626_v53  ;;  %v4577_v49 = vpop.eup %4576  ;;  %v8628_v36 = vld [vmem:[#allocation25_spill] sm:$0xff] }
 0x2c9   : > { %8620 = vst [vmem:[#allocation18_spill] sm:$0xff] %v6641_v59  ;;  %4586 = vlog2.f32 %v6641_v59  ;;  %v6650_v41 = vpop.xlane.xlu1 %2487  ;;  %v1675_v9 = vmul.f32 %v1643_v34, %v1611_v23  ;;  %v1649_v32 = vsub.f32 %v8629_v63, %v8628_v36  ;;  %v1612_v2 = vmul.f32 %v4575_v30, %v8630_v38  ;;  %v4579_v27 = vpop.eup %4578  ;;  %v8632_v53 = vld [vmem:[#allocation105_spill] sm:$0xff]  ;;  %v8637_v30 = vld [vmem:[#allocation27_spill] sm:$0xff]  ;;  %v8638_v63 = vld [vmem:[#allocation90_spill] sm:$0xff] }
 0x2ca   : > { %4588 = vrcp.f32 %v6431_v11  ;;  %8624 = vst [vmem:[#allocation74_spill] sm:$0xff] %v6650_v41  ;;  %v1671_v57 = vmul.f32 %v1639_v15, %v1607_v22  ;;  %v1615_v7 = vmul.f32 %v4577_v49, %v8632_v53  ;;  %v8636_v22 = vld [vmem:[#allocation28_spill] sm:$0xff] }
 0x2cb   : > { %1706 = vadd.xlane.f32.xlu0 %v1672_v55  ;;  %4590 = vrcp.f32 %v6369_v19  ;;  %v1681_v34 = vmul.f32 %v1649_v32, %v1617_v47  ;;  %v8633_v19 = vld [vmem:[#allocation13_spill] sm:$0xff]  ;;  %v8634_v55 = vld [vmem:[#allocation14_spill] sm:$0xff]  ;;  %v1647_v15 = vsub.f32 %v8637_v30, %v8636_v22  ;;  %v1610_v47 = vmul.f32 %v4579_v27, %v8638_v63  ;;  %v8646_v63 = vld [vmem:[#allocation96_spill] sm:$0xff] }
 0x2cc   : > { %v1151_v16 = vpop.xlane.xlu0 %1150  ;;  %1712 = vadd.xlane.f32.xlu1 %v1675_v9  ;;  %v1644_v9 = vsub.f32 %v8634_v55, %v8633_v19  ;;  %v8642_v55 = vld [vmem:[#allocation16_spill] sm:$0xff]  ;;  %v8644_v27 = vld [vmem:[#allocation33_spill] sm:$0xff]  ;;  %v8645_v22 = vld [vmem:[#allocation34_spill] sm:$0xff] }
 0x2cd   : > { %4592 = vlog2.f32 %v1151_v16  ;;  %v6660_v23 = vpop.xlane.xlu1 %2483  ;;  %v1679_v53 = vmul.f32 %v1647_v15, %v1615_v7 }
 0x2ce   : > { %4594 = vrcp.f32 %v6459_v42  ;;  %8631 = vst [vmem:[#allocation135_spill] sm:$0xff] %v6660_v23  ;;  %v1676_v36 = vmul.f32 %v1644_v9, %v1612_v2 }
 0x2cf   : > { %v4581_v24 = vpop.eup %4580  ;;  %1704 = vadd.xlane.f32.xlu0 %v1671_v57  ;;  %4596 = vrcp.f32 %v6397_v6  ;;  %v8640_v6 = vld [vmem:[#allocation111_spill] sm:$0xff] }
 0x2d0   : > { %v4583_v16 = vpop.eup %4582  ;;  %v6666_v8 = vpop.xlane.xlu0 %1470  ;;  %1724 = vadd.xlane.f32.xlu1 %v1681_v34  ;;  %v1219_v49 = vmul.f32 0.6931472, %v4581_v24  ;;  %v8641_v34 = vld [vmem:[#allocation15_spill] sm:$0xff]  ;;  %v1653_v24 = vsub.f32 %v8645_v22, %v8644_v27  ;;  %v8653_v27 = vld [vmem:[#allocation21_spill] sm:$0xff] }
 0x2d1   : > { %8635 = vst [vmem:[#allocation137_spill] sm:$0xff] %v6666_v8  ;;  %4598 = vlog2.f32 %v6666_v8  ;;  %v4585_v32 = vpop.eup %4584  ;;  %v6673_v57 = vpop.xlane.xlu1 %2809  ;;  %v1621_v19 = vmul.f32 %v4583_v16, %v8640_v6  ;;  %v1642_v59 = vsub.f32 %v8642_v55, %v8641_v34  ;;  %v8648_v16 = vld [vmem:[#allocation142_spill] sm:$0xff]  ;;  %v8650_v6 = vld [vmem:[#allocation147_spill] sm:$0xff] }
 0x2d2   : > { %4600 = vrcp.f32 %v6493_v48  ;;  %8639 = vst [vmem:[#allocation93_spill] sm:$0xff] %v6673_v57  ;;  %v1616_v42 = vmul.f32 %v4585_v32, %v8646_v63  ;;  %v8656_v63 = vld [vmem:[#allocation36_spill] sm:$0xff] }
 0x2d3   : > { %v4587_v38 = vpop.eup %4586  ;;  %1714 = vadd.xlane.f32.xlu0 %v1676_v36  ;;  %4602 = vrcp.f32 %v6423_v37  ;;  %v1674_v30 = vmul.f32 %v1642_v59, %v1610_v47  ;;  %v6687_v36 = vadd.f32 %v1219_v49, %v8648_v16  ;;  %v8654_v59 = vld [vmem:[#allocation22_spill] sm:$0xff]  ;;  %v8661_v48 = vld [vmem:[#allocation24_spill] sm:$0xff] }
 0x2d4   : > { %v4589_v8 = vpop.eup %4588  ;;  %v1539_v2 = vmul.f32 0.6931472, %v4587_v38  ;;  %v6679_v9 = vpop.xlane.xlu0 %1476  ;;  %1720 = vadd.xlane.f32.xlu1 %v1679_v53  ;;  %4604 = vrcp.f32 %v6447_v5  ;;  %v1685_v38 = vmul.f32 %v1653_v24, %v1621_v19  ;;  %v8652_v53 = vld [vmem:[#allocation116_spill] sm:$0xff]  ;;  %v1648_v47 = vsub.f32 %v8654_v59, %v8653_v27  ;;  %v8659_v27 = vld [vmem:[#allocation122_spill] sm:$0xff] }
 0x2d5   : > { %8643 = vst [vmem:[#allocation5_spill] sm:$0xff] %v6679_v9  ;;  %v4591_v7 = vpop.eup %4590  ;;  %v6684_v15 = vpop.xlane.xlu1 %2805  ;;  %8649 = vst [vmem:[#allocation20_spill] sm:$0xff] %v6687_v36  ;;  %v1619_v55 = vmul.f32 %v4589_v8, %v8652_v53  ;;  %v8658_v9 = vld [vmem:[#allocation102_spill] sm:$0xff]  ;;  %4606 = vrcp.f32 %v6471_v60 }
 0x2d6   : > { %8647 = vst [vmem:[#allocation6_spill] sm:$0xff] %v6684_v15  ;;  %v6690_v34 = vadd.f32 %v1539_v2, %v8650_v6  ;;  %v8657_v2 = vld [vmem:[#allocation35_spill] sm:$0xff]  ;;  %v1680_v6 = vmul.f32 %v1648_v47, %v1616_v42  ;;  %v1614_v5 = vmul.f32 %v4591_v7, %v8658_v9  ;;  %v8663_v42 = vld [vmem:[#allocation41_spill] sm:$0xff]  ;;  %v8664_v9 = vld [vmem:[#allocation42_spill] sm:$0xff]  ;;  %4608 = vrcp.f32 %v6529_v61 }
 0x2d7   : > { %v4593_v37 = vpop.eup %4592  ;;  %1710 = vadd.xlane.f32.xlu0 %v1674_v30  ;;  %v1651_v16 = vsub.f32 %v8657_v2, %v8656_v63  ;;  %v1657_v7 = vsub.f32 %v8664_v9, %v8663_v42  ;;  %v8665_v47 = vld [vmem:[#allocation108_spill] sm:$0xff]  ;;  %v8673_v36 = vld [vmem:[#allocation30_spill] sm:$0xff] }
 0x2d8   : > { %8651 = vst [vmem:[#allocation19_spill] sm:$0xff] %v6690_v34  ;;  %v4595_v32 = vpop.eup %4594  ;;  %v6696_v22 = vpop.xlane.xlu0 %1472  ;;  %1732 = vadd.xlane.f32.xlu1 %v1685_v38  ;;  %v1215_v24 = vmul.f32 0.6931472, %v4593_v37  ;;  %v8677_v9 = vld [vmem:[#allocation114_spill] sm:$0xff] }
 0x2d9   : > { %8655 = vst [vmem:[#allocation81_spill] sm:$0xff] %v6696_v22  ;;  %v4597_v19 = vpop.eup %4596  ;;  %v6703_v30 = vpop.xlane.xlu1 %2495  ;;  %v1683_v53 = vmul.f32 %v1651_v16, %v1619_v55  ;;  %v1625_v59 = vmul.f32 %v4595_v32, %v8659_v27  ;;  %v8660_v22 = vld [vmem:[#allocation23_spill] sm:$0xff] }
 0x2da   : > { %v1646_v33 = vsub.f32 %v8661_v48, %v8660_v22  ;;  %v1620_v2 = vmul.f32 %v4597_v19, %v8665_v47  ;;  %v8667_v32 = vld [vmem:[#allocation155_spill] sm:$0xff]  ;;  %v8669_v48 = vld [vmem:[#allocation162_spill] sm:$0xff] }
 0x2db   : > { %v4599_v8 = vpop.eup %4598  ;;  %1722 = vadd.xlane.f32.xlu0 %v1680_v6  ;;  %v6717_v6 = vadd.f32 %v1215_v24, %v8667_v32  ;;  %v1689_v60 = vmul.f32 %v1657_v7, %v1625_v59  ;;  %v8675_v59 = vld [vmem:[#allocation44_spill] sm:$0xff]  ;;  %v8679_v47 = vld [vmem:[#allocation31_spill] sm:$0xff] }
 0x2dc   : > { %v4601_v49 = vpop.eup %4600  ;;  %v1535_v38 = vmul.f32 0.6931472, %v4599_v8  ;;  %v6709_v63 = vpop.xlane.xlu0 %2807  ;;  %1728 = vadd.xlane.f32.xlu1 %v1683_v53  ;;  %v1678_v37 = vmul.f32 %v1646_v33, %v1614_v5  ;;  %v8671_v8 = vld [vmem:[#allocation127_spill] sm:$0xff]  ;;  %v8672_v53 = vld [vmem:[#allocation29_spill] sm:$0xff]  ;;  %v8680_v32 = vld [vmem:[#allocation32_spill] sm:$0xff] }
 0x2dd   : > { %8662 = vst [vmem:[#allocation99_spill] sm:$0xff] %v6709_v63  ;;  %v4603_v55 = vpop.eup %4602  ;;  %v6714_v16 = vpop.xlane.xlu1 %2491  ;;  %8668 = vst [vmem:[#allocation12_spill] sm:$0xff] %v6717_v6  ;;  %v1623_v27 = vmul.f32 %v4601_v49, %v8671_v8  ;;  %v1652_v34 = vsub.f32 %v8673_v36, %v8672_v53  ;;  %v8682_v53 = vld [vmem:[#allocation119_spill] sm:$0xff] }
 0x2de   : > { %8666 = vst [vmem:[#allocation11_spill] sm:$0xff] %v6714_v16  ;;  %v6720_v22 = vadd.f32 %v1535_v38, %v8669_v48  ;;  %v4605_v19 = vpop.eup %4604  ;;  %v8676_v38 = vld [vmem:[#allocation43_spill] sm:$0xff]  ;;  %v1618_v7 = vmul.f32 %v4603_v55, %v8677_v9  ;;  %v1650_v48 = vsub.f32 %v8680_v32, %v8679_v47 }
 0x2df   : > { %1718 = vadd.xlane.f32.xlu0 %v1678_v37  ;;  %v1655_v42 = vsub.f32 %v8676_v38, %v8675_v59  ;;  %v1684_v49 = vmul.f32 %v1652_v34, %v1620_v2  ;;  %v1624_v5 = vmul.f32 %v4605_v19, %v8682_v53  ;;  %v5016_v34 = vld [vmem:[%s5880_s23 + $0x18] sm:$0xff]  ;;  %v8684_v59 = vld [vmem:[#allocation37_spill] sm:$0xff]  ;;  %v8685_v38 = vld [vmem:[#allocation38_spill] sm:$0xff] }
 0x2e0   : > { %8670 = vst [vmem:[#allocation25_spill] sm:$0xff] %v6720_v22  ;;  %v6726_v33 = vpop.xlane.xlu0 %2803  ;;  %1740 = vadd.xlane.f32.xlu1 %v1689_v60  ;;  %v2869_v60 = vsub.f32 %v6222_v1, %v6709_v63  ;;  %v1682_v55 = vmul.f32 %v1650_v48, %v1618_v7  ;;  %v5017_v9 = vld [vmem:[%s5880_s23 + $0x10] sm:$0xff]  ;;  %v5018_v7 = vld [vmem:[%s5880_s23 + $0x8] sm:$0xff]  ;;  %v8687_v53 = vld [vmem:[#allocation125_spill] sm:$0xff] }
 0x2e1   : > { %8674 = vst [vmem:[#allocation26_spill] sm:$0xff] %v6726_v33  ;;  %v2867_v24 = vsub.f32 %v6246_v12, %v6726_v33  ;;  %v6735_v36 = vpop.xlane.xlu1 %2817  ;;  %v1687_v37 = vmul.f32 %v1655_v42, %v1623_v27  ;;  %v4607_v27 = vpop.eup %4606  ;;  %v1656_v42 = vsub.f32 %v8685_v38, %v8684_v59  ;;  %v2549_v47 = vsub.f32 %v5017_v9, %v6650_v41  ;;  %v8689_v38 = vld [vmem:[#allocation39_spill] sm:$0xff]  ;;  %v8690_v9 = vld [vmem:[#allocation40_spill] sm:$0xff]  ;;  %v5019_v22 = vld [vmem:[%s5880_s23] sm:$0xff] }
 0x2e2   : > { %8678 = vst [vmem:[#allocation84_spill] sm:$0xff] %v6735_v36  ;;  %v2903_v19 = vmul.f32 1.442695, %v2869_v60  ;;  %v2874_v32 = vsub.f32 %v6255_v25, %v6735_v36  ;;  %v4609_v59 = vpop.eup %4608  ;;  %v1654_v60 = vsub.f32 %v8690_v9, %v8689_v38  ;;  %v8691_v36 = vld [vmem:[#allocation141_spill] sm:$0xff] }
 0x2e3   : > { %v2899_v61 = vmul.f32 1.442695, %v2867_v24  ;;  %1730 = vadd.xlane.f32.xlu0 %v1684_v49  ;;  %v2583_v6 = vmul.f32 1.442695, %v2549_v47 }
 0x2e4   : > { %v6741_v8 = vpop.xlane.xlu0 %2489  ;;  %1736 = vadd.xlane.f32.xlu1 %v1687_v37  ;;  %v1688_v37 = vmul.f32 %v1656_v42, %v1624_v5  ;;  %v2547_v5 = vsub.f32 %v5019_v22, %v6660_v23  ;;  %v2870_v22 = vsub.f32 %v6191_v13, %v6673_v57 }
 0x2e5   : > { %8681 = vst [vmem:[#allocation105_spill] sm:$0xff] %v6741_v8  ;;  %4610 = vpow2.f32 %v2899_v61  ;;  %v2550_v2 = vsub.f32 %v5016_v34, %v6741_v8  ;;  %v6746_v24 = vpop.xlane.xlu1 %2813  ;;  %v1622_v34 = vmul.f32 %v4607_v27, %v8687_v53  ;;  %v1626_v27 = vmul.f32 %v4609_v59, %v8691_v36 }
 0x2e6   : > { %8683 = vst [vmem:[#allocation13_spill] sm:$0xff] %v6746_v24  ;;  %v2579_v47 = vmul.f32 1.442695, %v2547_v5  ;;  %v2905_v59 = vmul.f32 1.442695, %v2870_v22  ;;  %v2872_v9 = vsub.f32 %v6275_v39, %v6746_v24 }
 0x2e7   : > { %v2585_v49 = vmul.f32 1.442695, %v2550_v2  ;;  %1726 = vadd.xlane.f32.xlu0 %v1682_v55 }
 0x2e8   : > { %v6752_v61 = vpop.xlane.xlu0 %2485  ;;  %v2909_v22 = vmul.f32 1.442695, %v2872_v9  ;;  %v5023_v9 = vld [vmem:[%s5880_s23 + $0x50] sm:$0xff] }
 0x2e9   : > { %8686 = vst [vmem:[#allocation14_spill] sm:$0xff] %v6752_v61  ;;  %4612 = vpow2.f32 %v2585_v49  ;;  %v2548_v48 = vsub.f32 %v5018_v7, %v6752_v61  ;;  %v6759_v2 = vpop.xlane.xlu1 %2503  ;;  %v2913_v49 = vmul.f32 1.442695, %v2874_v32  ;;  %v1686_v7 = vmul.f32 %v1654_v60, %v1622_v34  ;;  %v5020_v60 = vld [vmem:[%s5880_s23 + $0x38] sm:$0xff] }
 0x2ea   : > { %8688 = vst [vmem:[#allocation28_spill] sm:$0xff] %v6759_v2  ;;  %4614 = vpow2.f32 %v2903_v19 }
 0x2eb   : > { %v2581_v55 = vmul.f32 1.442695, %v2548_v48  ;;  %1738 = vadd.xlane.f32.xlu0 %v1688_v37  ;;  %v8693_v37 = vld [vmem:[#allocation47_spill] sm:$0xff]  ;;  %v8694_v48 = vld [vmem:[#allocation48_spill] sm:$0xff] }
 0x2ec   : > { %v6765_v42 = vpop.xlane.xlu0 %2815  ;;  %v1658_v38 = vsub.f32 %v8694_v48, %v8693_v37 }
 0x2ed   : > { %4616 = vpow2.f32 %v2581_v55  ;;  %v6768_v53 = vpop.xlane.xlu1 %2499 }
 0x2ee   : > { %8692 = vst [vmem:[#allocation27_spill] sm:$0xff] %v6768_v53  ;;  %4618 = vpow2.f32 %v2583_v6  ;;  %v1690_v36 = vmul.f32 %v1658_v38, %v1626_v27  ;;  %v2868_v6 = vsub.f32 %v6211_v28, %v6684_v15  ;;  %v2873_v38 = vsub.f32 %v6286_v44, %v6765_v42 }
 0x2ef   : > { %v6770_v61 = vpop.eup %4610  ;;  %1734 = vadd.xlane.f32.xlu0 %v1686_v7  ;;  %4620 = vpow2.f32 %v2913_v49 }
 0x2f0   : > { %v6776_v19 = vpop.xlane.xlu0 %2811  ;;  %2963 = vadd.xlane.f32.xlu1 %v6770_v61  ;;  %4622 = vpow2.f32 %v2579_v47  ;;  %v2901_v48 = vmul.f32 1.442695, %v2868_v6  ;;  %v2911_v24 = vmul.f32 1.442695, %v2873_v38 }
 0x2f1   : > { %8695 = vst [vmem:[#allocation90_spill] sm:$0xff] %v6776_v19  ;;  %v6779_v32 = vpop.xlane.xlu1 %2825  ;;  %4624 = vpow2.f32 %v2905_v59  ;;  %v5022_v59 = vld [vmem:[%s5880_s23 + $0x30] sm:$0xff] }
 0x2f2   : > { %8696 = vst [vmem:[#allocation111_spill] sm:$0xff] %v6779_v32  ;;  %v2553_v6 = vsub.f32 %v5022_v59, %v6703_v30 }
 0x2f3   : > { %v4613_v34 = vpop.eup %4612  ;;  %1742 = vadd.xlane.f32.xlu0 %v1690_v36  ;;  %v5021_v36 = vld [vmem:[%s5880_s23 + $0x28] sm:$0xff] }
 0x2f4   : > { %v6783_v55 = vpop.xlane.xlu0 %2497  ;;  %2649 = vadd.xlane.f32.xlu1 %v4613_v34  ;;  %v6789_v49 = vpop.eup %4614 }
 0x2f5   : > { %8697 = vst [vmem:[#allocation15_spill] sm:$0xff] %v6783_v55  ;;  %v2554_v5 = vsub.f32 %v5020_v60, %v6783_v55  ;;  %v6791_v7 = vpop.xlane.xlu1 %2505 }
 0x2f6   : > { %8698 = vst [vmem:[#allocation16_spill] sm:$0xff] %v6791_v7 }
 0x2f7   : > { %v4617_v27 = vpop.eup %4616  ;;  %v2593_v37 = vmul.f32 1.442695, %v2554_v5  ;;  %2967 = vadd.xlane.f32.xlu0 %v6789_v49 }
 0x2f8   : > { %v6796_v47 = vpop.xlane.xlu0 %2493  ;;  %2645 = vadd.xlane.f32.xlu1 %v4617_v27  ;;  %v4619_v60 = vpop.eup %4618  ;;  %v2557_v27 = vsub.f32 %v5023_v9, %v6759_v2 }
 0x2f9   : > { %8699 = vst [vmem:[#allocation33_spill] sm:$0xff] %v6796_v47  ;;  %4626 = vpow2.f32 %v2593_v37  ;;  %v2552_v34 = vsub.f32 %v5021_v36, %v6796_v47  ;;  %v6800_v55 = vpop.xlane.xlu1 %2821  ;;  %v6802_v5 = vpop.eup %4620 }
 0x2fa   : > { %8700 = vst [vmem:[#allocation34_spill] sm:$0xff] %v6800_v55  ;;  %4628 = vpow2.f32 %v2901_v48  ;;  %v4623_v36 = vpop.eup %4622  ;;  %v2871_v48 = vsub.f32 %v6312_v40, %v6776_v19  ;;  %v2599_v59 = vmul.f32 1.442695, %v2557_v27 }
 0x2fb   : > { %2647 = vadd.xlane.f32.xlu0 %v4619_v60  ;;  %4630 = vpow2.f32 %v2909_v22  ;;  %v2589_v37 = vmul.f32 1.442695, %v2552_v34  ;;  %v2591_v60 = vmul.f32 1.442695, %v2553_v6  ;;  %v2878_v22 = vsub.f32 %v6319_v50, %v6779_v32  ;;  %v6819_v63 = vpop.eup %4624  ;;  %v5024_v6 = vld [vmem:[%s5880_s23 + $0x20] sm:$0xff]  ;;  %v8794_v50 = vld [vmem:[#allocation76_spill] sm:$0xff] }
 0x2fc   : > { %v6806_v15 = vpop.xlane.xlu0 %2823  ;;  %2977 = vadd.xlane.f32.xlu1 %v6802_v5  ;;  %4632 = vpow2.f32 %v2911_v24  ;;  %v2551_v24 = vsub.f32 %v5024_v6, %v6714_v16 }
 0x2fd   : > { %8701 = vst [vmem:[#allocation96_spill] sm:$0xff] %v6806_v15  ;;  %v6811_v47 = vpop.xlane.xlu1 %2511  ;;  %4634 = vpow2.f32 %v2589_v37  ;;  %v2921_v27 = vmul.f32 1.442695, %v2878_v22  ;;  %v2876_v37 = vsub.f32 %v6347_v0, %v6800_v55  ;;  %v5025_v22 = vld [vmem:[%s5880_s23 + $0x48] sm:$0xff] }
 0x2fe   : > { %8702 = vst [vmem:[#allocation142_spill] sm:$0xff] %v6811_v47  ;;  %4636 = vpow2.f32 %v2591_v60  ;;  %v2587_v60 = vmul.f32 1.442695, %v2551_v24 }
 0x2ff   : > { %2643 = vadd.xlane.f32.xlu0 %v4623_v36  ;;  %v2907_v36 = vmul.f32 1.442695, %v2871_v48  ;;  %4638 = vpow2.f32 %v2599_v59  ;;  %v2877_v48 = vsub.f32 %v6352_v17, %v6806_v15  ;;  %v2917_v59 = vmul.f32 1.442695, %v2876_v37 }
 0x300   : > { %v6815_v38 = vpop.xlane.xlu0 %2819 }
 0x301   : > { %8703 = vst [vmem:[#allocation147_spill] sm:$0xff] %v6815_v38  ;;  %v6821_v34 = vpop.xlane.xlu1 %2507  ;;  %4640 = vpow2.f32 %v2907_v36  ;;  %v2919_v36 = vmul.f32 1.442695, %v2877_v48  ;;  %v2875_v15 = vsub.f32 %v6366_v58, %v6815_v38 }
 0x302   : > { %8704 = vst [vmem:[#allocation116_spill] sm:$0xff] %v6821_v34  ;;  %4642 = vpow2.f32 %v2921_v27  ;;  %v5026_v27 = vld [vmem:[%s5880_s23 + $0x70] sm:$0xff] }
 0x303   : > { %v4627_v9 = vpop.eup %4626  ;;  %2969 = vadd.xlane.f32.xlu0 %v6819_v63  ;;  %4644 = vpow2.f32 %v2587_v60  ;;  %v2561_v37 = vsub.f32 %v5026_v27, %v6811_v47  ;;  %v5027_v60 = vld [vmem:[%s5880_s23 + $0x40] sm:$0xff]  ;;  %v2915_v38 = vmul.f32 1.442695, %v2875_v15 }
 0x304   : > { %v6826_v2 = vpop.xlane.xlu0 %2501  ;;  %2657 = vadd.xlane.f32.xlu1 %v4627_v9  ;;  %v6830_v32 = vpop.eup %4628  ;;  %4646 = vpow2.f32 %v2917_v59  ;;  %v2555_v48 = vsub.f32 %v5027_v60, %v6768_v53  ;;  %v5028_v59 = vld [vmem:[%s5880_s23 + $0x60] sm:$0xff]  ;;  %v5029_v60 = vld [vmem:[%s5880_s23 + $0x58] sm:$0xff] }
 0x305   : > { %8705 = vst [vmem:[#allocation21_spill] sm:$0xff] %v6826_v2  ;;  %v6832_v8 = vpop.xlane.xlu1 %2833  ;;  %v6834_v41 = vpop.eup %4630  ;;  %v2556_v9 = vsub.f32 %v5025_v22, %v6826_v2  ;;  %4648 = vpow2.f32 %v2919_v36  ;;  %v2559_v19 = vsub.f32 %v5028_v59, %v6821_v34  ;;  %v2558_v15 = vsub.f32 %v5029_v60, %v6791_v7 }
 0x306   : > { %8706 = vst [vmem:[#allocation22_spill] sm:$0xff] %v6832_v8  ;;  %v6844_v57 = vpop.eup %4632 }
 0x307   : > { %2965 = vadd.xlane.f32.xlu0 %v6830_v32  ;;  %v4635_v24 = vpop.eup %4634  ;;  %v2597_v22 = vmul.f32 1.442695, %v2556_v9 }
 0x308   : > { %v6839_v6 = vpop.xlane.xlu0 %2831  ;;  %2973 = vadd.xlane.f32.xlu1 %v6834_v41  ;;  %v4637_v55 = vpop.eup %4636 }
 0x309   : > { %8707 = vst [vmem:[#allocation36_spill] sm:$0xff] %v6839_v6  ;;  %v6846_v33 = vpop.xlane.xlu1 %2829  ;;  %v4639_v17 = vpop.eup %4638  ;;  %4650 = vpow2.f32 %v2597_v22 }
 0x30a   : > { %8708 = vst [vmem:[#allocation35_spill] sm:$0xff] %v6846_v33  ;;  %4652 = vpow2.f32 %v2915_v38  ;;  %v2881_v38 = vsub.f32 %v6395_v31, %v6839_v6 }
 0x30b   : > { %2975 = vadd.xlane.f32.xlu0 %v6844_v57  ;;  %v6863_v9 = vpop.eup %4640 }
 0x30c   : > { %v6851_v23 = vpop.xlane.xlu0 %2827  ;;  %2653 = vadd.xlane.f32.xlu1 %v4635_v24  ;;  %v2607_v24 = vmul.f32 1.442695, %v2561_v37  ;;  %v6867_v47 = vpop.eup %4642  ;;  %v2882_v37 = vsub.f32 %v6384_v51, %v6832_v8 }
 0x30d   : > { %8709 = vst [vmem:[#allocation102_spill] sm:$0xff] %v6851_v23  ;;  %v6855_v2 = vpop.xlane.xlu1 %2519  ;;  %v4645_v22 = vpop.eup %4644 }
 0x30e   : > { %8710 = vst [vmem:[#allocation122_spill] sm:$0xff] %v6855_v2  ;;  %4654 = vpow2.f32 %v2607_v24  ;;  %v6879_v34 = vpop.eup %4646  ;;  %v2880_v24 = vsub.f32 %v6403_v52, %v6846_v33 }
 0x30f   : > { %2655 = vadd.xlane.f32.xlu0 %v4637_v55  ;;  %v2595_v55 = vmul.f32 1.442695, %v2555_v48  ;;  %8715 = vst [vmem:[#allocation108_spill] sm:$0xff] %v6879_v34  ;;  %v2601_v48 = vmul.f32 1.442695, %v2558_v15  ;;  %v6888_v7 = vpop.eup %4648  ;;  %v2879_v15 = vsub.f32 %v6408_v56, %v6851_v23 }
 0x310   : > { %v6859_v58 = vpop.xlane.xlu0 %2513  ;;  %2663 = vadd.xlane.f32.xlu1 %v4639_v17  ;;  %v2603_v17 = vmul.f32 1.442695, %v2559_v19  ;;  %v2929_v19 = vmul.f32 1.442695, %v2882_v37  ;;  %8717 = vst [vmem:[#allocation162_spill] sm:$0xff] %v6888_v7  ;;  %v5030_v37 = vld [vmem:[%s5880_s23 + $0x90] sm:$0xff] }
 0x311   : > { %8711 = vst [vmem:[#allocation23_spill] sm:$0xff] %v6859_v58  ;;  %v6865_v27 = vpop.xlane.xlu1 %2515  ;;  %4656 = vpow2.f32 %v2595_v55  ;;  %v2927_v55 = vmul.f32 1.442695, %v2881_v38  ;;  %v2565_v33 = vsub.f32 %v5030_v37, %v6855_v2  ;;  %v5031_v38 = vld [vmem:[%s5880_s23 + $0x78] sm:$0xff] }
 0x312   : > { %8712 = vst [vmem:[#allocation24_spill] sm:$0xff] %v6865_v27  ;;  %4658 = vpow2.f32 %v2603_v17  ;;  %v2925_v17 = vmul.f32 1.442695, %v2880_v24  ;;  %v2562_v23 = vsub.f32 %v5031_v38, %v6859_v58  ;;  %v5032_v24 = vld [vmem:[%s5880_s23 + $0x80] sm:$0xff] }
 0x313   : > { %2971 = vadd.xlane.f32.xlu0 %v6863_v9  ;;  %4660 = vpow2.f32 %v2601_v48  ;;  %v2923_v48 = vmul.f32 1.442695, %v2879_v15  ;;  %v2563_v37 = vsub.f32 %v5032_v24, %v6865_v27 }
 0x314   : > { %v6872_v36 = vpop.xlane.xlu0 %2509  ;;  %2985 = vadd.xlane.f32.xlu1 %v6867_v47  ;;  %4662 = vpow2.f32 %v2929_v19  ;;  %v2615_v19 = vmul.f32 1.442695, %v2565_v33 }
 0x315   : > { %8713 = vst [vmem:[#allocation41_spill] sm:$0xff] %v6872_v36  ;;  %v6877_v59 = vpop.xlane.xlu1 %2841  ;;  %4664 = vpow2.f32 %v2927_v55  ;;  %v2609_v55 = vmul.f32 1.442695, %v2562_v23 }
 0x316   : > { %8714 = vst [vmem:[#allocation42_spill] sm:$0xff] %v6877_v59  ;;  %4666 = vpow2.f32 %v2925_v17  ;;  %v2886_v33 = vsub.f32 %v6434_v46, %v6877_v59  ;;  %v5037_v46 = vld [vmem:[%s5880_s23 + $0x88] sm:$0xff] }
 0x317   : > { %2651 = vadd.xlane.f32.xlu0 %v4645_v22  ;;  %v4651_v22 = vpop.eup %4650  ;;  %4668 = vpow2.f32 %v2923_v48 }
 0x318   : > { %v6883_v60 = vpop.xlane.xlu0 %2839  ;;  %2981 = vadd.xlane.f32.xlu1 %v6879_v34  ;;  %v6899_v52 = vpop.eup %4652  ;;  %4670 = vpow2.f32 %v2615_v19 }
 0x319   : > { %8716 = vst [vmem:[#allocation155_spill] sm:$0xff] %v6883_v60  ;;  %v6890_v8 = vpop.xlane.xlu1 %2837  ;;  %8720 = vst [vmem:[#allocation30_spill] sm:$0xff] %v6899_v52  ;;  %v4655_v51 = vpop.eup %4654  ;;  %4672 = vpow2.f32 %v2609_v55  ;;  %v2885_v23 = vsub.f32 %v6445_v10, %v6883_v60 }
 0x31a   : > { %8718 = vst [vmem:[#allocation127_spill] sm:$0xff] %v6890_v8  ;;  %v2884_v48 = vsub.f32 %v6453_v18, %v6890_v8 }
 0x31b   : > { %2983 = vadd.xlane.f32.xlu0 %v6888_v7  ;;  %v4657_v2 = vpop.eup %4656  ;;  %v2935_v55 = vmul.f32 1.442695, %v2885_v23  ;;  %v5035_v23 = vld [vmem:[%s5880_s23 + $0x98] sm:$0xff] }
 0x31c   : > { %v6895_v6 = vpop.xlane.xlu0 %2835  ;;  %2661 = vadd.xlane.f32.xlu1 %v4651_v22  ;;  %v4659_v53 = vpop.eup %4658 }
 0x31d   : > { %8719 = vst [vmem:[#allocation29_spill] sm:$0xff] %v6895_v6  ;;  %v6901_v31 = vpop.xlane.xlu1 %2527  ;;  %v4661_v17 = vpop.eup %4660 }
 0x31e   : > { %8721 = vst [vmem:[#allocation44_spill] sm:$0xff] %v6901_v31  ;;  %v6920_v24 = vpop.eup %4662 }
 0x31f   : > { %2979 = vadd.xlane.f32.xlu0 %v6899_v52  ;;  %v5033_v52 = vld [vmem:[%s5880_s23 + $0x68] sm:$0xff]  ;;  %8726 = vst [vmem:[#allocation119_spill] sm:$0xff] %v6920_v24  ;;  %v6929_v19 = vpop.eup %4664 }
 0x320   : > { %v6906_v22 = vpop.xlane.xlu0 %2521  ;;  %2671 = vadd.xlane.f32.xlu1 %v4655_v51  ;;  %v2560_v15 = vsub.f32 %v5033_v52, %v6872_v36  ;;  %v2611_v51 = vmul.f32 1.442695, %v2563_v37  ;;  %8728 = vst [vmem:[#allocation38_spill] sm:$0xff] %v6929_v19 }
 0x321   : > { %8722 = vst [vmem:[#allocation43_spill] sm:$0xff] %v6906_v22  ;;  %v6910_v56 = vpop.xlane.xlu1 %2523 }
 0x322   : > { %8723 = vst [vmem:[#allocation114_spill] sm:$0xff] %v6910_v56  ;;  %4674 = vpow2.f32 %v2611_v51  ;;  %v2933_v51 = vmul.f32 1.442695, %v2884_v48  ;;  %v5036_v48 = vld [vmem:[%s5880_s23 + $0xa0] sm:$0xff] }
 0x323   : > { %2659 = vadd.xlane.f32.xlu0 %v4657_v2  ;;  %v2605_v2 = vmul.f32 1.442695, %v2560_v15  ;;  %v2883_v15 = vsub.f32 %v6456_v54, %v6895_v6  ;;  %v2566_v6 = vsub.f32 %v5035_v23, %v6906_v22 }
 0x324   : > { %v6914_v7 = vpop.xlane.xlu0 %2517  ;;  %2667 = vadd.xlane.f32.xlu1 %v4659_v53  ;;  %v2937_v53 = vmul.f32 1.442695, %v2886_v33  ;;  %v5034_v33 = vld [vmem:[%s5880_s23 + $0xb0] sm:$0xff] }
 0x325   : > { %8724 = vst [vmem:[#allocation31_spill] sm:$0xff] %v6914_v7  ;;  %v6918_v38 = vpop.xlane.xlu1 %2849  ;;  %4676 = vpow2.f32 %v2605_v2  ;;  %v2569_v8 = vsub.f32 %v5034_v33, %v6901_v31  ;;  %v2931_v2 = vmul.f32 1.442695, %v2883_v15  ;;  %v2567_v33 = vsub.f32 %v5036_v48, %v6910_v56 }
 0x326   : > { %8725 = vst [vmem:[#allocation32_spill] sm:$0xff] %v6918_v38  ;;  %4678 = vpow2.f32 %v2937_v53  ;;  %v2564_v15 = vsub.f32 %v5037_v46, %v6914_v7 }
 0x327   : > { %2665 = vadd.xlane.f32.xlu0 %v4661_v17  ;;  %v6933_v17 = vpop.eup %4666  ;;  %4680 = vpow2.f32 %v2935_v55  ;;  %v2623_v53 = vmul.f32 1.442695, %v2569_v8  ;;  %v2617_v55 = vmul.f32 1.442695, %v2566_v6  ;;  %v2890_v8 = vsub.f32 %v6482_v4, %v6918_v38  ;;  %v8742_v38 = vld [vmem:[#allocation173_spill] sm:$0xff] }
 0x328   : > { %v6924_v52 = vpop.xlane.xlu0 %2847  ;;  %2993 = vadd.xlane.f32.xlu1 %v6920_v24  ;;  %8730 = vst [vmem:[#allocation39_spill] sm:$0xff] %v6933_v17  ;;  %v6943_v27 = vpop.eup %4668  ;;  %4682 = vpow2.f32 %v2933_v51 }
 0x329   : > { %8727 = vst [vmem:[#allocation37_spill] sm:$0xff] %v6924_v52  ;;  %v6931_v37 = vpop.xlane.xlu1 %2845  ;;  %8732 = vst [vmem:[#allocation141_spill] sm:$0xff] %v6943_v27  ;;  %v4671_v60 = vpop.eup %4670  ;;  %4684 = vpow2.f32 %v2931_v2  ;;  %v2889_v6 = vsub.f32 %v6491_v35, %v6924_v52  ;;  %v8740_v2 = vld [vmem:[#allocation200_spill] sm:$0xff]  ;;  %v8751_v35 = vld [vmem:[#allocation178_spill] sm:$0xff] }
 0x32a   : > { %8729 = vst [vmem:[#allocation125_spill] sm:$0xff] %v6931_v37  ;;  %v4673_v31 = vpop.eup %4672  ;;  %4686 = vpow2.f32 %v2623_v53  ;;  %v2888_v53 = vsub.f32 %v8740_v2, %v6931_v37  ;;  %v5038_v52 = vld [vmem:[%s5880_s23 + $0xb8] sm:$0xff] }
 0x32b   : > { %2991 = vadd.xlane.f32.xlu0 %v6929_v19  ;;  %4688 = vpow2.f32 %v2617_v55  ;;  %v8780_v19 = vld [vmem:[#allocation70_spill] sm:$0xff] }
 0x32c   : > { %v6938_v59 = vpop.xlane.xlu0 %2843  ;;  %2989 = vadd.xlane.f32.xlu1 %v6933_v17  ;;  %v4675_v36 = vpop.eup %4674 }
 0x32d   : > { %8731 = vst [vmem:[#allocation40_spill] sm:$0xff] %v6938_v59  ;;  %v6945_v18 = vpop.xlane.xlu1 %2535 }
 0x32e   : > { %8733 = vst [vmem:[#allocation47_spill] sm:$0xff] %v6945_v18 }
 0x32f   : > { %2987 = vadd.xlane.f32.xlu0 %v6943_v27  ;;  %v4677_v51 = vpop.eup %4676 }
 0x330   : > { %v6950_v54 = vpop.xlane.xlu0 %2529  ;;  %2679 = vadd.xlane.f32.xlu1 %v4671_v60  ;;  %v2619_v60 = vmul.f32 1.442695, %v2567_v33  ;;  %v6964_v48 = vpop.eup %4678 }
 0x331   : > { %8734 = vst [vmem:[#allocation48_spill] sm:$0xff] %v6950_v54  ;;  %v6954_v10 = vpop.xlane.xlu1 %2531  ;;  %8738 = vst [vmem:[#allocation212_spill] sm:$0xff] %v6964_v48  ;;  %v6973_v33 = vpop.eup %4680 }
 0x332   : > { %8735 = vst [vmem:[#allocation209_spill] sm:$0xff] %v6954_v10  ;;  %4690 = vpow2.f32 %v2619_v60  ;;  %8741 = vst [vmem:[#allocation214_spill] sm:$0xff] %v6973_v33  ;;  %v6978_v55 = vpop.eup %4682  ;;  %v8745_v60 = vld [vmem:[#allocation201_spill] sm:$0xff] }
 0x333   : > { %2673 = vadd.xlane.f32.xlu0 %v4673_v31  ;;  %v2613_v31 = vmul.f32 1.442695, %v2564_v15  ;;  %4692 = vlog2.f32 %v8742_v38  ;;  %8744 = vst [vmem:[#allocation215_spill] sm:$0xff] %v6978_v55  ;;  %v2943_v15 = vmul.f32 1.442695, %v2889_v6  ;;  %v6989_v2 = vpop.eup %4684 }
 0x334   : > { %v6958_v58 = vpop.xlane.xlu0 %2525  ;;  %2675 = vadd.xlane.f32.xlu1 %v4675_v36  ;;  %v2945_v36 = vmul.f32 1.442695, %v2890_v8  ;;  %4694 = vlog2.f32 %v6227_v62  ;;  %v2887_v8 = vsub.f32 %v8745_v60, %v6938_v59  ;;  %v2941_v38 = vmul.f32 1.442695, %v2888_v53  ;;  %8747 = vst [vmem:[#allocation217_spill] sm:$0xff] %v6989_v2  ;;  %v8748_v62 = vld [vmem:[#allocation175_spill] sm:$0xff]  ;;  %v4687_v6 = vpop.eup %4686 }
 0x335   : > { %8736 = vst [vmem:[#allocation210_spill] sm:$0xff] %v6958_v58  ;;  %v6962_v23 = vpop.xlane.xlu1 %2857  ;;  %4696 = vpow2.f32 %v2613_v31  ;;  %v4689_v60 = vpop.eup %4688 }
 0x336   : > { %8737 = vst [vmem:[#allocation211_spill] sm:$0xff] %v6962_v23  ;;  %4698 = vpow2.f32 %v2945_v36  ;;  %v2939_v59 = vmul.f32 1.442695, %v2887_v8  ;;  %v2570_v36 = vsub.f32 %v5038_v52, %v6950_v54  ;;  %v5040_v8 = vld [vmem:[%s5880_s23 + $0xa8] sm:$0xff] }
 0x337   : > { %2669 = vadd.xlane.f32.xlu0 %v4677_v51  ;;  %4700 = vlog2.f32 %v8748_v62 }
 0x338   : > { %v6968_v46 = vpop.xlane.xlu0 %2855  ;;  %3001 = vadd.xlane.f32.xlu1 %v6964_v48  ;;  %4702 = vlog2.f32 %v6261_v20  ;;  %v2625_v52 = vmul.f32 1.442695, %v2570_v36 }
 0x339   : > { %8739 = vst [vmem:[#allocation213_spill] sm:$0xff] %v6968_v46  ;;  %v6976_v56 = vpop.xlane.xlu1 %2853  ;;  %v2893_v37 = vsub.f32 %v6533_v45, %v6968_v46  ;;  %4704 = vpow2.f32 %v2943_v15  ;;  %v5039_v46 = vld [vmem:[%s5880_s23 + $0xd0] sm:$0xff] }
 0x33a   : > { %8743 = vst [vmem:[#allocation173_spill] sm:$0xff] %v6976_v56  ;;  %4706 = vpow2.f32 %v2941_v38  ;;  %v2573_v62 = vsub.f32 %v5039_v46, %v6945_v18  ;;  %v2568_v38 = vsub.f32 %v5040_v8, %v6958_v58 }
 0x33b   : > { %2999 = vadd.xlane.f32.xlu0 %v6973_v33  ;;  %v2951_v45 = vmul.f32 1.442695, %v2893_v37  ;;  %4708 = vlog2.f32 %v8751_v35 }
 0x33c   : > { %v6984_v51 = vpop.xlane.xlu0 %2851  ;;  %2997 = vadd.xlane.f32.xlu1 %v6978_v55  ;;  %v4691_v7 = vpop.eup %4690  ;;  %4710 = vlog2.f32 %v6289_v29  ;;  %v2631_v46 = vmul.f32 1.442695, %v2573_v62  ;;  %v8754_v29 = vld [vmem:[#allocation181_spill] sm:$0xff]  ;;  %v5041_v62 = vld [vmem:[%s5880_s23 + $0xd8] sm:$0xff]  ;;  %v8771_v55 = vld [vmem:[#allocation203_spill] sm:$0xff] }
 0x33d   : > { %8746 = vst [vmem:[#allocation216_spill] sm:$0xff] %v6984_v51  ;;  %v6992_v31 = vpop.xlane.xlu1 %2543  ;;  %v4693_v15 = vpop.eup %4692  ;;  %4712 = vpow2.f32 %v2939_v59  ;;  %v2891_v35 = vsub.f32 %v6550_v26, %v6984_v51  ;;  %v5042_v51 = vld [vmem:[%s5880_s23 + $0xc0] sm:$0xff]  ;;  %v2894_v26 = vsub.f32 %v6526_v3, %v6962_v23 }
 0x33e   : > { %8749 = vst [vmem:[#allocation175_spill] sm:$0xff] %v6992_v31  ;;  %v4695_v37 = vpop.eup %4694  ;;  %4714 = vpow2.f32 %v2951_v45  ;;  %v2571_v58 = vsub.f32 %v5042_v51, %v6954_v10 }
 0x33f   : > { %2995 = vadd.xlane.f32.xlu0 %v6989_v2  ;;  %v4697_v18 = vpop.eup %4696  ;;  %4716 = vlog2.f32 %v8754_v29  ;;  %v2947_v54 = vmul.f32 1.442695, %v2891_v35  ;;  %v5043_v35 = vld [vmem:[%s5880_s23 + $0xc8] sm:$0xff]  ;;  %v1165_v2 = vmul.f32 0.6931472, %v4693_v15 }
 0x340   : > { %v6998_v53 = vpop.xlane.xlu0 %2537  ;;  %2687 = vadd.xlane.f32.xlu1 %v4687_v6  ;;  %4718 = vlog2.f32 %v6323_v43  ;;  %v2953_v3 = vmul.f32 1.442695, %v2894_v26  ;;  %v8773_v26 = vld [vmem:[#allocation46_spill] sm:$0xff] }
 0x341   : > { %8750 = vst [vmem:[#allocation218_spill] sm:$0xff] %v6998_v53  ;;  %v7003_v20 = vpop.xlane.xlu1 %2539  ;;  %4720 = vpow2.f32 %v2625_v52  ;;  %v2574_v45 = vsub.f32 %v5041_v62, %v6998_v53  ;;  %v8762_v62 = vld [vmem:[#allocation190_spill] sm:$0xff] }
 0x342   : > { %8752 = vst [vmem:[#allocation178_spill] sm:$0xff] %v7003_v20  ;;  %4722 = vpow2.f32 %v2631_v46 }
 0x343   : > { %2681 = vadd.xlane.f32.xlu0 %v4689_v60  ;;  %v7015_v60 = vpop.eup %4698  ;;  %v2633_v46 = vmul.f32 1.442695, %v2574_v45 }
 0x344   : > { %v7008_v6 = vpop.xlane.xlu0 %2533  ;;  %2683 = vadd.xlane.f32.xlu1 %v4691_v7  ;;  %8756 = vst [vmem:[#allocation220_spill] sm:$0xff] %v7015_v60  ;;  %v4701_v36 = vpop.eup %4700  ;;  %v2621_v7 = vmul.f32 1.442695, %v2568_v38 }
 0x345   : > { %8753 = vst [vmem:[#allocation219_spill] sm:$0xff] %v7008_v6  ;;  %v7013_v59 = vpop.xlane.xlu1 %2865  ;;  %v4703_v29 = vpop.eup %4702 }
 0x346   : > { %8755 = vst [vmem:[#allocation181_spill] sm:$0xff] %v7013_v59  ;;  %v7026_v43 = vpop.eup %4704 }
 0x347   : > { %2677 = vadd.xlane.f32.xlu0 %v4697_v18  ;;  %8758 = vst [vmem:[#allocation222_spill] sm:$0xff] %v7026_v43  ;;  %v8759_v18 = vld [vmem:[#allocation185_spill] sm:$0xff]  ;;  %v7031_v38 = vpop.eup %4706 }
 0x348   : > { %v7021_v8 = vpop.xlane.xlu0 %2863  ;;  %3009 = vadd.xlane.f32.xlu1 %v7015_v60  ;;  %4724 = vlog2.f32 %v8759_v18  ;;  %8761 = vst [vmem:[#allocation223_spill] sm:$0xff] %v7031_v38  ;;  %v4709_v51 = vpop.eup %4708  ;;  %v2572_v18 = vsub.f32 %v5043_v35, %v7008_v6  ;;  %v8765_v60 = vld [vmem:[#allocation159_spill] sm:$0xff]  ;;  %v8767_v35 = vld [vmem:[#allocation180_spill] sm:$0xff] }
 0x349   : > { %8757 = vst [vmem:[#allocation221_spill] sm:$0xff] %v7021_v8  ;;  %v7029_v52 = vpop.xlane.xlu1 %2861  ;;  %4726 = vlog2.f32 %v8762_v62  ;;  %v4711_v10 = vpop.eup %4710  ;;  %v2627_v62 = vmul.f32 1.442695, %v2571_v58  ;;  %v8768_v6 = vld [vmem:[#allocation179_spill] sm:$0xff] }
 0x34a   : > { %8760 = vst [vmem:[#allocation185_spill] sm:$0xff] %v7029_v52  ;;  %4728 = vpow2.f32 %v2621_v7  ;;  %v292_v7 = vld [vmem:[%s7038_s30] sm:$0xff]  ;;  %v8769_v22 = vsub.f32 %v8767_v35, %v8768_v6  ;;  %v1481_v6 = vmul.f32 0.6931472, %v4703_v29  ;;  %v1173_v35 = vmul.f32 0.6931472, %v4709_v51 }
 0x34b   : > { %3007 = vadd.xlane.f32.xlu0 %v7026_v43  ;;  %4730 = vpow2.f32 %v2947_v54  ;;  %v7047_v43 = vpop.eup %4712  ;;  %v2629_v54 = vmul.f32 1.442695, %v2572_v18  ;;  %v1161_v18 = vmul.f32 0.6931472, %v4701_v36  ;;  %v8776_v29 = vld [vmem:[#allocation56_spill] sm:$0xff] }
 0x34c   : > { %v7042_v53 = vpop.xlane.xlu0 %2859  ;;  %3005 = vadd.xlane.f32.xlu1 %v7031_v38  ;;  %8764 = vst [vmem:[#allocation224_spill] sm:$0xff] %v7047_v43  ;;  %4732 = vrcp.f32 %v8765_v60  ;;  %v7051_v45 = vpop.eup %4714 }
 0x34d   : > { %8763 = vst [vmem:[#allocation190_spill] sm:$0xff] %v7042_v53  ;;  %v1703_v4 = vpop.xlane.xlu1 %1702  ;;  %8766 = vst [vmem:[#allocation159_spill] sm:$0xff] %v7051_v45  ;;  %4734 = vlog2.f32 %v6381_v21  ;;  %v4717_v58 = vpop.eup %4716  ;;  %v2892_v21 = vsub.f32 %v8771_v55, %v6976_v56 }
 0x34e   : > { %v1798_v38 = vsub.f32 %v1703_v4, %v8769_v22  ;;  %4736 = vpow2.f32 %v2633_v46  ;;  %v4719_v60 = vpop.eup %4718  ;;  %v1485_v22 = vmul.f32 0.6931472, %v4695_v37 }
 0x34f   : > { %3003 = vadd.xlane.f32.xlu0 %v7047_v43  ;;  %4738 = vpow2.f32 %v2627_v62  ;;  %v4721_v4 = vpop.eup %4720  ;;  %v8772_v62 = vld [vmem:[#allocation45_spill] sm:$0xff]  ;;  %v1489_v56 = vmul.f32 0.6931472, %v4719_v60  ;;  %v2949_v36 = vmul.f32 1.442695, %v2892_v21 }
 0x350   : > { %3015 = vadd.xlane.f32.xlu1 %v7051_v45  ;;  %v7059_v23 = vpop.xlane.xlu0 %2545  ;;  %v7063_v33 = vmul.f32 %v1798_v38, %v292_v7  ;;  %4740 = vlog2.f32 %v6350_v14  ;;  %v4723_v46 = vpop.eup %4722  ;;  %v1493_v45 = vmul.f32 0.6931472, %v4711_v10  ;;  %v5044_v38 = vld [vmem:[%s5880_s23 + $0xf8] sm:$0xff]  ;;  %v8775_v14 = vld [vmem:[#allocation55_spill] sm:$0xff]  ;;  %v1169_v60 = vmul.f32 0.6931472, %v4717_v58 }
 0x351   : > { %8770 = vst [vmem:[#allocation180_spill] sm:$0xff] %v7059_v23  ;;  %v7066_v15 = vpop.xlane.xlu1 %1708  ;;  %4742 = vpow2.f32 %v2629_v54  ;;  %v2578_v7 = vsub.f32 %v5044_v38, %v7059_v23  ;;  %v8777_v10 = vld [vmem:[#allocation207_spill] sm:$0xff]  ;;  %v8779_v54 = vld [vmem:[#allocation192_spill] sm:$0xff]  ;;  %v1545_v38 = vadd.f32 %v1485_v22, %v8780_v19  ;;  %v8784_v21 = vld [vmem:[#allocation73_spill] sm:$0xff] }
 0x352   : > { %v4725_v48 = vpop.eup %4724  ;;  %4744 = vpow2.f32 %v2953_v3  ;;  %v2897_v51 = vsub.f32 %v8777_v10, %v7021_v8  ;;  %v8781_v23 = vld [vmem:[#allocation71_spill] sm:$0xff]  ;;  %v8783_v3 = vld [vmem:[#allocation206_spill] sm:$0xff]  ;;  %v7088_v16 = vadd.f32 %v1173_v35, %v8784_v21  ;;  %v8786_v58 = vld [vmem:[#allocation72_spill] sm:$0xff] }
 0x353   : > { %2689 = vadd.xlane.f32.xlu0 %v4721_v4  ;;  %v4727_v27 = vpop.eup %4726  ;;  %v8778_v4 = vld [vmem:[#allocation69_spill] sm:$0xff]  ;;  %4746 = vlog2.f32 %v8779_v54  ;;  %v1543_v24 = vadd.f32 %v1481_v6, %v8781_v23  ;;  %v8785_v8 = vld [vmem:[#allocation75_spill] sm:$0xff]  ;;  %v8787_v19 = vld [vmem:[#allocation88_spill] sm:$0xff]  ;;  %v2641_v23 = vmul.f32 1.442695, %v2578_v7 }
 0x354   : > { %2695 = vadd.xlane.f32.xlu1 %v4723_v46  ;;  %v7072_v37 = vpop.xlane.xlu0 %2541  ;;  %v1225_v43 = vadd.f32 %v1165_v2, %v8778_v4  ;;  %v4729_v17 = vpop.eup %4728  ;;  %4748 = vrcp.f32 %v8783_v3  ;;  %v7091_v2 = vadd.f32 %v1493_v45, %v8785_v8  ;;  %v1223_v4 = vadd.f32 %v1161_v18, %v8786_v58  ;;  %v8788_v22 = vld [vmem:[#allocation7_spill] sm:$0xff]  ;;  %v8790_v45 = vld [vmem:[#allocation177_spill] sm:$0xff]  ;;  %v8791_v18 = vld [vmem:[#allocation176_spill] sm:$0xff] }
 0x355   : > { %8774 = vst [vmem:[#allocation179_spill] sm:$0xff] %v7072_v37  ;;  %v7081_v46 = vpop.xlane.xlu1 %1716  ;;  %v7084_v55 = vpop.eup %4730  ;;  %4750 = vlog2.f32 %v8787_v19  ;;  %v2895_v10 = vsub.f32 %v8788_v22, %v7042_v53  ;;  %v8789_v6 = vld [vmem:[#allocation79_spill] sm:$0xff]  ;;  %v1181_v8 = vmul.f32 0.6931472, %v4725_v48  ;;  %v8792_v58 = vsub.f32 %v8790_v45, %v8791_v18  ;;  %v8793_v53 = vld [vmem:[#allocation77_spill] sm:$0xff] }
 0x356   : > { %8782 = vst [vmem:[#allocation45_spill] sm:$0xff] %v7084_v55  ;;  %v4733_v54 = vpop.eup %4732  ;;  %v7099_v3 = vadd.f32 %v1489_v56, %v8789_v6  ;;  %v294_v21 = vld [vmem:[%s7038_s30 + $0x10] sm:$0xff]  ;;  %4752 = vpow2.f32 %v2949_v36  ;;  %v1769_v7 = vsub.f32 %v1545_v38, %v1225_v43  ;;  %v1227_v22 = vadd.f32 %v1169_v60, %v8793_v53  ;;  %v5045_v18 = vld [vmem:[%s5880_s23 + $0xe0] sm:$0xff]  ;;  %v293_v60 = vld [vmem:[%s7038_s30 + $0x8] sm:$0xff] }
 0x357   : > { %2685 = vadd.xlane.f32.xlu0 %v4729_v17  ;;  %v4735_v0 = vpop.eup %4734  ;;  %v2959_v17 = vmul.f32 1.442695, %v2897_v51  ;;  %4754 = vlog2.f32 %v6431_v11  ;;  %v1767_v56 = vsub.f32 %v1543_v24, %v1223_v4  ;;  %v8795_v36 = vld [vmem:[#allocation131_spill] sm:$0xff]  ;;  %v2575_v11 = vsub.f32 %v5045_v18, %v7003_v20  ;;  %v8796_v4 = vld [vmem:[#allocation80_spill] sm:$0xff]  ;;  %v5046_v18 = vld [vmem:[%s5880_s23 + $0xe8] sm:$0xff] }
 0x358   : > { %3011 = vadd.xlane.f32.xlu1 %v7084_v55  ;;  %v1707_v35 = vpop.xlane.xlu0 %1706  ;;  %v4737_v34 = vpop.eup %4736  ;;  %4756 = vrcp.f32 %v8794_v50  ;;  %v1628_v51 = vmul.f32 %v4733_v54, %v8795_v36  ;;  %v2955_v43 = vmul.f32 1.442695, %v2895_v10  ;;  %v1771_v53 = vsub.f32 %v7099_v3, %v1227_v22  ;;  %v8797_v36 = vld [vmem:[#allocation195_spill] sm:$0xff]  ;;  %v295_v22 = vld [vmem:[%s7038_s30 + $0x18] sm:$0xff]  ;;  %v8806_v48 = vld [vmem:[#allocation89_spill] sm:$0xff] }
 0x359   : > { %v1800_v19 = vsub.f32 %v1707_v35, %v8792_v58  ;;  %v1713_v55 = vpop.xlane.xlu1 %1712  ;;  %v4739_v6 = vpop.eup %4738  ;;  %4758 = vpow2.f32 %v2641_v23  ;;  %v1801_v38 = vsub.f32 %v7066_v15, %v1769_v7  ;;  %v1177_v58 = vmul.f32 0.6931472, %v4727_v27 }
 0x35a   : > { %v4741_v35 = vpop.eup %4740  ;;  %4760 = vpow2.f32 %v2959_v17  ;;  %v8798_v17 = vld [vmem:[#allocation94_spill] sm:$0xff]  ;;  %v8799_v15 = vsub.f32 %v8773_v26, %v8772_v62 }
 0x35b   : > { %2697 = vadd.xlane.f32.xlu0 %v4737_v34  ;;  %v1832_v45 = vmul.f32 %v1800_v19, %v294_v21  ;;  %v7117_v34 = vadd.f32 %v1181_v8, %v8796_v4  ;;  %v4743_v21 = vpop.eup %4742  ;;  %v1497_v19 = vmul.f32 0.6931472, %v4735_v0  ;;  %4762 = vlog2.f32 %v8797_v36  ;;  %v298_v4 = vld [vmem:[%s7038_s30 + $0x30] sm:$0xff]  ;;  %v8801_v36 = vld [vmem:[#allocation184_spill] sm:$0xff] }
 0x35c   : > { %2691 = vadd.xlane.f32.xlu1 %v4739_v6  ;;  %v1705_v24 = vpop.xlane.xlu0 %1704  ;;  %v7123_v23 = vpop.eup %4744  ;;  %v1501_v3 = vmul.f32 0.6931472, %v4741_v35  ;;  %4764 = vlog2.f32 %v8798_v17  ;;  %v1692_v8 = vmul.f32 %v8799_v15, %v1628_v51  ;;  %v2635_v0 = vmul.f32 1.442695, %v2575_v11  ;;  %v8802_v17 = vld [vmem:[#allocation183_spill] sm:$0xff]  ;;  %v8805_v15 = vld [vmem:[#allocation86_spill] sm:$0xff] }
 0x35d   : > { %v1799_v54 = vsub.f32 %v1705_v24, %v1767_v56  ;;  %v7120_v10 = vpop.xlane.xlu1 %1724  ;;  %v7129_v7 = vpop.eup %4746  ;;  %v8800_v56 = vld [vmem:[#allocation123_spill] sm:$0xff]  ;;  %4766 = vpow2.f32 %v2955_v43  ;;  %v2576_v24 = vsub.f32 %v5046_v18, %v7072_v37  ;;  %v8803_v62 = vsub.f32 %v8801_v36, %v8802_v17 }
 0x35e   : > { %v2898_v6 = vsub.f32 %v8800_v56, %v7013_v59  ;;  %v1863_v51 = vsel %vm1862_vm0, %v7063_v33, 0.0  ;;  %v1833_v11 = vmul.f32 %v1801_v38, %v295_v22  ;;  %v8804_v43 = vld [vmem:[#allocation103_spill] sm:$0xff]  ;;  %v1231_v18 = vadd.f32 %v1177_v58, %v8805_v15  ;;  %v8809_v58 = vld [vmem:[#allocation160_spill] sm:$0xff] }
 0x35f   : > { %2693 = vadd.xlane.f32.xlu0 %v4743_v21  ;;  %v1831_v27 = vmul.f32 %v1799_v54, %v293_v60  ;;  %v4749_v21 = vpop.eup %4748  ;;  %4768 = vlog2.f32 %v8804_v43  ;;  %v1551_v56 = vadd.f32 %v1497_v19, %v8806_v48  ;;  %v1803_v36 = vsub.f32 %v1713_v55, %v1771_v53  ;;  %v8810_v55 = vld [vmem:[#allocation78_spill] sm:$0xff]  ;;  %v8814_v15 = vld [vmem:[#allocation152_spill] sm:$0xff] }
 0x360   : > { %3017 = vadd.xlane.f32.xlu1 %v7123_v23  ;;  %v1715_v35 = vpop.xlane.xlu0 %1714  ;;  %v4751_v54 = vpop.eup %4750  ;;  %v1866_v33 = vsel %vm1862_vm0, %v1832_v45, 0.0  ;;  %v1630_v19 = vmul.f32 %v4749_v21, %v8809_v58  ;;  %v2961_v43 = vmul.f32 1.442695, %v2898_v6  ;;  %v2896_v53 = vsub.f32 %v8810_v55, %v7029_v52  ;;  %v8812_v45 = vld [vmem:[#allocation188_spill] sm:$0xff]  ;;  %v302_v52 = vld [vmem:[%s7038_s30 + $0x50] sm:$0xff] }
 0x361   : > { %v1804_v26 = vsub.f32 %v1715_v35, %v8803_v62  ;;  %v1864_v60 = vsel %vm1862_vm0, %v1831_v27, 0.0  ;;  %v1721_v37 = vpop.xlane.xlu1 %1720  ;;  %v7146_v20 = vpop.eup %4752  ;;  %v8808_v35 = vld [vmem:[#allocation199_spill] sm:$0xff]  ;;  %v2637_v27 = vmul.f32 1.442695, %v2576_v24  ;;  %v297_v62 = vld [vmem:[%s7038_s30 + $0x28] sm:$0xff]  ;;  %v1775_v21 = vsub.f32 %v1551_v56, %v1231_v18  ;;  %v8816_v58 = vld [vmem:[#allocation164_spill] sm:$0xff] }
 0x362   : > { %v1865_v59 = vadd.f32 %v1864_v60, %v1863_v51  ;;  %8807 = vst [vmem:[#allocation46_spill] sm:$0xff] %v7146_v20  ;;  %4770 = vlog2.f32 %v8808_v35  ;;  %v4755_v22 = vpop.eup %4754  ;;  %v296_v51 = vld [vmem:[%s7038_s30 + $0x20] sm:$0xff]  ;;  %v8815_v35 = vld [vmem:[#allocation83_spill] sm:$0xff]  ;;  %v8818_v18 = vsub.f32 %v8776_v29, %v8775_v14  ;;  %v8823_v29 = vld [vmem:[#allocation60_spill] sm:$0xff] }
 0x363   : > { %1746 = vadd.xlane.f32.xlu0 %v1692_v8  ;;  %v7150_v38 = vmul.f32 %v1804_v26, %v298_v4  ;;  %4772 = vpow2.f32 %v2635_v0  ;;  %v4757_v60 = vpop.eup %4756  ;;  %v8811_v8 = vld [vmem:[#allocation189_spill] sm:$0xff]  ;;  %v1868_v0 = vsel %vm1862_vm0, %v1833_v11, 0.0 }
 0x364   : > { %3013 = vadd.xlane.f32.xlu1 %v7146_v20  ;;  %v1711_v48 = vpop.xlane.xlu0 %1710  ;;  %v1867_v17 = vadd.f32 %v1866_v33, %v1865_v59  ;;  %v8813_v4 = vsub.f32 %v8811_v8, %v8812_v45  ;;  %v4759_v24 = vpop.eup %4758  ;;  %4774 = vlog2.f32 %v8814_v15  ;;  %v1553_v20 = vadd.f32 %v1501_v3, %v8815_v35  ;;  %v299_v35 = vld [vmem:[%s7038_s30 + $0x38] sm:$0xff] }
 0x365   : > { %v7164_v59 = vpop.xlane.xlu1 %1732  ;;  %v7166_v33 = vpop.eup %4760  ;;  %4776 = vrcp.f32 %v8816_v58  ;;  %v1835_v8 = vmul.f32 %v1803_v36, %v297_v62  ;;  %v1505_v3 = vmul.f32 0.6931472, %v4755_v22  ;;  %v8821_v36 = vld [vmem:[#allocation82_spill] sm:$0xff] }
 0x366   : > { %v1802_v26 = vsub.f32 %v1711_v48, %v8813_v4  ;;  %v1869_v6 = vadd.f32 %v1868_v0, %v1867_v17  ;;  %v8817_v48 = vsub.f32 %v7091_v2, %v7088_v16  ;;  %v4763_v4 = vpop.eup %4762  ;;  %4778 = vpow2.f32 %v2637_v27  ;;  %v8819_v0 = vld [vmem:[#allocation168_spill] sm:$0xff]  ;;  %v8820_v2 = vld [vmem:[#allocation85_spill] sm:$0xff] }
 0x367   : > { %2705 = vadd.xlane.f32.xlu0 %v4759_v24  ;;  %v1694_v17 = vmul.f32 %v8818_v18, %v1630_v19  ;;  %v1631_v15 = vmul.f32 %v4757_v60, %v8819_v0  ;;  %v7180_v16 = vpop.eup %4764  ;;  %4780 = vpow2.f32 %v2961_v43  ;;  %v8822_v62 = vsub.f32 %v8820_v2, %v8821_v36  ;;  %v8824_v19 = vld [vmem:[#allocation59_spill] sm:$0xff]  ;;  %v8825_v0 = vld [vmem:[#allocation101_spill] sm:$0xff] }
 0x368   : > { %v1805_v11 = vsub.f32 %v7081_v46, %v8817_v48  ;;  %v1834_v45 = vmul.f32 %v1802_v26, %v296_v51  ;;  %3023 = vadd.xlane.f32.xlu1 %v7166_v33  ;;  %v1723_v56 = vpop.xlane.xlu0 %1722  ;;  %v2957_v46 = vmul.f32 1.442695, %v2896_v53  ;;  %v7186_v51 = vpop.eup %4766  ;;  %v1185_v26 = vmul.f32 0.6931472, %v4751_v54 }
 0x369   : > { %v1808_v22 = vsub.f32 %v1723_v56, %v8822_v62  ;;  %v1777_v14 = vsub.f32 %v1553_v20, %v7117_v34  ;;  %v1663_v60 = vsub.f32 %v8824_v19, %v8823_v29  ;;  %v1807_v48 = vsub.f32 %v1721_v37, %v1775_v21  ;;  %v4769_v18 = vpop.eup %4768  ;;  %v1729_v54 = vpop.xlane.xlu1 %1728  ;;  %v301_v62 = vld [vmem:[%s7038_s30 + $0x48] sm:$0xff]  ;;  %v300_v29 = vld [vmem:[%s7038_s30 + $0x40] sm:$0xff]  ;;  %v5047_v37 = vld [vmem:[%s5880_s23 + $0xf0] sm:$0xff] }
 0x36a   : > { %v1870_v27 = vsel %vm1862_vm0, %v1834_v45, 0.0  ;;  %v1837_v43 = vmul.f32 %v1805_v11, %v299_v35  ;;  %v1872_v53 = vsel %vm1862_vm0, %v1835_v8, 0.0  ;;  %v1509_v45 = vmul.f32 0.6931472, %v4763_v4  ;;  %v8826_v11 = vld [vmem:[#allocation139_spill] sm:$0xff] }
 0x36b   : > { %v1871_v24 = vadd.f32 %v1870_v27, %v1869_v6  ;;  %1750 = vadd.xlane.f32.xlu0 %v1694_v17  ;;  %v1840_v56 = vmul.f32 %v1808_v22, %v302_v52  ;;  %v1555_v2 = vadd.f32 %v1505_v3, %v8825_v0  ;;  %v1695_v34 = vmul.f32 %v1663_v60, %v1631_v15  ;;  %v8827_v8 = vld [vmem:[#allocation143_spill] sm:$0xff]  ;;  %v8829_v15 = vld [vmem:[#allocation98_spill] sm:$0xff] }
 0x36c   : > { %3019 = vadd.xlane.f32.xlu1 %v7186_v51  ;;  %v1719_v20 = vpop.xlane.xlu0 %1718  ;;  %v4771_v6 = vpop.eup %4770  ;;  %v2577_v21 = vsub.f32 %v5047_v37, %v6992_v31  ;;  %4782 = vpow2.f32 %v2957_v46  ;;  %v8828_v52 = vsub.f32 %v8826_v11, %v8827_v8  ;;  %v1874_v4 = vsel %vm1862_vm0, %v7150_v38, 0.0  ;;  %v303_v8 = vld [vmem:[%s7038_s30 + $0x58] sm:$0xff] }
 0x36d   : > { %v1873_v36 = vadd.f32 %v1872_v53, %v1871_v24  ;;  %v4773_v3 = vpop.eup %4772  ;;  %v1189_v35 = vmul.f32 0.6931472, %v7129_v7  ;;  %v1235_v22 = vadd.f32 %v1185_v26, %v8829_v15  ;;  %v1809_v19 = vsub.f32 %v7120_v10, %v1777_v14  ;;  %v8831_v26 = vld [vmem:[#allocation161_spill] sm:$0xff]  ;;  %v8832_v10 = vld [vmem:[#allocation140_spill] sm:$0xff] }
 0x36e   : > { %v1806_v17 = vsub.f32 %v1719_v20, %v8828_v52  ;;  %v1876_v46 = vsel %vm1862_vm0, %v1837_v43, 0.0  ;;  %v1839_v60 = vmul.f32 %v1807_v48, %v301_v62  ;;  %v4775_v53 = vpop.eup %4774  ;;  %v1513_v0 = vmul.f32 0.6931472, %v4771_v6  ;;  %v8830_v20 = vld [vmem:[#allocation95_spill] sm:$0xff]  ;;  %v8833_v14 = vld [vmem:[#allocation145_spill] sm:$0xff]  ;;  %v1741_v6 = vpop.xlane.xlu1 %1740 }
 0x36f   : > { %v1875_v27 = vadd.f32 %v1874_v4, %v1873_v36  ;;  %1752 = vadd.xlane.f32.xlu0 %v1695_v34  ;;  %v1557_v37 = vadd.f32 %v1509_v45, %v8830_v20  ;;  %v1779_v38 = vsub.f32 %v1555_v2, %v1235_v22  ;;  %v306_v52 = vld [vmem:[%s7038_s30 + $0x70] sm:$0xff]  ;;  %v4777_v31 = vpop.eup %4776  ;;  %4784 = vrcp.f32 %v8831_v26  ;;  %v8835_v45 = vld [vmem:[#allocation92_spill] sm:$0xff] }
 0x370   : > { %v1838_v24 = vmul.f32 %v1806_v17, %v300_v29  ;;  %2699 = vadd.xlane.f32.xlu1 %v4773_v3  ;;  %v1731_v11 = vpop.xlane.xlu0 %1730  ;;  %v2639_v36 = vmul.f32 1.442695, %v2577_v21  ;;  %v8834_v34 = vsub.f32 %v8832_v10, %v8833_v14  ;;  %v4779_v62 = vpop.eup %4778  ;;  %v1193_v29 = vmul.f32 0.6931472, %v4769_v18  ;;  %v305_v18 = vld [vmem:[%s7038_s30 + $0x68] sm:$0xff]  ;;  %v8838_v14 = vld [vmem:[#allocation149_spill] sm:$0xff] }
 0x371   : > { %v1877_v7 = vadd.f32 %v1876_v46, %v1875_v27  ;;  %v1237_v2 = vadd.f32 %v1189_v35, %v8835_v45  ;;  %v7216_v4 = vpop.eup %4780  ;;  %v1811_v3 = vsub.f32 %v1729_v54, %v1779_v38  ;;  %v1841_v15 = vmul.f32 %v1809_v19, %v303_v8  ;;  %v8836_v35 = vld [vmem:[#allocation113_spill] sm:$0xff]  ;;  %v8841_v38 = vld [vmem:[#allocation146_spill] sm:$0xff] }
 0x372   : > { %v1812_v43 = vsub.f32 %v1731_v11, %v8834_v34  ;;  %v1878_v48 = vsel %vm1862_vm0, %v1838_v24, 0.0  ;;  %v1880_v21 = vsel %vm1862_vm0, %v1839_v60, 0.0  ;;  %v1517_v27 = vmul.f32 0.6931472, %v4775_v53  ;;  %v304_v11 = vld [vmem:[%s7038_s30 + $0x60] sm:$0xff]  ;;  %v8840_v53 = vld [vmem:[#allocation110_spill] sm:$0xff]  ;;  %v1737_v45 = vpop.xlane.xlu1 %1736 }
 0x373   : > { %v1879_v17 = vadd.f32 %v1878_v48, %v1877_v7  ;;  %2701 = vadd.xlane.f32.xlu0 %v4779_v62  ;;  %v1781_v46 = vsub.f32 %v1557_v37, %v1237_v2  ;;  %4786 = vpow2.f32 %v2639_v36  ;;  %v1559_v10 = vadd.f32 %v1513_v0, %v8836_v35  ;;  %v8837_v7 = vld [vmem:[#allocation100_spill] sm:$0xff] }
 0x374   : > { %v1844_v22 = vmul.f32 %v1812_v43, %v306_v52  ;;  %3025 = vadd.xlane.f32.xlu1 %v7216_v4  ;;  %v1727_v24 = vpop.xlane.xlu0 %1726  ;;  %v8839_v34 = vsub.f32 %v8837_v7, %v8838_v14  ;;  %v1882_v19 = vsel %vm1862_vm0, %v1840_v56, 0.0  ;;  %v1197_v60 = vmul.f32 0.6931472, %v7180_v16  ;;  %v8842_v2 = vld [vmem:[#allocation52_spill] sm:$0xff] }
 0x375   : > { %v1881_v20 = vadd.f32 %v1880_v21, %v1879_v17  ;;  %v1239_v37 = vadd.f32 %v1193_v29, %v8840_v53  ;;  %v1627_v8 = vmul.f32 %v4777_v31, %v8841_v38  ;;  %v1813_v36 = vsub.f32 %v7164_v59, %v1781_v46  ;;  %v8843_v17 = vld [vmem:[#allocation51_spill] sm:$0xff]  ;;  %v307_v21 = vld [vmem:[%s7038_s30 + $0x78] sm:$0xff]  ;;  %v8845_v59 = vld [vmem:[#allocation106_spill] sm:$0xff] }
 0x376   : > { %v1810_v54 = vsub.f32 %v1727_v24, %v8839_v34  ;;  %v7230_v43 = vpop.eup %4782  ;;  %v1884_v0 = vsel %vm1862_vm0, %v1841_v15, 0.0  ;;  %v1843_v48 = vmul.f32 %v1811_v3, %v305_v18  ;;  %v1659_v16 = vsub.f32 %v8843_v17, %v8842_v2  ;;  %v310_v24 = vld [vmem:[%s7038_s30 + $0x90] sm:$0xff]  ;;  %v8850_v17 = vld [vmem:[#allocation112_spill] sm:$0xff] }
 0x377   : > { %v1883_v52 = vadd.f32 %v1882_v19, %v1881_v20  ;;  %v8844_v31 = vld [vmem:[#allocation107_spill] sm:$0xff]  ;;  %v1783_v35 = vsub.f32 %v1559_v10, %v1239_v37  ;;  %v1845_v53 = vmul.f32 %v1813_v36, %v307_v21  ;;  %v309_v10 = vld [vmem:[%s7038_s30 + $0x88] sm:$0xff]  ;;  %v308_v37 = vld [vmem:[%s7038_s30 + $0x80] sm:$0xff] }
 0x378   : > { %v1842_v62 = vmul.f32 %v1810_v54, %v304_v11  ;;  %3021 = vadd.xlane.f32.xlu1 %v7230_v43  ;;  %v1739_v56 = vpop.xlane.xlu0 %1738  ;;  %v1561_v20 = vadd.f32 %v1517_v27, %v8844_v31  ;;  %v8846_v46 = vld [vmem:[#allocation151_spill] sm:$0xff]  ;;  %v8848_v11 = vld [vmem:[#allocation104_spill] sm:$0xff]  ;;  %v1691_v14 = vmul.f32 %v1659_v16, %v1627_v8  ;;  %v1888_v38 = vsel %vm1862_vm0, %v1843_v48, 0.0  ;;  %v8852_v36 = vld [vmem:[#allocation134_spill] sm:$0xff] }
 0x379   : > { %v1885_v29 = vadd.f32 %v1884_v0, %v1883_v52  ;;  %v8847_v15 = vsub.f32 %v8845_v59, %v8846_v46  ;;  %v1241_v7 = vadd.f32 %v1197_v60, %v8848_v11  ;;  %v4785_v54 = vpop.eup %4784  ;;  %v1815_v19 = vsub.f32 %v1737_v45, %v1783_v35  ;;  %v8853_v59 = vld [vmem:[#allocation49_spill] sm:$0xff]  ;;  %v8854_v46 = vld [vmem:[#allocation50_spill] sm:$0xff] }
 0x37a   : > { %v1886_v18 = vsel %vm1862_vm0, %v1842_v62, 0.0  ;;  %v1890_v45 = vsel %vm1862_vm0, %v1844_v22, 0.0  ;;  %v1629_v16 = vmul.f32 %v4785_v54, %v8852_v36  ;;  %v312_v11 = vld [vmem:[%s7038_s30 + $0xa0] sm:$0xff] }
 0x37b   : > { %v1816_v3 = vsub.f32 %v1739_v56, %v8847_v15  ;;  %v1887_v34 = vadd.f32 %v1886_v18, %v1885_v29  ;;  %v1785_v2 = vsub.f32 %v1561_v20, %v1241_v7  ;;  %v8849_v56 = vld [vmem:[#allocation115_spill] sm:$0xff]  ;;  %v1847_v31 = vmul.f32 %v1815_v19, %v309_v10  ;;  %v8855_v7 = vld [vmem:[#allocation165_spill] sm:$0xff] }
 0x37c   : > { %1744 = vadd.xlane.f32.xlu1 %v1691_v14  ;;  %v1735_v27 = vpop.xlane.xlu0 %1734  ;;  %v8851_v62 = vsub.f32 %v8849_v56, %v8850_v17  ;;  %v1661_v15 = vsub.f32 %v8854_v46, %v8853_v59  ;;  %v8856_v14 = vld [vmem:[#allocation167_spill] sm:$0xff] }
 0x37d   : > { %v1848_v52 = vmul.f32 %v1816_v3, %v310_v24  ;;  %v1889_v0 = vadd.f32 %v1888_v38, %v1887_v34  ;;  %v7251_v8 = vpop.xlane.xlu1 %2963  ;;  %v4787_v21 = vpop.eup %4786  ;;  %v1817_v29 = vsub.f32 %v1741_v6, %v1785_v2  ;;  %v1892_v24 = vsel %vm1862_vm0, %v1845_v53, 0.0  ;;  %v311_v3 = vld [vmem:[%s7038_s30 + $0x98] sm:$0xff] }
 0x37e   : > { %v1814_v60 = vsub.f32 %v1735_v27, %v8851_v62  ;;  %v8857_v22 = vsub.f32 %v8855_v7, %v8856_v14  ;;  %v1693_v38 = vmul.f32 %v1661_v15, %v1629_v16  ;;  %v1896_v27 = vsel %vm1862_vm0, %v1847_v31, 0.0 }
 0x37f   : > { %v1891_v48 = vadd.f32 %v1890_v45, %v1889_v0  ;;  %v1849_v19 = vmul.f32 %v1817_v29, %v311_v3  ;;  %4788 = vrcp.f32 %v7251_v8  ;;  %v1898_v2 = vsel %vm1862_vm0, %v1848_v52, 0.0 }
 0x380   : > { %v1846_v35 = vmul.f32 %v1814_v60, %v308_v37  ;;  %2703 = vadd.xlane.f32.xlu1 %v4787_v21  ;;  %v1743_v20 = vpop.xlane.xlu0 %1742 }
 0x381   : > { %v1893_v18 = vadd.f32 %v1892_v24, %v1891_v48  ;;  %v1818_v34 = vsub.f32 %v1743_v20, %v8857_v22  ;;  %v7263_v54 = vpop.xlane.xlu1 %2649  ;;  %v1900_v62 = vsel %vm1862_vm0, %v1849_v19, 0.0  ;;  %v5048_v20 = vld [vmem:[%s5880_s23 + $0x10] sm:$0xff] }
 0x382   : > { %v1894_v6 = vsel %vm1862_vm0, %v1846_v35, 0.0  ;;  %v3189_v59 = vsub.f32 %v6222_v1, %v5048_v20  ;;  %v5052_v20 = vld [vmem:[%s5880_s23 + $0x38] sm:$0xff] }
 0x383   : > { %v1895_v53 = vadd.f32 %v1894_v6, %v1893_v18  ;;  %v1850_v0 = vmul.f32 %v1818_v34, %v312_v11  ;;  %v5049_v11 = vld [vmem:[%s5880_s23] sm:$0xff] }
 0x384   : > { %1748 = vadd.xlane.f32.xlu1 %v1693_v38  ;;  %v7267_v10 = vpop.xlane.xlu0 %2967  ;;  %v3187_v7 = vsub.f32 %v6246_v12, %v5049_v11  ;;  %v5050_v12 = vld [vmem:[%s5880_s23 + $0x18] sm:$0xff] }
 0x385   : > { %v1897_v37 = vadd.f32 %v1896_v27, %v1895_v53  ;;  %4790 = vrcp.f32 %v7267_v10  ;;  %v7272_v17 = vpop.xlane.xlu1 %2645  ;;  %v1902_v36 = vsel %vm1862_vm0, %v1850_v0, 0.0  ;;  %v3190_v38 = vsub.f32 %v6191_v13, %v5050_v12 }
 0x387   : > { %v1899_v56 = vadd.f32 %v1898_v2, %v1897_v37 }
 0x388   : > { %v7275_v60 = vpop.xlane.xlu0 %2647 }
 0x389   : > { %v1901_v45 = vadd.f32 %v1900_v62, %v1899_v56  ;;  %v7282_v21 = vpop.xlane.xlu1 %2977  ;;  %v4789_v52 = vpop.eup %4788  ;;  %v5051_v56 = vld [vmem:[%s5880_s23 + $0x8] sm:$0xff] }
 0x38a   : > { %v3155_v15 = vmul.f32 %v4789_v52, %v6770_v61  ;;  %v3188_v62 = vsub.f32 %v6211_v28, %v5051_v56  ;;  %v5053_v28 = vld [vmem:[%s5880_s23 + $0x30] sm:$0xff] }
 0x38b   : > { %v7278_v16 = vadd.f32 %v1902_v36, %v1901_v45 }
 0x38c   : > { %v7280_v48 = vpop.xlane.xlu0 %2643 }
 0x38f   : > { %v4791_v29 = vpop.eup %4790 }
 0x390   : > { %v7284_v24 = vpop.xlane.xlu0 %2969  ;;  %v3157_v35 = vmul.f32 %v4791_v29, %v6789_v49  ;;  %v3219_v49 = vmul.f32 %v3187_v7, %v3155_v15 }
 0x391   : > { %v7286_v31 = vpop.xlane.xlu1 %2657  ;;  %4792 = vrcp.f32 %v7284_v24 }
 0x392   : > { %v3221_v46 = vmul.f32 %v3189_v59, %v3157_v35  ;;  %4794 = vrcp.f32 %v7282_v21 }
 0x394   : > { %v7293_v3 = vpop.xlane.xlu0 %2965  ;;  %3255 = vadd.xlane.f32.xlu0 %v3221_v46  ;;  %v3193_v46 = vsub.f32 %v6286_v44, %v5053_v28  ;;  %v5057_v28 = vld [vmem:[%s5880_s23 + $0x48] sm:$0xff] }
 0x395   : > { %v7296_v18 = vpop.xlane.xlu1 %2973  ;;  %4796 = vrcp.f32 %v7293_v3 }
 0x396   : > { %4798 = vrcp.f32 %v7296_v18 }
 0x398   : > { %v2976_v1 = vpop.xlane.xlu0 %2975  ;;  %3251 = vadd.xlane.f32.xlu0 %v3219_v49 }
 0x399   : > { %4800 = vlog2.f32 %v2976_v1  ;;  %v7302_v61 = vpop.xlane.xlu1 %2653 }
 0x39a   : > { %4802 = vrcp.f32 %v2976_v1 }
 0x39b   : > { %v4793_v14 = vpop.eup %4792 }
 0x39c   : > { %v2656_v22 = vpop.xlane.xlu0 %2655  ;;  %v3158_v6 = vmul.f32 %v4793_v14, %v6819_v63  ;;  %v4795_v53 = vpop.eup %4794 }
 0x39d   : > { %4804 = vlog2.f32 %v2656_v22  ;;  %v7304_v34 = vpop.xlane.xlu1 %2663  ;;  %v3162_v13 = vmul.f32 %v4795_v53, %v6802_v5  ;;  %v5054_v22 = vld [vmem:[%s5880_s23 + $0x28] sm:$0xff] }
 0x39e   : > { %v3222_v19 = vmul.f32 %v3190_v38, %v3158_v6 }
 0x39f   : > { %v4797_v27 = vpop.eup %4796 }
 0x3a0   : > { %v2972_v0 = vpop.xlane.xlu0 %2971  ;;  %3257 = vadd.xlane.f32.xlu1 %v3222_v19  ;;  %v3156_v2 = vmul.f32 %v4797_v27, %v6830_v32  ;;  %v4799_v45 = vpop.eup %4798  ;;  %v3194_v32 = vsub.f32 %v6255_v25, %v5052_v20 }
 0x3a1   : > { %4806 = vlog2.f32 %v2972_v0  ;;  %v7309_v37 = vpop.xlane.xlu1 %2985  ;;  %v3160_v49 = vmul.f32 %v4799_v45, %v6834_v41 }
 0x3a2   : > { %4808 = vrcp.f32 %v2972_v0  ;;  %v3220_v36 = vmul.f32 %v3188_v62, %v3156_v2  ;;  %v3226_v5 = vmul.f32 %v3194_v32, %v3162_v13  ;;  %v5055_v0 = vld [vmem:[%s5880_s23 + $0x20] sm:$0xff] }
 0x3a3   : > { %v4801_v63 = vpop.eup %4800  ;;  %4810 = vrcp.f32 %v7309_v37 }
 0x3a4   : > { %v4803_v52 = vpop.eup %4802  ;;  %v2652_v29 = vpop.xlane.xlu0 %2651  ;;  %3253 = vadd.xlane.f32.xlu1 %v3220_v36  ;;  %v3040_v15 = vmul.f32 0.6931472, %v4801_v63  ;;  %v5056_v63 = vld [vmem:[%s5880_s23 + $0x58] sm:$0xff]  ;;  %v8858_v36 = vld [vmem:[#allocation182_spill] sm:$0xff] }
 0x3a5   : > { %4812 = vlog2.f32 %v2652_v29  ;;  %v2982_v35 = vpop.xlane.xlu1 %2981  ;;  %v3161_v59 = vmul.f32 %v4803_v52, %v6844_v57  ;;  %v3192_v57 = vsub.f32 %v6275_v39, %v5054_v22  ;;  %v3198_v13 = vsub.f32 %v8858_v36, %v5056_v63  ;;  %v8865_v63 = vld [vmem:[#allocation21_spill] sm:$0xff] }
 0x3a6   : > { %4814 = vlog2.f32 %v2982_v35  ;;  %v7331_v6 = vadd.f32 %v3040_v15, %v6765_v42 }
 0x3a7   : > { %v4805_v11 = vpop.eup %4804  ;;  %4816 = vrcp.f32 %v2982_v35  ;;  %v3225_v7 = vmul.f32 %v3193_v46, %v3161_v59  ;;  %v3224_v41 = vmul.f32 %v3192_v57, %v3160_v49  ;;  %v8860_v46 = vld [vmem:[#allocation186_spill] sm:$0xff] }
 0x3a8   : > { %v2720_v1 = vmul.f32 0.6931472, %v4805_v11  ;;  %v7322_v14 = vpop.xlane.xlu0 %2983  ;;  %3265 = vadd.xlane.f32.xlu1 %v3226_v5  ;;  %v3196_v15 = vsub.f32 %v8860_v46, %v5057_v28  ;;  %v8861_v11 = vld [vmem:[#allocation11_spill] sm:$0xff] }
 0x3a9   : > { %3263 = vadd.xlane.f32.xlu0 %v3225_v7  ;;  %v2662_v25 = vpop.xlane.xlu1 %2661  ;;  %4818 = vrcp.f32 %v7322_v14 }
 0x3aa   : > { %v7328_v44 = vadd.f32 %v2720_v1, %v6703_v30  ;;  %4820 = vlog2.f32 %v2662_v25  ;;  %v3191_v30 = vsub.f32 %v6312_v40, %v5055_v0  ;;  %v8859_v40 = vld [vmem:[#allocation108_spill] sm:$0xff]  ;;  %v8864_v0 = vld [vmem:[#allocation187_spill] sm:$0xff] }
 0x3ab   : > { %v4807_v12 = vpop.eup %4806 }
 0x3ac   : > { %v4809_v38 = vpop.eup %4808  ;;  %v2980_v53 = vpop.xlane.xlu0 %2979  ;;  %3261 = vadd.xlane.f32.xlu1 %v3224_v41  ;;  %v3036_v42 = vmul.f32 0.6931472, %v4807_v12 }
 0x3ad   : > { %4822 = vlog2.f32 %v2980_v53  ;;  %v2672_v39 = vpop.xlane.xlu1 %2671  ;;  %v3159_v27 = vmul.f32 %v4809_v38, %v6863_v9  ;;  %v4811_v2 = vpop.eup %4810  ;;  %v8863_v38 = vld [vmem:[#allocation162_spill] sm:$0xff] }
 0x3ae   : > { %4824 = vrcp.f32 %v2980_v53  ;;  %v3166_v45 = vmul.f32 %v4811_v2, %v6867_v47  ;;  %v8862_v47 = vld [vmem:[#allocation90_spill] sm:$0xff] }
 0x3af   : > { %v4813_v56 = vpop.eup %4812  ;;  %v3223_v62 = vmul.f32 %v3191_v30, %v3159_v27  ;;  %v7348_v7 = vadd.f32 %v3036_v42, %v8862_v47  ;;  %v5058_v27 = vld [vmem:[%s5880_s23 + $0x50] sm:$0xff] }
 0x3b0   : > { %v4815_v52 = vpop.eup %4814  ;;  %v2716_v29 = vmul.f32 0.6931472, %v4813_v56  ;;  %v2660_v35 = vpop.xlane.xlu0 %2659  ;;  %v3230_v32 = vmul.f32 %v3198_v13, %v3166_v45  ;;  %v3197_v30 = vsub.f32 %v8864_v0, %v5058_v27  ;;  %v8866_v13 = vld [vmem:[#allocation34_spill] sm:$0xff] }
 0x3b1   : > { %v4817_v20 = vpop.eup %4816  ;;  %3259 = vadd.xlane.f32.xlu0 %v3223_v62  ;;  %4826 = vlog2.f32 %v2660_v35  ;;  %v2668_v9 = vpop.xlane.xlu1 %2667  ;;  %v3046_v1 = vmul.f32 0.6931472, %v4815_v52 }
 0x3b2   : > { %v3164_v59 = vmul.f32 %v4817_v20, %v8859_v40  ;;  %v7345_v5 = vadd.f32 %v2716_v29, %v8861_v11  ;;  %3273 = vadd.xlane.f32.xlu1 %v3230_v32  ;;  %4828 = vlog2.f32 %v2672_v39  ;;  %v8867_v29 = vld [vmem:[#allocation30_spill] sm:$0xff]  ;;  %v5059_v20 = vld [vmem:[%s5880_s23 + $0x40] sm:$0xff]  ;;  %v8868_v32 = vld [vmem:[#allocation191_spill] sm:$0xff] }
 0x3b3   : > { %v4819_v49 = vpop.eup %4818  ;;  %v7361_v39 = vadd.f32 %v3046_v1, %v8866_v13  ;;  %v3195_v40 = vsub.f32 %v8868_v32, %v5059_v20 }
 0x3b4   : > { %v7350_v25 = vpop.xlane.xlu0 %2665  ;;  %v3228_v22 = vmul.f32 %v3196_v15, %v3164_v59  ;;  %v4821_v12 = vpop.eup %4820  ;;  %v3165_v53 = vmul.f32 %v4819_v49, %v8863_v38  ;;  %v8869_v49 = vld [vmem:[#allocation27_spill] sm:$0xff] }
 0x3b5   : > { %v2994_v41 = vpop.xlane.xlu1 %2993  ;;  %v2726_v2 = vmul.f32 0.6931472, %v4821_v12 }
 0x3b6   : > { %4830 = vrcp.f32 %v2994_v41  ;;  %3269 = vadd.xlane.f32.xlu1 %v3228_v22  ;;  %v3229_v56 = vmul.f32 %v3197_v30, %v3165_v53  ;;  %v8871_v22 = vld [vmem:[#allocation147_spill] sm:$0xff] }
 0x3b7   : > { %v4823_v42 = vpop.eup %4822  ;;  %4832 = vlog2.f32 %v2668_v9  ;;  %v7358_v36 = vadd.f32 %v2726_v2, %v8865_v63  ;;  %v8901_v9 = vld [vmem:[#allocation208_spill] sm:$0xff] }
 0x3b8   : > { %v4825_v62 = vpop.eup %4824  ;;  %v2992_v45 = vpop.xlane.xlu0 %2991  ;;  %3271 = vadd.xlane.f32.xlu0 %v3229_v56  ;;  %v3044_v59 = vmul.f32 0.6931472, %v4823_v42  ;;  %v8873_v42 = vld [vmem:[#allocation119_spill] sm:$0xff] }
 0x3b9   : > { %4834 = vlog2.f32 %v2992_v45  ;;  %v2990_v52 = vpop.xlane.xlu1 %2989  ;;  %v3163_v35 = vmul.f32 %v4825_v62, %v8867_v29  ;;  %v5060_v62 = vld [vmem:[%s5880_s23 + $0x78] sm:$0xff] }
 0x3ba   : > { %4836 = vrcp.f32 %v2992_v45  ;;  %v7372_v12 = vadd.f32 %v3044_v59, %v8871_v22  ;;  %v8874_v45 = vld [vmem:[#allocation158_spill] sm:$0xff] }
 0x3bb   : > { %v4827_v28 = vpop.eup %4826  ;;  %4838 = vlog2.f32 %v2994_v41  ;;  %v3227_v46 = vmul.f32 %v3195_v40, %v3163_v35  ;;  %v3202_v63 = vsub.f32 %v8874_v45, %v5060_v62  ;;  %v8875_v59 = vld [vmem:[#allocation38_spill] sm:$0xff]  ;;  %v8882_v45 = vld [vmem:[#allocation39_spill] sm:$0xff] }
 0x3bc   : > { %v2724_v15 = vmul.f32 0.6931472, %v4827_v28  ;;  %4840 = vrcp.f32 %v2990_v52  ;;  %v2988_v11 = vpop.xlane.xlu0 %2987  ;;  %8872 = vst [vmem:[#allocation56_spill] sm:$0xff] %v7372_v12  ;;  %v4829_v38 = vpop.eup %4828  ;;  %v8877_v22 = vld [vmem:[#allocation166_spill] sm:$0xff] }
 0x3bd   : > { %3267 = vadd.xlane.f32.xlu0 %v3227_v46  ;;  %4842 = vlog2.f32 %v2988_v11  ;;  %v2680_v47 = vpop.xlane.xlu1 %2679  ;;  %v2736_v2 = vmul.f32 0.6931472, %v4829_v38  ;;  %v5061_v46 = vld [vmem:[%s5880_s23 + $0x70] sm:$0xff] }
 0x3be   : > { %4844 = vrcp.f32 %v2988_v11  ;;  %v7369_v1 = vadd.f32 %v2724_v15, %v8869_v49  ;;  %v8876_v15 = vld [vmem:[#allocation193_spill] sm:$0xff] }
 0x3bf   : > { %4846 = vlog2.f32 %v2990_v52  ;;  %v3201_v11 = vsub.f32 %v8876_v15, %v5061_v46  ;;  %v8884_v15 = vld [vmem:[#allocation141_spill] sm:$0xff] }
 0x3c0   : > { %8870 = vst [vmem:[#allocation55_spill] sm:$0xff] %v7369_v1  ;;  %v2674_v53 = vpop.xlane.xlu0 %2673  ;;  %v4831_v27 = vpop.eup %4830  ;;  %v8941_v1 = vld [vmem:[#allocation150_spill] sm:$0xff] }
 0x3c1   : > { %4848 = vlog2.f32 %v2674_v53  ;;  %v2676_v0 = vpop.xlane.xlu1 %2675  ;;  %v4833_v30 = vpop.eup %4832  ;;  %v3170_v56 = vmul.f32 %v4831_v27, %v8873_v42  ;;  %v8878_v53 = vld [vmem:[#allocation142_spill] sm:$0xff] }
 0x3c2   : > { %4850 = vlog2.f32 %v2680_v47  ;;  %v2732_v38 = vmul.f32 0.6931472, %v4833_v30  ;;  %v7384_v27 = vadd.f32 %v2736_v2, %v8878_v53  ;;  %v8880_v47 = vld [vmem:[#allocation36_spill] sm:$0xff]  ;;  %v5063_v53 = vld [vmem:[%s5880_s23 + $0x60] sm:$0xff] }
 0x3c3   : > { %v4835_v13 = vpop.eup %4834  ;;  %v3234_v20 = vmul.f32 %v3202_v63, %v3170_v56 }
 0x3c4   : > { %v4837_v29 = vpop.eup %4836  ;;  %v3056_v35 = vmul.f32 0.6931472, %v4835_v13  ;;  %v2670_v52 = vpop.xlane.xlu0 %2669  ;;  %8879 = vst [vmem:[#allocation69_spill] sm:$0xff] %v7384_v27  ;;  %v5062_v13 = vld [vmem:[%s5880_s23 + $0x68] sm:$0xff]  ;;  %v5069_v27 = vld [vmem:[%s5880_s23 + $0xb0] sm:$0xff] }
 0x3c5   : > { %v4839_v32 = vpop.eup %4838  ;;  %4852 = vlog2.f32 %v2670_v52  ;;  %v3002_v40 = vpop.xlane.xlu1 %3001  ;;  %v3169_v28 = vmul.f32 %v4837_v29, %v8875_v59  ;;  %3281 = vadd.xlane.f32.xlu1 %v3234_v20  ;;  %v8883_v29 = vld [vmem:[#allocation194_spill] sm:$0xff] }
 0x3c6   : > { %v4841_v49 = vpop.eup %4840  ;;  %4854 = vrcp.f32 %v8877_v22  ;;  %v7387_v42 = vadd.f32 %v3056_v35, %v8880_v47  ;;  %v3200_v52 = vsub.f32 %v8883_v29, %v5062_v13  ;;  %v3058_v47 = vmul.f32 0.6931472, %v4839_v32 }
 0x3c7   : > { %v4843_v56 = vpop.eup %4842  ;;  %4856 = vrcp.f32 %v3002_v40  ;;  %v3233_v62 = vmul.f32 %v3201_v11, %v3169_v28  ;;  %v3168_v63 = vmul.f32 %v4841_v49, %v8882_v45  ;;  %v8885_v28 = vld [vmem:[#allocation196_spill] sm:$0xff] }
 0x3c8   : > { %8881 = vst [vmem:[#allocation192_spill] sm:$0xff] %v7387_v42  ;;  %v4845_v59 = vpop.eup %4844  ;;  %v3052_v46 = vmul.f32 0.6931472, %v4843_v56  ;;  %4858 = vlog2.f32 %v2676_v0  ;;  %v3000_v30 = vpop.xlane.xlu0 %2999  ;;  %v3199_v11 = vsub.f32 %v8885_v28, %v5063_v53  ;;  %v8886_v45 = vld [vmem:[#allocation116_spill] sm:$0xff]  ;;  %v8888_v0 = vld [vmem:[#allocation102_spill] sm:$0xff]  ;;  %v5070_v42 = vld [vmem:[%s5880_s23 + $0xa0] sm:$0xff] }
 0x3c9   : > { %3279 = vadd.xlane.f32.xlu0 %v3233_v62  ;;  %4860 = vlog2.f32 %v3000_v30  ;;  %v2998_v35 = vpop.xlane.xlu1 %2997  ;;  %v3232_v20 = vmul.f32 %v3200_v52, %v3168_v63  ;;  %v3167_v22 = vmul.f32 %v4845_v59, %v8884_v15  ;;  %v4847_v49 = vpop.eup %4846  ;;  %v7398_v13 = vadd.f32 %v2732_v38, %v8886_v45  ;;  %v8892_v15 = vld [vmem:[#allocation23_spill] sm:$0xff] }
 0x3ca   : > { %4862 = vrcp.f32 %v3000_v30  ;;  %v7401_v56 = vadd.f32 %v3052_v46, %v8888_v0  ;;  %v3054_v38 = vmul.f32 0.6931472, %v4847_v49  ;;  %v8890_v30 = vld [vmem:[#allocation22_spill] sm:$0xff] }
 0x3cb   : > { %8887 = vst [vmem:[#allocation70_spill] sm:$0xff] %v7398_v13  ;;  %v4849_v29 = vpop.eup %4848  ;;  %4864 = vlog2.f32 %v3002_v40  ;;  %3277 = vadd.xlane.f32.xlu1 %v3232_v20  ;;  %v3231_v62 = vmul.f32 %v3199_v11, %v3167_v22  ;;  %v7406_v46 = vadd.f32 %v3058_v47, %v8890_v30  ;;  %v8894_v22 = vld [vmem:[#allocation8_spill] sm:$0xff]  ;;  %v8895_v47 = vld [vmem:[#allocation91_spill] sm:$0xff] }
 0x3cc   : > { %8889 = vst [vmem:[#allocation71_spill] sm:$0xff] %v7401_v56  ;;  %v2738_v2 = vmul.f32 0.6931472, %v4849_v29  ;;  %4866 = vrcp.f32 %v2998_v35  ;;  %v2996_v63 = vpop.xlane.xlu0 %2995  ;;  %v4851_v59 = vpop.eup %4850  ;;  %v5064_v29 = vld [vmem:[%s5880_s23 + $0x98] sm:$0xff] }
 0x3cd   : > { %3275 = vadd.xlane.f32.xlu0 %v3231_v62  ;;  %4868 = vlog2.f32 %v2996_v63  ;;  %v2688_v32 = vpop.xlane.xlu1 %2687  ;;  %8891 = vst [vmem:[#allocation206_spill] sm:$0xff] %v7406_v46  ;;  %v3206_v62 = vsub.f32 %v8895_v47, %v5064_v29  ;;  %v8896_v30 = vld [vmem:[#allocation212_spill] sm:$0xff] }
 0x3ce   : > { %4870 = vrcp.f32 %v2996_v63  ;;  %v7409_v40 = vadd.f32 %v2738_v2, %v8892_v15  ;;  %v2744_v2 = vmul.f32 0.6931472, %v4851_v59 }
 0x3cf   : > { %v4853_v20 = vpop.eup %4852  ;;  %4872 = vlog2.f32 %v8894_v22  ;;  %v8897_v22 = vld [vmem:[#allocation35_spill] sm:$0xff] }
 0x3d0   : > { %8893 = vst [vmem:[#allocation73_spill] sm:$0xff] %v7409_v40  ;;  %v7412_v53 = vpop.eup %4854  ;;  %v2734_v28 = vmul.f32 0.6931472, %v4853_v20  ;;  %4874 = vlog2.f32 %v2998_v35  ;;  %v2682_v11 = vpop.xlane.xlu0 %2681  ;;  %v7420_v52 = vadd.f32 %v3054_v38, %v8897_v22  ;;  %v8899_v20 = vld [vmem:[#allocation41_spill] sm:$0xff]  ;;  %v8902_v38 = vld [vmem:[#allocation214_spill] sm:$0xff] }
 0x3d1   : > { %v4857_v0 = vpop.eup %4856  ;;  %4876 = vlog2.f32 %v2682_v11  ;;  %v2684_v49 = vpop.xlane.xlu1 %2683 }
 0x3d2   : > { %v4859_v63 = vpop.eup %4858  ;;  %v3174_v15 = vmul.f32 %v4857_v0, %v8896_v30  ;;  %8898 = vst [vmem:[#allocation75_spill] sm:$0xff] %v7420_v52  ;;  %v7423_v35 = vadd.f32 %v2734_v28, %v8899_v20  ;;  %4878 = vrcp.f32 %v8901_v9  ;;  %v5065_v30 = vld [vmem:[%s5880_s23 + $0x90] sm:$0xff]  ;;  %v8903_v28 = vld [vmem:[#allocation97_spill] sm:$0xff] }
 0x3d3   : > { %v4861_v41 = vpop.eup %4860  ;;  %4880 = vlog2.f32 %v2688_v32  ;;  %v3205_v22 = vsub.f32 %v8903_v28, %v5065_v30  ;;  %v2740_v13 = vmul.f32 0.6931472, %v4859_v63  ;;  %v8908_v9 = vld [vmem:[#allocation215_spill] sm:$0xff] }
 0x3d4   : > { %8900 = vst [vmem:[#allocation72_spill] sm:$0xff] %v7423_v35  ;;  %v4863_v45 = vpop.eup %4862  ;;  %v3064_v11 = vmul.f32 0.6931472, %v4861_v41  ;;  %v2678_v57 = vpop.xlane.xlu0 %2677  ;;  %v3238_v19 = vmul.f32 %v3206_v62, %v3174_v15  ;;  %v8904_v41 = vld [vmem:[#allocation122_spill] sm:$0xff]  ;;  %v8906_v62 = vld [vmem:[#allocation155_spill] sm:$0xff] }
 0x3d5   : > { %v4865_v29 = vpop.eup %4864  ;;  %4882 = vlog2.f32 %v2678_v57  ;;  %v3010_v0 = vpop.xlane.xlu1 %3009  ;;  %v3173_v47 = vmul.f32 %v4863_v45, %v8902_v38  ;;  %v7432_v32 = vadd.f32 %v2744_v2, %v8904_v41  ;;  %v5066_v45 = vld [vmem:[%s5880_s23 + $0x88] sm:$0xff]  ;;  %v8909_v38 = vld [vmem:[#allocation197_spill] sm:$0xff] }
 0x3d6   : > { %v4867_v20 = vpop.eup %4866  ;;  %4884 = vlog2.f32 %v2684_v49  ;;  %3289 = vadd.xlane.f32.xlu1 %v3238_v19  ;;  %v7435_v15 = vadd.f32 %v3064_v11, %v8906_v62  ;;  %v3204_v35 = vsub.f32 %v8909_v38, %v5066_v45  ;;  %v8910_v41 = vld [vmem:[#allocation217_spill] sm:$0xff]  ;;  %v3066_v45 = vmul.f32 0.6931472, %v4865_v29 }
 0x3d7   : > { %8905 = vst [vmem:[#allocation88_spill] sm:$0xff] %v7432_v32  ;;  %v4869_v59 = vpop.eup %4868  ;;  %4886 = vrcp.f32 %v3010_v0  ;;  %v3237_v57 = vmul.f32 %v3205_v22, %v3173_v47  ;;  %v3172_v56 = vmul.f32 %v4867_v20, %v8908_v9  ;;  %v5067_v22 = vld [vmem:[%s5880_s23 + $0x80] sm:$0xff]  ;;  %v8911_v9 = vld [vmem:[#allocation198_spill] sm:$0xff] }
 0x3d8   : > { %8907 = vst [vmem:[#allocation79_spill] sm:$0xff] %v7435_v15  ;;  %v4871_v30 = vpop.eup %4870  ;;  %v3060_v28 = vmul.f32 0.6931472, %v4869_v59  ;;  %4888 = vlog2.f32 %v3010_v0  ;;  %v3008_v49 = vpop.xlane.xlu0 %3007  ;;  %v3203_v20 = vsub.f32 %v8911_v9, %v5067_v22  ;;  %v8912_v59 = vld [vmem:[#allocation24_spill] sm:$0xff]  ;;  %v8914_v38 = vld [vmem:[#allocation29_spill] sm:$0xff] }
 0x3d9   : > { %v7442_v63 = vpop.eup %4872  ;;  %3287 = vadd.xlane.f32.xlu0 %v3237_v57  ;;  %4890 = vlog2.f32 %v3008_v49  ;;  %v3006_v2 = vpop.xlane.xlu1 %3005  ;;  %v3236_v11 = vmul.f32 %v3204_v35, %v3172_v56  ;;  %v3171_v47 = vmul.f32 %v4871_v30, %v8910_v41  ;;  %v7448_v0 = vadd.f32 %v2740_v13, %v8912_v59  ;;  %v8923_v35 = vld [vmem:[#allocation220_spill] sm:$0xff] }
 0x3da   : > { %v4875_v62 = vpop.eup %4874  ;;  %4892 = vrcp.f32 %v3008_v49  ;;  %v7451_v52 = vadd.f32 %v3060_v28, %v8914_v38  ;;  %v8916_v28 = vld [vmem:[#allocation42_spill] sm:$0xff]  ;;  %v5068_v38 = vld [vmem:[%s5880_s23 + $0xb8] sm:$0xff] }
 0x3db   : > { %8913 = vst [vmem:[#allocation177_spill] sm:$0xff] %v7448_v0  ;;  %v4877_v19 = vpop.eup %4876  ;;  %4894 = vlog2.f32 %v3006_v2  ;;  %3285 = vadd.xlane.f32.xlu1 %v3236_v11  ;;  %v3235_v57 = vmul.f32 %v3203_v20, %v3171_v47  ;;  %v3062_v29 = vmul.f32 0.6931472, %v4875_v62  ;;  %v7458_v41 = vadd.f32 %v3066_v45, %v8916_v28  ;;  %v8918_v11 = vld [vmem:[#allocation43_spill] sm:$0xff]  ;;  %v8927_v20 = vld [vmem:[#allocation54_spill] sm:$0xff] }
 0x3dc   : > { %8915 = vst [vmem:[#allocation176_spill] sm:$0xff] %v7451_v52  ;;  %v2746_v32 = vmul.f32 0.6931472, %v4877_v19  ;;  %4896 = vrcp.f32 %v3006_v2  ;;  %v3004_v56 = vpop.xlane.xlu0 %3003  ;;  %v7455_v30 = vpop.eup %4878  ;;  %v8921_v45 = vld [vmem:[#allocation127_spill] sm:$0xff] }
 0x3dd   : > { %3283 = vadd.xlane.f32.xlu0 %v3235_v57  ;;  %4898 = vlog2.f32 %v3004_v56  ;;  %v3016_v13 = vpop.xlane.xlu1 %3015  ;;  %v4881_v49 = vpop.eup %4880  ;;  %8917 = vst [vmem:[#allocation77_spill] sm:$0xff] %v7458_v41  ;;  %v8920_v57 = vld [vmem:[#allocation153_spill] sm:$0xff]  ;;  %v7468_v28 = vadd.f32 %v3062_v29, %v8921_v45  ;;  %v8931_v41 = vld [vmem:[#allocation222_spill] sm:$0xff] }
 0x3de   : > { %4900 = vrcp.f32 %v3004_v56  ;;  %v7461_v47 = vadd.f32 %v2746_v32, %v8918_v11  ;;  %v3210_v56 = vsub.f32 %v8920_v57, %v5068_v38  ;;  %v2752_v11 = vmul.f32 0.6931472, %v4881_v49  ;;  %v8928_v38 = vld [vmem:[#allocation57_spill] sm:$0xff]  ;;  %v8929_v57 = vld [vmem:[#allocation58_spill] sm:$0xff] }
 0x3df   : > { %v4883_v19 = vpop.eup %4882  ;;  %4902 = vlog2.f32 %v3016_v13  ;;  %8922 = vst [vmem:[#allocation131_spill] sm:$0xff] %v7468_v28  ;;  %v8933_v29 = vld [vmem:[#allocation201_spill] sm:$0xff] }
 0x3e0   : > { %8919 = vst [vmem:[#allocation76_spill] sm:$0xff] %v7461_v47  ;;  %v4885_v2 = vpop.eup %4884  ;;  %v2742_v22 = vmul.f32 0.6931472, %v4883_v19  ;;  %4904 = vrcp.f32 %v3016_v13  ;;  %v2690_v9 = vpop.xlane.xlu0 %2689  ;;  %v8924_v19 = vld [vmem:[#allocation31_spill] sm:$0xff]  ;;  %v8930_v47 = vld [vmem:[#allocation137_spill] sm:$0xff]  ;;  %v3207_v40 = vsub.f32 %v8933_v29, %v5070_v42 }
 0x3e1   : > { %v4887_v62 = vpop.eup %4886  ;;  %4906 = vlog2.f32 %v2690_v9  ;;  %v2696_v59 = vpop.xlane.xlu1 %2695  ;;  %v8926_v9 = vld [vmem:[#allocation53_spill] sm:$0xff] }
 0x3e2   : > { %v4889_v32 = vpop.eup %4888  ;;  %4908 = vlog2.f32 %v2696_v59  ;;  %v3178_v0 = vmul.f32 %v4887_v62, %v8923_v35  ;;  %v7472_v13 = vadd.f32 %v2742_v22, %v8924_v19  ;;  %v1664_v15 = vsub.f32 %v8927_v20, %v8926_v9  ;;  %v8932_v20 = vld [vmem:[#allocation109_spill] sm:$0xff] }
 0x3e3   : > { %v4891_v52 = vpop.eup %4890  ;;  %4910 = vlog2.f32 %v8794_v50  ;;  %v3209_v9 = vsub.f32 %v8932_v20, %v5069_v27  ;;  %v5071_v27 = vld [vmem:[%s5880_s23 + $0xa8] sm:$0xff]  ;;  %v8939_v20 = vld [vmem:[#allocation200_spill] sm:$0xff]  ;;  %v8940_v29 = vld [vmem:[#allocation81_spill] sm:$0xff] }
 0x3e4   : > { %8925 = vst [vmem:[#allocation80_spill] sm:$0xff] %v7472_v13  ;;  %v4893_v45 = vpop.eup %4892  ;;  %4912 = vrcp.f32 %v8930_v47  ;;  %v3072_v49 = vmul.f32 0.6931472, %v4891_v52  ;;  %v2686_v59 = vpop.xlane.xlu0 %2685  ;;  %v3242_v35 = vmul.f32 %v3210_v56, %v3178_v0  ;;  %v2748_v47 = vmul.f32 0.6931472, %v4885_v2  ;;  %v8934_v52 = vld [vmem:[#allocation44_spill] sm:$0xff] }
 0x3e5   : > { %v4895_v62 = vpop.eup %4894  ;;  %4914 = vlog2.f32 %v2686_v59  ;;  %v3012_v19 = vpop.xlane.xlu1 %3011  ;;  %v3177_v50 = vmul.f32 %v4893_v45, %v8931_v41  ;;  %v7488_v0 = vadd.f32 %v2752_v11, %v8934_v52  ;;  %v8936_v56 = vld [vmem:[#allocation37_spill] sm:$0xff]  ;;  %v8938_v41 = vld [vmem:[#allocation223_spill] sm:$0xff]  ;;  %v3208_v28 = vsub.f32 %v8939_v20, %v5071_v27 }
 0x3e6   : > { %v4897_v46 = vpop.eup %4896  ;;  %4916 = vlog2.f32 %v3012_v19  ;;  %3297 = vadd.xlane.f32.xlu1 %v3242_v35  ;;  %v7491_v22 = vadd.f32 %v3072_v49, %v8936_v56  ;;  %v1632_v11 = vmul.f32 %v7412_v53, %v8941_v1  ;;  %v5072_v56 = vld [vmem:[%s5880_s23 + $0xd0] sm:$0xff]  ;;  %v8946_v1 = vld [vmem:[#allocation40_spill] sm:$0xff] }
 0x3e7   : > { %8935 = vst [vmem:[#allocation195_spill] sm:$0xff] %v7488_v0  ;;  %v4899_v59 = vpop.eup %4898  ;;  %4918 = vrcp.f32 %v3012_v19  ;;  %v3241_v13 = vmul.f32 %v3209_v9, %v3177_v50  ;;  %v3176_v45 = vmul.f32 %v4897_v46, %v8938_v41  ;;  %v8942_v50 = vld [vmem:[#allocation224_spill] sm:$0xff]  ;;  %v8943_v41 = vld [vmem:[#allocation202_spill] sm:$0xff]  ;;  %v8948_v0 = vld [vmem:[#allocation159_spill] sm:$0xff] }
 0x3e8   : > { %8937 = vst [vmem:[#allocation94_spill] sm:$0xff] %v7491_v22  ;;  %v4901_v42 = vpop.eup %4900  ;;  %4920 = vrcp.f32 %v8940_v29  ;;  %v3068_v2 = vmul.f32 0.6931472, %v4899_v59  ;;  %v2698_v35 = vpop.xlane.xlu0 %2697  ;;  %v3213_v27 = vsub.f32 %v8943_v41, %v5072_v56  ;;  %v3074_v59 = vmul.f32 0.6931472, %v4889_v32  ;;  %v8944_v29 = vld [vmem:[#allocation114_spill] sm:$0xff] }
 0x3e9   : > { %v4903_v52 = vpop.eup %4902  ;;  %3295 = vadd.xlane.f32.xlu0 %v3241_v13  ;;  %4922 = vlog2.f32 %v2698_v35  ;;  %v2692_v19 = vpop.xlane.xlu1 %2691  ;;  %v3240_v46 = vmul.f32 %v3208_v28, %v3176_v45  ;;  %v3175_v9 = vmul.f32 %v4901_v42, %v8942_v50  ;;  %v7505_v12 = vadd.f32 %v2748_v47, %v8944_v29  ;;  %v5073_v45 = vld [vmem:[%s5880_s23 + $0xc0] sm:$0xff]  ;;  %v8950_v56 = vld [vmem:[#allocation18_spill] sm:$0xff] }
 0x3ea   : > { %v4905_v20 = vpop.eup %4904  ;;  %4924 = vlog2.f32 %v2692_v19  ;;  %v7508_v53 = vadd.f32 %v3068_v2, %v8946_v1  ;;  %v3080_v13 = vmul.f32 0.6931472, %v4903_v52  ;;  %v8949_v42 = vld [vmem:[#allocation205_spill] sm:$0xff]  ;;  %v1696_v41 = vmul.f32 %v1664_v15, %v1632_v11  ;;  %v8952_v1 = vld [vmem:[#allocation32_spill] sm:$0xff] }
 0x3eb   : > { %8945 = vst [vmem:[#allocation184_spill] sm:$0xff] %v7505_v12  ;;  %v4907_v49 = vpop.eup %4906  ;;  %3293 = vadd.xlane.f32.xlu1 %v3240_v46  ;;  %v3239_v35 = vmul.f32 %v3207_v40, %v3175_v9  ;;  %v3181_v28 = vmul.f32 %v4905_v20, %v8948_v0  ;;  %v3211_v50 = vsub.f32 %v8949_v42, %v5073_v45  ;;  %4926 = vrcp.f32 %v8950_v56  ;;  %v8951_v46 = vld [vmem:[#allocation163_spill] sm:$0xff]  ;;  %v8953_v15 = vld [vmem:[#allocation48_spill] sm:$0xff]  ;;  %v8964_v47 = vld [vmem:[#allocation125_spill] sm:$0xff] }
 0x3ec   : > { %8947 = vst [vmem:[#allocation183_spill] sm:$0xff] %v7508_v53  ;;  %v4909_v22 = vpop.eup %4908  ;;  %v2754_v32 = vmul.f32 0.6931472, %v4907_v49  ;;  %v2694_v19 = vpop.xlane.xlu0 %2693  ;;  %v1633_v0 = vmul.f32 %v7455_v30, %v8951_v46  ;;  %v3070_v20 = vmul.f32 0.6931472, %v4895_v62  ;;  %v7519_v49 = vadd.f32 %v3074_v59, %v8952_v1  ;;  %v7533_v56 = vld [vmem:[%s7038_s30 + $0xb0] sm:$0xff] }
 0x3ed   : > { %v4911_v29 = vpop.eup %4910  ;;  %v2760_v2 = vmul.f32 0.6931472, %v4909_v22  ;;  %3291 = vadd.xlane.f32.xlu0 %v3239_v35  ;;  %4928 = vlog2.f32 %v2694_v19  ;;  %v3018_v52 = vpop.xlane.xlu1 %3017  ;;  %v3245_v40 = vmul.f32 %v3213_v27, %v3181_v28  ;;  %v1209_v22 = vmul.f32 0.6931472, %v7442_v63  ;;  %v8954_v35 = vld [vmem:[#allocation47_spill] sm:$0xff]  ;;  %v8956_v28 = vld [vmem:[#allocation213_spill] sm:$0xff] }
 0x3ee   : > { %v4913_v9 = vpop.eup %4912  ;;  %4930 = vlog2.f32 %v3018_v52  ;;  %v7522_v11 = vadd.f32 %v2754_v32, %v8953_v15  ;;  %v7529_v30 = vadd.f32 %v3080_v13, %v8956_v28  ;;  %v1529_v62 = vmul.f32 0.6931472, %v4911_v29  ;;  %v8968_v15 = vld [vmem:[#allocation138_spill] sm:$0xff] }
 0x3ef   : > { %v4915_v45 = vpop.eup %4914  ;;  %4932 = vrcp.f32 %v3018_v52  ;;  %3303 = vadd.xlane.f32.xlu1 %v3245_v40  ;;  %v7526_v27 = vadd.f32 %v2760_v2, %v8954_v35  ;;  %v8958_v52 = vld [vmem:[#allocation5_spill] sm:$0xff]  ;;  %v8959_v2 = vld [vmem:[#allocation120_spill] sm:$0xff]  ;;  %v7548_v19 = vadd.f32 %v3070_v20, %v8964_v47 }
 0x3f0   : > { %8957 = vst [vmem:[#allocation86_spill] sm:$0xff] %v7529_v30  ;;  %v4917_v42 = vpop.eup %4916  ;;  %4934 = vlog2.f32 %v8816_v58  ;;  %v2750_v59 = vmul.f32 0.6931472, %v4915_v45  ;;  %v1747_v32 = vpop.xlane.xlu0 %1746  ;;  %v8960_v40 = vld [vmem:[#allocation117_spill] sm:$0xff]  ;;  %v8962_v58 = vsub.f32 %v8929_v57, %v8928_v38  ;;  %v8967_v38 = vld [vmem:[#allocation171_spill] sm:$0xff]  ;;  %v8969_v20 = vld [vmem:[#allocation204_spill] sm:$0xff] }
 0x3f1   : > { %8955 = vst [vmem:[#allocation103_spill] sm:$0xff] %v7526_v27  ;;  %v4919_v63 = vpop.eup %4918  ;;  %4936 = vrcp.f32 %v8958_v52  ;;  %1754 = vadd.xlane.f32.xlu0 %v1696_v41  ;;  %v8961_v46 = vsub.f32 %v8959_v2, %v8960_v40  ;;  %v3014_v1 = vpop.xlane.xlu1 %3013  ;;  %v8963_v35 = vld [vmem:[#allocation45_spill] sm:$0xff]  ;;  %v8965_v41 = vld [vmem:[#allocation210_spill] sm:$0xff]  ;;  %v1634_v57 = vmul.f32 %v4913_v9, %v8967_v38  ;;  %v1567_v27 = vadd.f32 %v1529_v62, %v8968_v15 }
 0x3f2   : > { %v1697_v29 = vmul.f32 %v8962_v58, %v1633_v0  ;;  %v4921_v45 = vpop.eup %4920  ;;  %4938 = vlog2.f32 %v3014_v1  ;;  %v3179_v28 = vmul.f32 %v4919_v63, %v8963_v35  ;;  %v7551_v52 = vadd.f32 %v2750_v59, %v8965_v41  ;;  %v8970_v63 = vld [vmem:[#allocation62_spill] sm:$0xff] }
 0x3f3   : > { %v1820_v13 = vsub.f32 %v1747_v32, %v8961_v46  ;;  %v4923_v2 = vpop.eup %4922  ;;  %v3076_v32 = vmul.f32 0.6931472, %v4917_v42  ;;  %4940 = vrcp.f32 %v3014_v1  ;;  %v8973_v62 = vld [vmem:[#allocation174_spill] sm:$0xff] }
 0x3f4   : > { %8966 = vst [vmem:[#allocation89_spill] sm:$0xff] %v7551_v52  ;;  %v4925_v0 = vpop.eup %4924  ;;  %v2706_v46 = vpop.xlane.xlu0 %2705  ;;  %v3243_v58 = vmul.f32 %v3211_v50, %v3179_v28  ;;  %4942 = vlog2.f32 %v8969_v20  ;;  %v2762_v9 = vmul.f32 0.6931472, %v4923_v2  ;;  %v8972_v50 = vld [vmem:[#allocation136_spill] sm:$0xff]  ;;  %v1635_v15 = vmul.f32 %v4921_v45, %v8973_v62  ;;  %v8980_v62 = vld [vmem:[#allocation157_spill] sm:$0xff] }
 0x3f5   : > { %v7554_v40 = vmul.f32 %v1820_v13, %v7533_v56  ;;  %v2756_v59 = vmul.f32 0.6931472, %v4925_v0  ;;  %1756 = vadd.xlane.f32.xlu0 %v1697_v29  ;;  %v7561_v42 = vpop.xlane.xlu1 %3023  ;;  %v8971_v13 = vld [vmem:[#allocation65_spill] sm:$0xff]  ;;  %v4927_v35 = vpop.eup %4926  ;;  %v1247_v28 = vadd.f32 %v1209_v22, %v8972_v50  ;;  %v8976_v29 = vld [vmem:[#allocation216_spill] sm:$0xff] }
 0x3f6   : > { %v1666_v1 = vsub.f32 %v8971_v13, %v8970_v63  ;;  %3299 = vadd.xlane.f32.xlu1 %v3243_v58  ;;  %4944 = vrcp.f32 %v7561_v42  ;;  %v8974_v0 = vld [vmem:[#allocation209_spill] sm:$0xff]  ;;  %v7572_v47 = vadd.f32 %v3076_v32, %v8976_v29  ;;  %v8978_v22 = vld [vmem:[#allocation68_spill] sm:$0xff]  ;;  %v8979_v13 = vld [vmem:[#allocation67_spill] sm:$0xff] }
 0x3f7   : > { %v4929_v41 = vpop.eup %4928  ;;  %v7569_v20 = vadd.f32 %v2756_v59, %v8974_v0  ;;  %4946 = vlog2.f32 %v8831_v26  ;;  %v7576_v63 = vld [vmem:[%s7038_s30 + $0xc0] sm:$0xff]  ;;  %v1791_v58 = vsub.f32 %v1567_v27, %v1247_v28  ;;  %v1667_v45 = vsub.f32 %v8979_v13, %v8978_v22  ;;  %v5074_v50 = vld [vmem:[%s5880_s23 + $0xd8] sm:$0xff]  ;;  %v8982_v0 = vld [vmem:[#allocation87_spill] sm:$0xff] }
 0x3f8   : > { %v1698_v38 = vmul.f32 %v1666_v1, %v1634_v57  ;;  %v4931_v30 = vpop.eup %4930  ;;  %8977 = vst [vmem:[#allocation160_spill] sm:$0xff] %v7576_v63  ;;  %v1751_v2 = vpop.xlane.xlu0 %1750  ;;  %v3214_v12 = vsub.f32 %v8980_v62, %v5074_v50  ;;  %v8981_v59 = vld [vmem:[#allocation17_spill] sm:$0xff]  ;;  %v8984_v26 = vld [vmem:[#allocation170_spill] sm:$0xff] }
 0x3f9   : > { %8975 = vst [vmem:[#allocation199_spill] sm:$0xff] %v7569_v20  ;;  %v4933_v57 = vpop.eup %4932  ;;  %v3082_v1 = vmul.f32 0.6931472, %v4931_v30  ;;  %v8983_v32 = vsub.f32 %v8981_v59, %v8982_v0  ;;  %v3020_v53 = vpop.xlane.xlu1 %3019  ;;  %v1636_v52 = vmul.f32 %v4927_v35, %v8984_v26  ;;  %v1699_v22 = vmul.f32 %v1667_v45, %v1635_v15  ;;  %v8985_v50 = vld [vmem:[#allocation218_spill] sm:$0xff]  ;;  %v8989_v45 = vld [vmem:[#allocation61_spill] sm:$0xff]  ;;  %v8992_v20 = vld [vmem:[#allocation203_spill] sm:$0xff] }
 0x3fa   : > { %1758 = vadd.xlane.f32.xlu0 %v1698_v38  ;;  %v4935_v28 = vpop.eup %4934  ;;  %4948 = vlog2.f32 %v3020_v53  ;;  %v3182_v13 = vmul.f32 %v4933_v57, %v7123_v23  ;;  %v7590_v62 = vadd.f32 %v2762_v9, %v8985_v50  ;;  %v2758_v38 = vmul.f32 0.6931472, %v4929_v41  ;;  %v7600_v26 = vld [vmem:[%s7038_s30 + $0xc8] sm:$0xff]  ;;  %v8990_v9 = vld [vmem:[#allocation64_spill] sm:$0xff] }
 0x3fb   : > { %v1822_v29 = vsub.f32 %v1751_v2, %v8983_v32  ;;  %v4937_v30 = vpop.eup %4936  ;;  %4950 = vrcp.f32 %v3020_v53  ;;  %v8986_v2 = vld [vmem:[#allocation211_spill] sm:$0xff]  ;;  %v8987_v32 = vld [vmem:[#allocation156_spill] sm:$0xff]  ;;  %8988 = vst [vmem:[#allocation78_spill] sm:$0xff] %v7600_v26  ;;  %v1668_v57 = vsub.f32 %v8990_v9, %v8989_v45 }
 0x3fc   : > { %v7596_v0 = vadd.f32 %v3082_v1, %v8986_v2  ;;  %v4939_v35 = vpop.eup %4938  ;;  %4952 = vlog2.f32 %v8987_v32  ;;  %v1753_v15 = vpop.xlane.xlu0 %1752  ;;  %v3246_v23 = vmul.f32 %v3214_v12, %v3182_v13  ;;  %v8991_v32 = vld [vmem:[#allocation46_spill] sm:$0xff] }
 0x3fd   : > { %v7593_v59 = vmul.f32 %v1822_v29, %v7576_v63  ;;  %v4941_v50 = vpop.eup %4940  ;;  %v3078_v41 = vmul.f32 0.6931472, %v4939_v35  ;;  %4954 = vlog2.f32 %v2706_v46  ;;  %v1823_v29 = vsub.f32 %v1753_v15, %v1791_v58  ;;  %v2700_v53 = vpop.xlane.xlu1 %2699  ;;  %v5075_v63 = vld [vmem:[%s5880_s23 + $0xc8] sm:$0xff]  ;;  %v8993_v35 = vld [vmem:[#allocation172_spill] sm:$0xff]  ;;  %v8994_v58 = vld [vmem:[#allocation173_spill] sm:$0xff] }
 0x3fe   : > { %1760 = vadd.xlane.f32.xlu0 %v1699_v22  ;;  %4956 = vlog2.f32 %v2700_v53  ;;  %3305 = vadd.xlane.f32.xlu1 %v3246_v23  ;;  %v1700_v2 = vmul.f32 %v1668_v57, %v1636_v52  ;;  %v3180_v27 = vmul.f32 %v4941_v50, %v8991_v32  ;;  %v3212_v12 = vsub.f32 %v8992_v20, %v5075_v63  ;;  %v4943_v13 = vpop.eup %4942  ;;  %v8995_v15 = vld [vmem:[#allocation219_spill] sm:$0xff]  ;;  %v8997_v53 = vld [vmem:[#allocation66_spill] sm:$0xff] }
 0x3ff   : > { %v7610_v45 = vmul.f32 %v1823_v29, %v7600_v26  ;;  %v1637_v46 = vmul.f32 %v4937_v30, %v8993_v35  ;;  %v7614_v22 = vadd.f32 %v3078_v41, %v8994_v58  ;;  %v7617_v9 = vadd.f32 %v2758_v38, %v8995_v15  ;;  %v8996_v63 = vld [vmem:[#allocation63_spill] sm:$0xff]  ;;  %v8999_v15 = vld [vmem:[#allocation128_spill] sm:$0xff] }
 0x400   : > { %v1521_v23 = vmul.f32 0.6931472, %v4935_v28  ;;  %v2702_v52 = vpop.xlane.xlu0 %2701  ;;  %v3244_v57 = vmul.f32 %v3212_v12, %v3180_v27  ;;  %v4945_v50 = vpop.eup %4944  ;;  %v1669_v29 = vsub.f32 %v8997_v53, %v8996_v63  ;;  %v1201_v41 = vmul.f32 0.6931472, %v4943_v13  ;;  %v5076_v28 = vld [vmem:[%s5880_s23 + $0xf0] sm:$0xff]  ;;  %v9000_v13 = vld [vmem:[#allocation124_spill] sm:$0xff] }
 0x401   : > { %4958 = vlog2.f32 %v2702_v52  ;;  %v3026_v20 = vpop.xlane.xlu1 %3025  ;;  %v4947_v32 = vpop.eup %4946  ;;  %v3185_v38 = vmul.f32 %v4945_v50, %v7166_v33  ;;  %v8998_v35 = vld [vmem:[#allocation207_spill] sm:$0xff]  ;;  %v5077_v50 = vld [vmem:[%s5880_s23 + $0xe0] sm:$0xff] }
 0x402   : > { %1762 = vadd.xlane.f32.xlu0 %v1700_v2  ;;  %4960 = vlog2.f32 %v3026_v20  ;;  %3301 = vadd.xlane.f32.xlu1 %v3244_v57  ;;  %v3217_v27 = vsub.f32 %v8998_v35, %v5076_v28  ;;  %v1701_v12 = vmul.f32 %v1669_v29, %v1637_v46  ;;  %v1563_v52 = vadd.f32 %v1521_v23, %v8999_v15  ;;  %v9001_v30 = vld [vmem:[#allocation7_spill] sm:$0xff] }
 0x403   : > { %4962 = vrcp.f32 %v3026_v20  ;;  %v1243_v57 = vadd.f32 %v1201_v41, %v9000_v13  ;;  %v3215_v28 = vsub.f32 %v9001_v30, %v5077_v50  ;;  %v1525_v23 = vmul.f32 0.6931472, %v4947_v32  ;;  %v9004_v13 = vld [vmem:[#allocation121_spill] sm:$0xff] }
 0x404   : > { %v4949_v58 = vpop.eup %4948  ;;  %v3249_v2 = vmul.f32 %v3217_v27, %v3185_v38 }
 0x405   : > { %v4951_v1 = vpop.eup %4950  ;;  %v3022_v63 = vpop.xlane.xlu1 %3021  ;;  %v3084_v29 = vmul.f32 0.6931472, %v4949_v58  ;;  %v1787_v35 = vsub.f32 %v1563_v52, %v1243_v57  ;;  %v9003_v58 = vld [vmem:[#allocation190_spill] sm:$0xff]  ;;  %v1565_v57 = vadd.f32 %v1525_v23, %v9004_v13  ;;  %v9007_v23 = vld [vmem:[#allocation181_spill] sm:$0xff] }
 0x406   : > { %1764 = vadd.xlane.f32.xlu0 %v1701_v12  ;;  %v4953_v53 = vpop.eup %4952  ;;  %4964 = vlog2.f32 %v3022_v63  ;;  %3311 = vadd.xlane.f32.xlu1 %v3249_v2  ;;  %v3183_v33 = vmul.f32 %v4951_v1, %v7186_v51  ;;  %v7632_v12 = vld [vmem:[%s7038_s30 + $0xa8] sm:$0xff] }
 0x407   : > { %v4955_v46 = vpop.eup %4954  ;;  %4966 = vrcp.f32 %v3022_v63  ;;  %v1205_v26 = vmul.f32 0.6931472, %v4953_v53  ;;  %v9002_v2 = vld [vmem:[#allocation178_spill] sm:$0xff]  ;;  %v7639_v63 = vadd.f32 %v3084_v29, %v9003_v58 }
 0x408   : > { %v4957_v38 = vpop.eup %4956  ;;  %v3247_v20 = vmul.f32 %v3215_v28, %v3183_v33  ;;  %4968 = vlog2.f32 %v7561_v42  ;;  %v2770_v1 = vmul.f32 0.6931472, %v4955_v46  ;;  %v9005_v28 = vld [vmem:[#allocation118_spill] sm:$0xff] }
 0x409   : > { %v2764_v27 = vmul.f32 0.6931472, %v4957_v38  ;;  %v1745_v15 = vpop.xlane.xlu1 %1744  ;;  %v1245_v46 = vadd.f32 %v1205_v26, %v9005_v28 }
 0x40a   : > { %v1819_v41 = vsub.f32 %v1745_v15, %v1787_v35  ;;  %3307 = vadd.xlane.f32.xlu1 %v3247_v20  ;;  %v9006_v20 = vld [vmem:[#allocation180_spill] sm:$0xff] }
 0x40b   : > { %v4959_v51 = vpop.eup %4958  ;;  %v7636_v30 = vadd.f32 %v2764_v27, %v9002_v2  ;;  %v7649_v27 = vadd.f32 %v2770_v1, %v9006_v20  ;;  %v1906_v2 = vsel %vm1862_vm0, %v7554_v40, 0.0  ;;  %v1789_v58 = vsub.f32 %v1565_v57, %v1245_v46  ;;  %v9008_v40 = vld [vmem:[#allocation179_spill] sm:$0xff] }
 0x40c   : > { %v4961_v32 = vpop.eup %4960  ;;  %v1851_v52 = vmul.f32 %v1819_v41, %v7632_v12  ;;  %v2766_v35 = vmul.f32 0.6931472, %v4959_v51 }
 0x40d   : > { %v3090_v33 = vmul.f32 0.6931472, %v4961_v32  ;;  %v2704_v50 = vpop.xlane.xlu1 %2703  ;;  %v3343_v42 = vsub.f32 %v7639_v63, %v7636_v30  ;;  %v4963_v38 = vpop.eup %4962 }
 0x40e   : > { %v1904_v53 = vsel %vm1862_vm0, %v1851_v52, 0.0  ;;  %4970 = vlog2.f32 %v2704_v50  ;;  %v7658_v52 = vld [vmem:[%s7038_s30 + $0xb8] sm:$0xff]  ;;  %v7667_v57 = vadd.f32 %v2766_v35, %v9008_v40 }
 0x40f   : > { %v1905_v29 = vadd.f32 %v1904_v53, %v7278_v16  ;;  %v7652_v15 = vadd.f32 %v3090_v33, %v9007_v23  ;;  %4972 = vlog2.f32 %v7280_v48  ;;  %v5078_v48 = vld [vmem:[%s5880_s23 + $0xe8] sm:$0xff]  ;;  %v9009_v53 = vld [vmem:[#allocation185_spill] sm:$0xff]  ;;  %v3186_v23 = vmul.f32 %v4963_v38, %v7216_v4 }
 0x410   : > { %v4965_v41 = vpop.eup %4964  ;;  %4974 = vlog2.f32 %v7251_v8  ;;  %v3216_v50 = vsub.f32 %v8810_v55, %v5078_v48  ;;  %v9010_v55 = vld [vmem:[#allocation123_spill] sm:$0xff] }
 0x411   : > { %v4967_v32 = vpop.eup %4966  ;;  %v3086_v26 = vmul.f32 0.6931472, %v4965_v41  ;;  %v1749_v51 = vpop.xlane.xlu1 %1748  ;;  %v1907_v16 = vadd.f32 %v1906_v2, %v1905_v29  ;;  %v3346_v1 = vsub.f32 %v7652_v15, %v7649_v27  ;;  %v5079_v41 = vld [vmem:[%s5880_s23 + $0xf8] sm:$0xff]  ;;  %4976 = vlog2.f32 %v7284_v24  ;;  %v9011_v24 = vld [vmem:[#allocation175_spill] sm:$0xff] }
 0x412   : > { %v1821_v13 = vsub.f32 %v1749_v51, %v1789_v58  ;;  %v3184_v33 = vmul.f32 %v4967_v32, %v7230_v43  ;;  %v4969_v46 = vpop.eup %4968  ;;  %v3218_v2 = vsub.f32 %v9010_v55, %v5079_v41  ;;  %4978 = vlog2.f32 %v7263_v54 }
 0x413   : > { %v7670_v28 = vadd.f32 %v3086_v26, %v9009_v53  ;;  %v3088_v35 = vmul.f32 0.6931472, %v4969_v46  ;;  %v1910_v26 = vsel %vm1862_vm0, %v7593_v59, 0.0  ;;  %4980 = vlog2.f32 %v7275_v60  ;;  %v9012_v59 = vld [vmem:[#allocation221_spill] sm:$0xff]  ;;  %v9013_v53 = vld [vmem:[#allocation135_spill] sm:$0xff] }
 0x414   : > { %v1853_v29 = vmul.f32 %v1821_v13, %v7658_v52  ;;  %v3248_v20 = vmul.f32 %v3216_v50, %v3184_v33  ;;  %v3250_v51 = vmul.f32 %v3218_v2, %v3186_v23  ;;  %v1912_v33 = vsel %vm1862_vm0, %v7610_v45, 0.0  ;;  %v9014_v23 = vld [vmem:[#allocation26_spill] sm:$0xff] }
 0x415   : > { %v3344_v8 = vsub.f32 %v7670_v28, %v7667_v57  ;;  %4982 = vlog2.f32 %v7267_v10  ;;  %v7693_v50 = vadd.f32 %v3088_v35, %v9012_v59 }
 0x416   : > { %v1908_v43 = vsel %vm1862_vm0, %v1853_v29, 0.0  ;;  %3309 = vadd.xlane.f32.xlu1 %v3248_v20  ;;  %4984 = vlog2.f32 %v7293_v3 }
 0x417   : > { %v1909_v58 = vadd.f32 %v1908_v43, %v1907_v16  ;;  %4986 = vlog2.f32 %v7272_v17 }
 0x418   : > { %v4971_v32 = vpop.eup %4970  ;;  %4988 = vlog2.f32 %v7302_v61 }
 0x419   : > { %v2768_v4 = vmul.f32 0.6931472, %v4971_v32  ;;  %v1911_v38 = vadd.f32 %v1910_v26, %v1909_v58  ;;  %v4973_v13 = vpop.eup %4972  ;;  %4990 = vlog2.f32 %v7296_v18  ;;  %v9018_v18 = vld [vmem:[#allocation99_spill] sm:$0xff] }
 0x41a   : > { %3313 = vadd.xlane.f32.xlu1 %v3250_v51  ;;  %v4975_v54 = vpop.eup %4974  ;;  %v2708_v40 = vmul.f32 0.6931472, %v4973_v13  ;;  %4992 = vlog2.f32 %v7286_v31  ;;  %v5080_v13 = vld [vmem:[%s7038_s30] sm:$0xff] }
 0x41b   : > { %v7687_v16 = vadd.f32 %v1912_v33, %v1911_v38  ;;  %v7690_v48 = vadd.f32 %v2768_v4, %v9011_v24  ;;  %v3028_v45 = vmul.f32 0.6931472, %v4975_v54  ;;  %v4977_v46 = vpop.eup %4976  ;;  %v9015_v24 = vld [vmem:[#allocation93_spill] sm:$0xff]  ;;  %4994 = vlog2.f32 %v7350_v25  ;;  %v9016_v54 = vld [vmem:[#allocation74_spill] sm:$0xff] }
 0x41c   : > { %v2771_v10 = vadd.f32 %v2708_v40, %v9013_v53  ;;  %v4979_v20 = vpop.eup %4978  ;;  %v3034_v2 = vmul.f32 0.6931472, %v4977_v46  ;;  %4996 = vlog2.f32 %v7282_v21  ;;  %v9019_v46 = vld [vmem:[#allocation6_spill] sm:$0xff] }
 0x41d   : > { %v3345_v60 = vsub.f32 %v7693_v50, %v7690_v48  ;;  %v3091_v43 = vadd.f32 %v3028_v45, %v9014_v23  ;;  %v4981_v41 = vpop.eup %4980  ;;  %v2714_v32 = vmul.f32 0.6931472, %v4979_v20  ;;  %v9017_v45 = vld [vmem:[#allocation105_spill] sm:$0xff]  ;;  %4998 = vlog2.f32 %v7309_v37 }
 0x41e   : > { %v2712_v26 = vmul.f32 0.6931472, %v4981_v41  ;;  %v3094_v59 = vadd.f32 %v3034_v2, %v9015_v24  ;;  %5000 = vlog2.f32 %v7322_v14 }
 0x41f   : > { %v4983_v55 = vpop.eup %4982  ;;  %v3315_v3 = vsub.f32 %v3091_v43, %v2771_v10  ;;  %v2774_v53 = vadd.f32 %v2714_v32, %v9017_v45  ;;  %5002 = vlog2.f32 %v7304_v34 }
 0x420   : > { %v4985_v35 = vpop.eup %4984  ;;  %v3032_v4 = vmul.f32 0.6931472, %v4983_v55  ;;  %v2773_v40 = vadd.f32 %v2712_v26, %v9016_v54  ;;  %v9020_v55 = vld [vmem:[#allocation14_spill] sm:$0xff] }
 0x421   : > { %v3256_v29 = vpop.xlane.xlu0 %3255  ;;  %v4987_v51 = vpop.eup %4986  ;;  %v3030_v38 = vmul.f32 0.6931472, %v4985_v35  ;;  %v3318_v31 = vsub.f32 %v3094_v59, %v2774_v53  ;;  %v5083_v59 = vld [vmem:[%s7038_s30 + $0x8] sm:$0xff]  ;;  %v9021_v53 = vld [vmem:[#allocation33_spill] sm:$0xff] }
 0x422   : > { %v2710_v61 = vmul.f32 0.6931472, %v4987_v51  ;;  %v3093_v10 = vadd.f32 %v3032_v4, %v9018_v18  ;;  %v4989_v43 = vpop.eup %4988 }
 0x423   : > { %v3092_v20 = vadd.f32 %v3030_v38, %v9019_v46  ;;  %v4991_v37 = vpop.eup %4990  ;;  %v2718_v32 = vmul.f32 0.6931472, %v4989_v43  ;;  %v9022_v46 = vsub.f32 %v7331_v6, %v7328_v44 }
 0x424   : > { %v3317_v25 = vsub.f32 %v3093_v10, %v2773_v40  ;;  %v2772_v21 = vadd.f32 %v2710_v61, %v9020_v55  ;;  %v3038_v14 = vmul.f32 0.6931472, %v4991_v37 }
 0x425   : > { %v3252_v58 = vpop.xlane.xlu0 %3251  ;;  %v2776_v18 = vadd.f32 %v2718_v32, %v9021_v53 }
 0x426   : > { %v3347_v17 = vsub.f32 %v3252_v58, %v3315_v3  ;;  %v3349_v2 = vsub.f32 %v3256_v29, %v3317_v25  ;;  %v5081_v3 = vld [vmem:[%s7038_s30 + $0x18] sm:$0xff]  ;;  %v3316_v58 = vsub.f32 %v3092_v20, %v2772_v21  ;;  %v5084_v21 = vld [vmem:[%s7038_s30 + $0x30] sm:$0xff] }
 0x428   : > { %v3379_v33 = vmul.f32 %v5080_v13, %v3347_v17  ;;  %v4993_v17 = vpop.eup %4992  ;;  %v5082_v13 = vld [vmem:[%s7038_s30 + $0x10] sm:$0xff] }
 0x429   : > { %v4995_v4 = vpop.eup %4994  ;;  %v3381_v24 = vmul.f32 %v5082_v13, %v3349_v2  ;;  %v2722_v29 = vmul.f32 0.6931472, %v4993_v17 }
 0x42a   : > { %v4997_v38 = vpop.eup %4996  ;;  %v2730_v10 = vmul.f32 0.6931472, %v4995_v4  ;;  %v3411_v34 = vsel %vm1862_vm0, %v3379_v33, 0.0  ;;  %v9025_v4 = vld [vmem:[#allocation16_spill] sm:$0xff] }
 0x42b   : > { %v4999_v54 = vpop.eup %4998  ;;  %v3414_v55 = vsel %vm1862_vm0, %v3381_v24, 0.0 }
 0x42c   : > { %v5001_v25 = vpop.eup %5000  ;;  %v2782_v44 = vadd.f32 %v2730_v10, %v9025_v4 }
 0x42d   : > { %v3258_v23 = vpop.xlane.xlu1 %3257  ;;  %v5003_v6 = vpop.eup %5002 }
 0x42e   : > { %v3350_v41 = vsub.f32 %v3258_v23, %v3318_v31  ;;  %v3042_v23 = vmul.f32 0.6931472, %v4997_v38  ;;  %v3048_v38 = vmul.f32 0.6931472, %v5001_v25  ;;  %v2728_v53 = vmul.f32 0.6931472, %v5003_v6 }
 0x430   : > { %v3382_v35 = vmul.f32 %v5081_v3, %v3350_v41  ;;  %v3050_v41 = vmul.f32 0.6931472, %v4999_v54  ;;  %v9023_v3 = vld [vmem:[#allocation13_spill] sm:$0xff]  ;;  %v9027_v54 = vld [vmem:[#allocation111_spill] sm:$0xff] }
 0x431   : > { %v3254_v26 = vpop.xlane.xlu1 %3253 }
 0x432   : > { %v3348_v51 = vsub.f32 %v3254_v26, %v3316_v58  ;;  %v3096_v58 = vadd.f32 %v3038_v14, %v9023_v3  ;;  %v3416_v33 = vsel %vm1862_vm0, %v3382_v35, 0.0  ;;  %v9024_v26 = vld [vmem:[#allocation15_spill] sm:$0xff]  ;;  %v3102_v14 = vadd.f32 %v3050_v41, %v9027_v54  ;;  %v5087_v3 = vld [vmem:[%s7038_s30 + $0x58] sm:$0xff] }
 0x433   : > { %v2778_v17 = vadd.f32 %v2722_v29, %v9024_v26  ;;  %v9028_v35 = vsub.f32 %v7348_v7, %v7345_v5 }
 0x434   : > { %v3380_v61 = vmul.f32 %v5083_v59, %v3348_v51  ;;  %v3320_v51 = vsub.f32 %v3096_v58, %v2776_v18  ;;  %v9026_v59 = vld [vmem:[#allocation84_spill] sm:$0xff]  ;;  %v3326_v18 = vsub.f32 %v3102_v14, %v2782_v44  ;;  %v5090_v14 = vld [vmem:[%s7038_s30 + $0x50] sm:$0xff] }
 0x435   : > { %v3266_v40 = vpop.xlane.xlu1 %3265  ;;  %v3098_v24 = vadd.f32 %v3042_v23, %v9026_v59  ;;  %v5086_v23 = vld [vmem:[%s7038_s30 + $0x20] sm:$0xff]  ;;  %v5089_v59 = vld [vmem:[%s7038_s30 + $0x48] sm:$0xff] }
 0x436   : > { %v3264_v45 = vpop.xlane.xlu0 %3263  ;;  %v3412_v31 = vsel %vm1862_vm0, %v3380_v61, 0.0 }
 0x437   : > { %v3353_v20 = vsub.f32 %v3264_v45, %v9022_v46  ;;  %v3413_v43 = vadd.f32 %v3412_v31, %v3411_v34  ;;  %v3322_v34 = vsub.f32 %v3098_v24, %v2778_v17  ;;  %v9029_v31 = vld [vmem:[#allocation96_spill] sm:$0xff] }
 0x438   : > { %v3101_v46 = vadd.f32 %v3048_v38, %v9029_v31 }
 0x439   : > { %v3385_v2 = vmul.f32 %v5084_v21, %v3353_v20  ;;  %v3415_v37 = vadd.f32 %v3414_v55, %v3413_v43  ;;  %v3262_v32 = vpop.xlane.xlu1 %3261  ;;  %v3354_v20 = vsub.f32 %v3266_v40, %v3322_v34  ;;  %v5085_v43 = vld [vmem:[%s7038_s30 + $0x28] sm:$0xff]  ;;  %v9031_v40 = vsub.f32 %v7361_v39, %v7358_v36  ;;  %v9033_v36 = vld [vmem:[#allocation55_spill] sm:$0xff] }
 0x43a   : > { %v3352_v61 = vsub.f32 %v3262_v32, %v3320_v51 }
 0x43b   : > { %v3417_v13 = vadd.f32 %v3416_v33, %v3415_v37  ;;  %v9030_v37 = vld [vmem:[#allocation28_spill] sm:$0xff]  ;;  %v3422_v38 = vsel %vm1862_vm0, %v3385_v2, 0.0 }
 0x43c   : > { %v3384_v25 = vmul.f32 %v5085_v43, %v3352_v61  ;;  %v2781_v32 = vadd.f32 %v2728_v53, %v9030_v37  ;;  %v5088_v33 = vld [vmem:[%s7038_s30 + $0x38] sm:$0xff] }
 0x43d   : > { %v3386_v26 = vmul.f32 %v5088_v33, %v3354_v20 }
 0x43e   : > { %v3260_v45 = vpop.xlane.xlu0 %3259  ;;  %v3420_v17 = vsel %vm1862_vm0, %v3384_v25, 0.0  ;;  %v3325_v4 = vsub.f32 %v3101_v46, %v2781_v32  ;;  %v5092_v32 = vld [vmem:[%s7038_s30 + $0x78] sm:$0xff] }
 0x43f   : > { %v3351_v29 = vsub.f32 %v3260_v45, %v9028_v35  ;;  %v3274_v10 = vpop.xlane.xlu1 %3273  ;;  %v9032_v35 = vld [vmem:[#allocation56_spill] sm:$0xff] }
 0x440   : > { %v3358_v21 = vsub.f32 %v3274_v10, %v3326_v18  ;;  %v9034_v39 = vsub.f32 %v9032_v35, %v9033_v36  ;;  %v5091_v18 = vld [vmem:[%s7038_s30 + $0x40] sm:$0xff] }
 0x441   : > { %v3383_v55 = vmul.f32 %v5086_v23, %v3351_v29  ;;  %v9035_v23 = vld [vmem:[#allocation206_spill] sm:$0xff]  ;;  %v5095_v35 = vld [vmem:[%s7038_s30 + $0x60] sm:$0xff] }
 0x442   : > { %v3390_v58 = vmul.f32 %v5087_v3, %v3358_v21 }
 0x443   : > { %v3418_v41 = vsel %vm1862_vm0, %v3383_v55, 0.0  ;;  %v3270_v7 = vpop.xlane.xlu1 %3269  ;;  %v9036_v55 = vld [vmem:[#allocation73_spill] sm:$0xff] }
 0x444   : > { %v3419_v5 = vadd.f32 %v3418_v41, %v3417_v13  ;;  %v3356_v51 = vsub.f32 %v3270_v7, %v9031_v40  ;;  %v3424_v13 = vsel %vm1862_vm0, %v3386_v26, 0.0  ;;  %v9037_v21 = vsub.f32 %v9035_v23, %v9036_v55  ;;  %v9038_v26 = vld [vmem:[#allocation192_spill] sm:$0xff] }
 0x445   : > { %v3272_v6 = vpop.xlane.xlu0 %3271  ;;  %v3432_v37 = vsel %vm1862_vm0, %v3390_v58, 0.0  ;;  %v9044_v58 = vld [vmem:[#allocation71_spill] sm:$0xff] }
 0x446   : > { %v3421_v44 = vadd.f32 %v3420_v17, %v3419_v5  ;;  %v3388_v24 = vmul.f32 %v5089_v59, %v3356_v51  ;;  %v3357_v61 = vsub.f32 %v3272_v6, %v3325_v4  ;;  %v9039_v17 = vld [vmem:[#allocation69_spill] sm:$0xff]  ;;  %v9042_v59 = vld [vmem:[#allocation72_spill] sm:$0xff] }
 0x447   : > { %v9040_v40 = vsub.f32 %v9038_v26, %v9039_v17 }
 0x448   : > { %v3423_v54 = vadd.f32 %v3422_v38, %v3421_v44  ;;  %v3389_v45 = vmul.f32 %v5090_v14, %v3357_v61  ;;  %v3428_v46 = vsel %vm1862_vm0, %v3388_v24, 0.0  ;;  %v5093_v44 = vld [vmem:[%s7038_s30 + $0x70] sm:$0xff] }
 0x449   : > { %v9041_v38 = vld [vmem:[#allocation75_spill] sm:$0xff] }
 0x44a   : > { %v3425_v53 = vadd.f32 %v3424_v13, %v3423_v54  ;;  %v3268_v34 = vpop.xlane.xlu0 %3267  ;;  %v3430_v43 = vsel %vm1862_vm0, %v3389_v45, 0.0  ;;  %v9043_v24 = vsub.f32 %v9041_v38, %v9042_v59  ;;  %v5094_v13 = vld [vmem:[%s7038_s30 + $0x68] sm:$0xff] }
 0x44b   : > { %v3355_v29 = vsub.f32 %v3268_v34, %v9034_v39  ;;  %v9045_v45 = vld [vmem:[#allocation70_spill] sm:$0xff] }
 0x44d   : > { %v3387_v10 = vmul.f32 %v5091_v18, %v3355_v29 }
 0x44f   : > { %v3426_v2 = vsel %vm1862_vm0, %v3387_v10, 0.0 }
 0x450   : > { %v3427_v31 = vadd.f32 %v3426_v2, %v3425_v53  ;;  %v9046_v53 = vsub.f32 %v9044_v58, %v9045_v45  ;;  %v9059_v58 = vld [vmem:[#allocation208_spill] sm:$0xff]  ;;  %v5099_v45 = vld [vmem:[%s7038_s30 + $0x80] sm:$0xff] }
 0x451   : > { %5004 = vlog2.f32 %v9059_v58  ;;  %v9073_v58 = vld [vmem:[#allocation86_spill] sm:$0xff] }
 0x452   : > { %v3429_v20 = vadd.f32 %v3428_v46, %v3427_v31  ;;  %v3282_v25 = vpop.xlane.xlu1 %3281  ;;  %v9047_v46 = vld [vmem:[#allocation77_spill] sm:$0xff] }
 0x453   : > { %v3362_v41 = vsub.f32 %v3282_v25, %v9037_v21  ;;  %v5096_v21 = vld [vmem:[%s7038_s30 + $0x98] sm:$0xff] }
 0x454   : > { %v3431_v3 = vadd.f32 %v3430_v43, %v3429_v20  ;;  %v9048_v20 = vld [vmem:[#allocation76_spill] sm:$0xff] }
 0x455   : > { %v3394_v5 = vmul.f32 %v5092_v32, %v3362_v41  ;;  %v9049_v43 = vsub.f32 %v9047_v46, %v9048_v20  ;;  %v9050_v32 = vld [vmem:[#allocation79_spill] sm:$0xff] }
 0x456   : > { %v3280_v7 = vpop.xlane.xlu0 %3279  ;;  %v3433_v33 = vadd.f32 %v3432_v37, %v3431_v3 }
 0x457   : > { %v3361_v51 = vsub.f32 %v3280_v7, %v9040_v40  ;;  %v3440_v55 = vsel %vm1862_vm0, %v3394_v5, 0.0  ;;  %v9051_v7 = vld [vmem:[#allocation88_spill] sm:$0xff]  ;;  %v5097_v40 = vld [vmem:[%s7038_s30 + $0x90] sm:$0xff]  ;;  %v9057_v5 = vld [vmem:[#allocation177_spill] sm:$0xff] }
 0x458   : > { %v3278_v4 = vpop.xlane.xlu1 %3277 }
 0x459   : > { %v3393_v6 = vmul.f32 %v5093_v44, %v3361_v51  ;;  %v3360_v61 = vsub.f32 %v3278_v4, %v9043_v24  ;;  %v9053_v4 = vld [vmem:[#allocation131_spill] sm:$0xff]  ;;  %v9054_v44 = vld [vmem:[#allocation80_spill] sm:$0xff]  ;;  %v5098_v24 = vld [vmem:[%s7038_s30 + $0x88] sm:$0xff] }
 0x45a   : > { %v3276_v54 = vpop.xlane.xlu0 %3275 }
 0x45b   : > { %v3392_v14 = vmul.f32 %v5094_v13, %v3360_v61  ;;  %v3359_v34 = vsub.f32 %v3276_v54, %v9046_v53  ;;  %v3438_v2 = vsel %vm1862_vm0, %v3393_v6, 0.0  ;;  %v9055_v6 = vsub.f32 %v9053_v4, %v9054_v44  ;;  %v9056_v54 = vld [vmem:[#allocation176_spill] sm:$0xff] }
 0x45c   : > { %v9058_v13 = vsub.f32 %v9056_v54, %v9057_v5  ;;  %v318_v54 = vld [vmem:[%s7038_s30 + $0xd0] sm:$0xff] }
 0x45d   : > { %v3391_v36 = vmul.f32 %v5095_v35, %v3359_v34  ;;  %v3436_v18 = vsel %vm1862_vm0, %v3392_v14, 0.0  ;;  %v9060_v34 = vld [vmem:[#allocation126_spill] sm:$0xff] }
 0x45e   : > { %5006 = vlog2.f32 %v9060_v34 }
 0x45f   : > { %v3434_v39 = vsel %vm1862_vm0, %v3391_v36, 0.0 }
 0x460   : > { %v3435_v29 = vadd.f32 %v3434_v39, %v3433_v33  ;;  %v9052_v33 = vsub.f32 %v9050_v32, %v9051_v7  ;;  %v9065_v32 = vld [vmem:[#allocation195_spill] sm:$0xff] }
 0x462   : > { %v3437_v10 = vadd.f32 %v3436_v18, %v3435_v29 }
 0x463   : > { %v3290_v31 = vpop.xlane.xlu1 %3289 }
 0x464   : > { %v3366_v25 = vsub.f32 %v3290_v31, %v9049_v43  ;;  %v3439_v23 = vadd.f32 %v3438_v2, %v3437_v10  ;;  %v9061_v2 = vld [vmem:[#allocation81_spill] sm:$0xff]  ;;  %v9062_v31 = vsub.f32 %v7519_v49, %v7522_v11 }
 0x465   : > { %5008 = vlog2.f32 %v9061_v2 }
 0x466   : > { %v3398_v41 = vmul.f32 %v5096_v21, %v3366_v25  ;;  %v3288_v3 = vpop.xlane.xlu0 %3287  ;;  %v3441_v37 = vadd.f32 %v3440_v55, %v3439_v23  ;;  %v5005_v25 = vpop.eup %5004  ;;  %v9063_v23 = vld [vmem:[#allocation10_spill] sm:$0xff] }
 0x467   : > { %v3365_v26 = vsub.f32 %v3288_v3, %v9052_v33  ;;  %5010 = vlog2.f32 %v9063_v23  ;;  %v1533_v49 = vmul.f32 0.6931472, %v5005_v25 }
 0x468   : > { %v3286_v17 = vpop.xlane.xlu1 %3285  ;;  %v3448_v43 = vsel %vm1862_vm0, %v3398_v41, 0.0  ;;  %v9067_v41 = vld [vmem:[#allocation89_spill] sm:$0xff] }
 0x469   : > { %v3397_v51 = vmul.f32 %v5097_v40, %v3365_v26  ;;  %v3364_v38 = vsub.f32 %v3286_v17, %v9055_v6  ;;  %v5007_v26 = vpop.eup %5006  ;;  %v9068_v40 = vsub.f32 %v7548_v19, %v9067_v41  ;;  %v9069_v6 = vld [vmem:[#allocation183_spill] sm:$0xff]  ;;  %v9076_v19 = vld [vmem:[#allocation133_spill] sm:$0xff] }
 0x46a   : > { %v3284_v59 = vpop.xlane.xlu0 %3283  ;;  %v1213_v44 = vmul.f32 0.6931472, %v5007_v26  ;;  %v1569_v34 = vadd.f32 %v1533_v49, %v9076_v19  ;;  %v9089_v19 = vld [vmem:[#allocation154_spill] sm:$0xff] }
 0x46b   : > { %v3396_v61 = vmul.f32 %v5098_v24, %v3364_v38  ;;  %v3363_v14 = vsub.f32 %v3284_v59, %v9058_v13  ;;  %v3446_v18 = vsel %vm1862_vm0, %v3397_v51, 0.0  ;;  %v9070_v38 = vld [vmem:[#allocation184_spill] sm:$0xff]  ;;  %v5100_v13 = vld [vmem:[%s7038_s30 + $0xa0] sm:$0xff] }
 0x46c   : > { %v9071_v59 = vsub.f32 %v9069_v6, %v9070_v38 }
 0x46d   : > { %v3395_v53 = vmul.f32 %v5099_v45, %v3363_v14  ;;  %v3444_v39 = vsel %vm1862_vm0, %v3396_v61, 0.0  ;;  %v9072_v61 = vld [vmem:[#allocation5_spill] sm:$0xff] }
 0x46e   : > { %5012 = vlog2.f32 %v9072_v61 }
 0x46f   : > { %v3442_v35 = vsel %vm1862_vm0, %v3395_v53, 0.0 }
 0x470   : > { %v3443_v36 = vadd.f32 %v3442_v35, %v3441_v37  ;;  %v9064_v37 = vld [vmem:[#allocation94_spill] sm:$0xff]  ;;  %v5009_v35 = vpop.eup %5008 }
 0x471   : > { %v9066_v7 = vsub.f32 %v9064_v37, %v9065_v32  ;;  %v1537_v23 = vmul.f32 0.6931472, %v5009_v35 }
 0x472   : > { %v3445_v29 = vadd.f32 %v3444_v39, %v3443_v36  ;;  %v9077_v36 = vld [vmem:[#allocation9_spill] sm:$0xff] }
 0x473   : > { %v3298_v10 = vpop.xlane.xlu1 %3297  ;;  %5014 = vlog2.f32 %v9077_v36 }
 0x474   : > { %v3370_v46 = vsub.f32 %v3298_v10, %v9062_v31  ;;  %v3447_v20 = vadd.f32 %v3446_v18, %v3445_v29  ;;  %v9078_v18 = vld [vmem:[#allocation132_spill] sm:$0xff]  ;;  %v9079_v10 = vld [vmem:[#allocation129_spill] sm:$0xff] }
 0x475   : > { %v9080_v2 = vsub.f32 %v9078_v18, %v9079_v10 }
 0x476   : > { %v3402_v55 = vmul.f32 %v3370_v46, %v7658_v52  ;;  %v3296_v21 = vpop.xlane.xlu0 %3295  ;;  %v3449_v3 = vadd.f32 %v3448_v43, %v3447_v20  ;;  %v9081_v46 = vld [vmem:[#allocation130_spill] sm:$0xff]  ;;  %v5011_v43 = vpop.eup %5010 }
 0x477   : > { %v3369_v33 = vsub.f32 %v3296_v21, %v9066_v7  ;;  %v1249_v20 = vadd.f32 %v1213_v44, %v9081_v46 }
 0x478   : > { %v3294_v17 = vpop.xlane.xlu1 %3293  ;;  %v3456_v38 = vsel %vm1862_vm0, %v3402_v55, 0.0 }
 0x479   : > { %v3401_v11 = vmul.f32 %v3369_v33, %v7533_v56  ;;  %v3368_v51 = vsub.f32 %v3294_v17, %v9068_v40  ;;  %v9074_v56 = vld [vmem:[#allocation103_spill] sm:$0xff]  ;;  %v1793_v32 = vsub.f32 %v1569_v34, %v1249_v20  ;;  %v319_v33 = vld [vmem:[%s7038_s30 + $0xd8] sm:$0xff]  ;;  %v1217_v17 = vmul.f32 0.6931472, %v5011_v43 }
 0x47a   : > { %v3292_v4 = vpop.xlane.xlu0 %3291  ;;  %v9075_v45 = vsub.f32 %v9073_v58, %v9074_v56 }
 0x47b   : > { %v3400_v52 = vmul.f32 %v3368_v51, %v7632_v12  ;;  %v3367_v24 = vsub.f32 %v3292_v4, %v9071_v59  ;;  %v3454_v49 = vsel %vm1862_vm0, %v3401_v11, 0.0  ;;  %v1251_v34 = vadd.f32 %v1217_v17, %v9089_v19 }
 0x47c   : > { %v3304_v5 = vpop.xlane.xlu1 %3303 }
 0x47d   : > { %v3399_v14 = vmul.f32 %v5100_v13, %v3367_v24  ;;  %v3373_v53 = vsub.f32 %v3304_v5, %v9075_v45  ;;  %v3452_v21 = vsel %vm1862_vm0, %v3400_v52, 0.0  ;;  %v9084_v24 = vld [vmem:[#allocation169_spill] sm:$0xff]  ;;  %v9085_v5 = vld [vmem:[#allocation160_spill] sm:$0xff] }
 0x47e   : > { %v1755_v12 = vpop.xlane.xlu0 %1754  ;;  %v1571_v61 = vadd.f32 %v1537_v23, %v9084_v24  ;;  %v9087_v45 = vld [vmem:[#allocation12_spill] sm:$0xff] }
 0x47f   : > { %v3450_v39 = vsel %vm1862_vm0, %v3399_v14, 0.0  ;;  %v7827_v29 = vmul.f32 %v3373_v53, %v318_v54  ;;  %v1824_v31 = vsub.f32 %v1755_v12, %v9080_v2  ;;  %v320_v14 = vld [vmem:[%s7038_s30 + $0xe0] sm:$0xff]  ;;  %v321_v2 = vld [vmem:[%s7038_s30 + $0xe8] sm:$0xff] }
 0x480   : > { %v3451_v25 = vadd.f32 %v3450_v39, %v3449_v3  ;;  %v9082_v3 = vld [vmem:[#allocation199_spill] sm:$0xff]  ;;  %v1795_v10 = vsub.f32 %v1571_v61, %v1251_v34 }
 0x481   : > { %v1856_v37 = vmul.f32 %v1824_v31, %v318_v54  ;;  %v9083_v44 = vsub.f32 %v7572_v47, %v9082_v3  ;;  %v5013_v54 = vpop.eup %5012 }
 0x482   : > { %v3453_v7 = vadd.f32 %v3452_v21, %v3451_v25  ;;  %v1757_v26 = vpop.xlane.xlu0 %1756  ;;  %v5015_v35 = vpop.eup %5014  ;;  %v1541_v12 = vmul.f32 0.6931472, %v5013_v54  ;;  %v9090_v21 = vsub.f32 %v7596_v0, %v7590_v62  ;;  %v9096_v62 = vsub.f32 %v7614_v22, %v7617_v9  ;;  %v9097_v54 = vld [vmem:[#allocation78_spill] sm:$0xff] }
 0x483   : > { %v1914_v41 = vsel %vm1862_vm0, %v1856_v37, 0.0  ;;  %v1825_v40 = vsub.f32 %v1757_v26, %v1793_v32  ;;  %v3300_v51 = vpop.xlane.xlu1 %3299  ;;  %v1221_v46 = vmul.f32 0.6931472, %v5015_v35  ;;  %v3462_v9 = vsel %vm1862_vm0, %v7827_v29, 0.0 }
 0x484   : > { %v1915_v4 = vadd.f32 %v1914_v41, %v7687_v16  ;;  %v3371_v6 = vsub.f32 %v3300_v51, %v9083_v44  ;;  %v3455_v52 = vadd.f32 %v3454_v49, %v3453_v7  ;;  %v9086_v16 = vld [vmem:[#allocation25_spill] sm:$0xff]  ;;  %v9091_v7 = vld [vmem:[#allocation148_spill] sm:$0xff]  ;;  %v322_v49 = vld [vmem:[%s7038_s30 + $0xf0] sm:$0xff] }
 0x485   : > { %v1857_v59 = vmul.f32 %v1825_v40, %v319_v33  ;;  %v9088_v53 = vsub.f32 %v9086_v16, %v9087_v45  ;;  %v1573_v26 = vadd.f32 %v1541_v12, %v9091_v7  ;;  %v9092_v51 = vld [vmem:[#allocation19_spill] sm:$0xff] }
 0x486   : > { %v3403_v11 = vmul.f32 %v3371_v6, %v9085_v5  ;;  %v3457_v13 = vadd.f32 %v3456_v38, %v3455_v52  ;;  %v9095_v52 = vld [vmem:[#allocation144_spill] sm:$0xff] }
 0x487   : > { %v1759_v58 = vpop.xlane.xlu0 %1758  ;;  %v1916_v56 = vsel %vm1862_vm0, %v1857_v59, 0.0  ;;  %v1253_v38 = vadd.f32 %v1221_v46, %v9095_v52  ;;  %v323_v5 = vld [vmem:[%s7038_s30 + $0xf8] sm:$0xff] }
 0x488   : > { %v1826_v47 = vsub.f32 %v1759_v58, %v9088_v53  ;;  %v1917_v55 = vadd.f32 %v1916_v56, %v1915_v4  ;;  %v3458_v36 = vsel %vm1862_vm0, %v3403_v11, 0.0  ;;  %v9093_v4 = vld [vmem:[#allocation20_spill] sm:$0xff] }
 0x489   : > { %v3459_v39 = vadd.f32 %v3458_v36, %v3457_v13  ;;  %v9094_v3 = vsub.f32 %v9092_v51, %v9093_v4  ;;  %v1797_v61 = vsub.f32 %v1573_v26, %v1253_v38 }
 0x48a   : > { %v1858_v18 = vmul.f32 %v1826_v47, %v320_v14 }
 0x48b   : > { %v1761_v31 = vpop.xlane.xlu0 %1760  ;;  %v3306_v25 = vpop.xlane.xlu1 %3305 }
 0x48c   : > { %v1918_v20 = vsel %vm1862_vm0, %v1858_v18, 0.0  ;;  %v1827_v43 = vsub.f32 %v1761_v31, %v1795_v10  ;;  %v3374_v37 = vsub.f32 %v3306_v25, %v9090_v21 }
 0x48d   : > { %v1919_v23 = vadd.f32 %v1918_v20, %v1917_v55 }
 0x48e   : > { %v1859_v32 = vmul.f32 %v1827_v43, %v321_v2  ;;  %v3406_v17 = vmul.f32 %v3374_v37, %v319_v33 }
 0x48f   : > { %v1763_v41 = vpop.xlane.xlu0 %1762  ;;  %v3302_v6 = vpop.xlane.xlu1 %3301 }
 0x490   : > { %v1920_v40 = vsel %vm1862_vm0, %v1859_v32, 0.0  ;;  %v1828_v44 = vsub.f32 %v1763_v41, %v9094_v3  ;;  %v3372_v0 = vsub.f32 %v3302_v6, %v9096_v62  ;;  %v3464_v36 = vsel %vm1862_vm0, %v3406_v17, 0.0 }
 0x491   : > { %v1921_v59 = vadd.f32 %v1920_v40, %v1919_v23 }
 0x492   : > { %v1860_v24 = vmul.f32 %v1828_v44, %v322_v49  ;;  %v3404_v33 = vmul.f32 %v3372_v0, %v9097_v54 }
 0x493   : > { %v1765_v11 = vpop.xlane.xlu0 %1764  ;;  %v3312_v56 = vpop.xlane.xlu1 %3311 }
 0x494   : > { %v1922_v13 = vsel %vm1862_vm0, %v1860_v24, 0.0  ;;  %v1829_v58 = vsub.f32 %v1765_v11, %v1797_v61  ;;  %v3460_v45 = vsel %vm1862_vm0, %v3404_v33, 0.0  ;;  %v3377_v53 = vsub.f32 %v3312_v56, %v3345_v60 }
 0x495   : > { %v1923_v16 = vadd.f32 %v1922_v13, %v1921_v59  ;;  %v3461_v47 = vadd.f32 %v3460_v45, %v3459_v39 }
 0x496   : > { %v1861_v22 = vmul.f32 %v1829_v58, %v323_v5  ;;  %v3409_v19 = vmul.f32 %v3377_v53, %v322_v49 }
 0x497   : > { %v3463_v34 = vadd.f32 %v3462_v9, %v3461_v47  ;;  %v3308_v55 = vpop.xlane.xlu1 %3307 }
 0x498   : > { %v1924_v35 = vsel %vm1862_vm0, %v1861_v22, 0.0  ;;  %v3375_v12 = vsub.f32 %v3308_v55, %v3343_v42 }
 0x499   : > { %v1925_v18 = vadd.f32 %v1924_v35, %v1923_v16  ;;  %v3465_v10 = vadd.f32 %v3464_v36, %v3463_v34 }
 0x49a   : > { %v3407_v48 = vmul.f32 %v3375_v12, %v320_v14  ;;  %v3470_v14 = vsel %vm1862_vm0, %v3409_v19, 0.0 }
 0x49b   : > { %1926 = vadd.xlane.f32.xlu0 %v1925_v18 }
 0x49c   : > { %v3466_v50 = vsel %vm1862_vm0, %v3407_v48, 0.0 }
 0x49d   : > { %v3467_v60 = vadd.f32 %v3466_v50, %v3465_v10 }
 0x4a3   : > { %v3310_v29 = vpop.xlane.xlu1 %3309 }
 0x4a4   : > { %v3376_v39 = vsub.f32 %v3310_v29, %v3344_v8 }
 0x4a6   : > { %v3408_v31 = vmul.f32 %v3376_v39, %v321_v2 }
 0x4a7   : > { %v3314_v46 = vpop.xlane.xlu1 %3313 }
 0x4a8   : > { %v3468_v30 = vsel %vm1862_vm0, %v3408_v31, 0.0  ;;  %v3378_v63 = vsub.f32 %v3314_v46, %v3346_v1 }
 0x4a9   : > { %v3469_v42 = vadd.f32 %v3468_v30, %v3467_v60 }
 0x4aa   : > { %v3410_v20 = vmul.f32 %v3378_v63, %v323_v5 }
 0x4ab   : > { %v3471_v43 = vadd.f32 %v3470_v14, %v3469_v42 }
 0x4ac   : > { %v3472_v25 = vsel %vm1862_vm0, %v3410_v20, 0.0 }
 0x4ad   : > { %v3473_v23 = vadd.f32 %v3472_v25, %v3471_v43 }
 0x4af   : > { %3474 = vadd.xlane.f32.xlu1 %v3473_v23 }
 0x4b0   : > { %5114 = shalt.err (!%p5111_p3)
}
 0x4b1   : > { %s5115_s16 = scalar_lea.hbm %s7894_s9, 4096  ;;  %s5119_s7 = scalar_lea.hbm %s7951_s4, 8192 }
 0x4b2   : > { %p5116_p4 = scmp.ne.s32.totalorder %s7894_s9, %s5115_s16  ;;  %p5120_p9 = scmp.lt.u32.totalorder %s7894_s9, %s7951_s4 }
 0x4b3   : > { %p5121_p10 = scmp.lt.u32.totalorder %s5119_s7, %s5115_s16  ;;  %p5123_p12 = scmp.lt.u32.totalorder %s5115_s16, %s7894_s9 }
 0x4b4   : > { %p5117_p7 = pnand %p5116_p4, %p5236_p5 }
 0x4b5   : > { %p5122_p11 = por %p5121_p10, %p5120_p9 }
 0x4b6   : > { %p5118_p8 = pneg %p5117_p7 }
 0x4b7   : > { %p5124_p13 = por %p5123_p12, %p5122_p11 }
 0x4b9   : > { %p5125_p0 = pnand %p5124_p13, %p5118_p8 }
 0x4bb   : > { %5128 = shalt.err (!%p5125_p0)
}
 0x4bc   : > { %s5166_s14 = smov 128   ;;  %s5167_s6 = smov 8   ;;  %v3515_v41 = vlaneseq }
 0x4bd   : > { %4031 = dma.vmem_to_hbm [thread:$0]  (%p5236_p5), %s7897_s10, 4096, %s7894_s9, %s7901_s11, %s5166_s14, %s5166_s14, %s5167_s6  }
 0x4be   : > { %p255_p1 = scmp.lt.s32.totalorder %s5219_s22, 1  ;;  %v3516_v40 = vshrl.u32 %v3515_v41, 7 }
 0x4c0   : > { %s9105_s22 = smov (!%p255_p1, %s5219_s22), 1  ;;  %vm3517_vm1 = vcmp.eq.s32.totalorder %v3516_v40, 0  ;;  %vm3520_vm2 = vcmp.eq.s32.totalorder %v3516_v40, 1 }
 0x4c1   : > { %s3652_s8 = sshll.u32 %s9105_s22, 3 }
 0x4c2   : > { %s258_s11 = scalar_lea.vmem %s7952_s5, %s3652_s8 }
 0x528   : > { %v1927_v27 = vpop.xlane.xlu0 %1926 }
 0x529   : > { %v1928_v15 = vrot.slane %v1927_v27, 4 }
 0x52b   : > { %v1929_v1 = vadd.f32 %v1928_v15, %v1927_v27 }
 0x52d   : > { %v1930_v57 = vrot.slane %v1929_v1, 2 }
 0x52f   : > { %v1931_v28 = vadd.f32 %v1930_v57, %v1929_v1 }
 0x531   : > { %v1932_v8 = vrot.slane %v1931_v28, 1 }
 0x533   : > { %v1933_v2 = vadd.f32 %v1932_v8, %v1931_v28 }
 0x535   : > { %4027 = vpush %v1933_v2 }
 0x53c   : > { %v3475_v21 = vpop.xlane.xlu1 %3474 }
 0x53d   : > { %v3476_v37 = vrot.slane %v3475_v21, 4 }
 0x53f   : > { %v3477_v32 = vadd.f32 %v3476_v37, %v3475_v21 }
 0x541   : > { %v3478_v7 = vrot.slane %v3477_v32, 2 }
 0x543   : > { %v3479_v26 = vadd.f32 %v3478_v7, %v3477_v32 }
 0x545   : > { %v3480_v17 = vrot.slane %v3479_v26, 1 }
 0x547   : > { %v3481_v49 = vadd.f32 %v3480_v17, %v3479_v26 }
 0x549   : > { %4029 = vpush %v3481_v49 }
 0x566   : > { %s4028_s28 = spop %4027 }
 0x567   : > { %v3518_v51 = vstv %s4028_s28 }
 0x568   : > { %v3519_v4 = vsel %vm3517_vm1, %v3518_v51, 0.0 }
 0x57a   : > { %s4030_s12 = spop %4029 }
 0x57b   : > { %v3521_v3 = vstv %s4030_s12 }
 0x57c   : > { %v3522_v44 = vsel %vm3520_vm2, %v3521_v3, %v3519_v4 }
 0x57d   : > { %3523 = vst [vmem:[%s258_s11] sm:$0xff] %v3522_v44 }
 0x57e PF: > { %p4037_p5 = scmp.ge.s32.totalorder %s5163_s21, 2  ;;  %s3560_s13 = sand.u32 1, %s5151_s18  }
 0x57f   : > { %s3561_s22 = scalar_lea.sflag [#allocation3], %s3560_s13 }
 0x580   : > { %p4034_p2 = pnand %p4037_p5, %p5240_p6 }
 0x582   : > { %5146 = dma.done.wait (!%p4034_p2), %s3561_s22, 4096  }
 0x583   : > { %5148 = vsyncadd (!%p4034_p2), %s3561_s22, 4294963200  ;;  %p16_p3 = scmp.ge.s32.totalorder %s5223_s24, 4   ;;  %s9098_s18 = smov %s5155_s19 }
 0x584   : > { %s9099_s19 = smov %s5159_s20  ;;  %s9100_s20 = smov %s5234_s27 }
 0x585   : > { %s9101_s21 = smov %s5223_s24  ;;  %18 = sbr.rel (!%p16_p3) target bundleno = 3 (0x3), region = 88 }
 0x58c   :  { %3573 = vsyncpa [#allocation3], 1 }
 0x58d   :  { %3575 = vsyncpa [#allocation3 + $0x1], 1 }

</bundles_post_ra>
